<compile_context>
chip_gen: v6e
topology: v6e:2x2x1
jax: 0.10.0
libtpu: 0.0.40
codegen_flags: <defaults>
</compile_context>

<pallas_src>
import math

import numpy as np
import jax
import jax.numpy as jnp
from jax.experimental import pallas as pl
from jax.experimental.pallas import tpu as pltpu

_BN_EPS = 1e-5


# ---------------------------------------------------------------------------
# Static geometry of the stem
# ---------------------------------------------------------------------------
def _stem_geometry(img_size, in_dim, out_dim):
    specs = [
        (in_dim,       out_dim // 8, 2, 1, True),
        (out_dim // 8, out_dim // 4, 2, 1, True),
        (out_dim // 4, out_dim // 2, 1, 1, True),
        (out_dim // 2, out_dim,      1, 1, True),
        (out_dim,      out_dim,      1, 0, False),   # last conv: BN, no act
    ]
    geom, h = [], img_size
    for cin, cout, stride, pad, relu in specs:
        hp = h + 2 * pad                       # padded input height/width
        ho = (hp - 3) // stride + 1            # output height/width
        geom.append(dict(cin=cin, cout=cout, stride=stride, pad=pad,
                         hin=h, hp=hp, ho=ho, relu=relu))
        h = ho
    return geom


# ---------------------------------------------------------------------------
# Host-side weight transforms (done once at parameter-build time)
# ---------------------------------------------------------------------------
def _toeplitz_weights(w, scale, wp, wo, stride):
    """Banded weight matrix for the row-major (H, W*C) layout.

    T[kh, wi*Cin + ci, j*Cout + co] = scale[co] * w[co, ci, kh, kw]
    where wi = j*stride + kw, zero elsewhere.  One matmul per kh then computes
    a full conv row (window over W and the channel contraction in one shot).
    """
    cout, cin, _, _ = w.shape
    t = np.zeros((3, wp, cin, wo, cout), np.float32)
    wk = np.transpose(w, (2, 3, 1, 0)) * scale[None, None, None, :]  # (kh,kw,ci,co)
    for kh in range(3):
        for kw in range(3):
            for j in range(wo):
                t[kh, j * stride + kw, :, j, :] = wk[kh, kw]
    return t.reshape(3, wp * cin, wo * cout)


def _row_select(ho, hp, stride):
    """0/1 matrices S[kh] (ho, hp) picking padded input rows i*stride + kh."""
    s = np.zeros((3, ho, hp), np.float32)
    idx = np.arange(ho)
    for kh in range(3):
        s[kh, idx, idx * stride + kh] = 1.0
    return s


def build_stem_params(seed, img_size=32, in_dim=3, out_dim=64):
    geom = _stem_geometry(img_size, in_dim, out_dim)
    keys = jax.random.split(jax.random.PRNGKey(seed), len(geom))
    layers, toeps, sels, shift_rows = [], [], [], []
    for k, g in zip(keys, geom):
        cin, cout = g["cin"], g["cout"]
        # deterministic kaiming-normal, zero bias, eval-mode BN folded
        w = jax.random.normal(k, (cout, cin, 3, 3), jnp.float32) * math.sqrt(
            2.0 / (cin * 9))
        bias = jnp.zeros((cout,), jnp.float32)
        scale = jnp.ones((cout,), jnp.float32) / jnp.sqrt(1.0 + _BN_EPS)
        shift = bias * scale   # (bias - running_mean) * scale + beta
        layers.append({"w": w, "scale": scale, "shift": shift})

        w_np = np.asarray(w, np.float32)
        sc_np = np.asarray(scale, np.float32)
        sh_np = np.asarray(shift, np.float32)
        toeps.append(jnp.asarray(
            _toeplitz_weights(w_np, sc_np, g["hp"], g["ho"], g["stride"]),
            jnp.bfloat16))
        if g["stride"] == 2:
            sels.append(jnp.asarray(
                _row_select(g["ho"], g["hp"], g["stride"]), jnp.bfloat16))
        shift_rows.append(jnp.asarray(np.tile(sh_np, g["ho"])[None, :],
                                      jnp.float32))
    return {"geom": geom, "layers": layers, "T": toeps, "S": sels,
            "shift_rows": shift_rows}


# ---------------------------------------------------------------------------
# The fused Pallas kernel (all 5 convs, intermediates in VMEM scratch)
# ---------------------------------------------------------------------------
def _make_stem_kernel(geom):
    n_layers = len(geom)
    n_s2 = sum(1 for g in geom if g["stride"] == 2)

    def kernel(*refs):
        x_ref = refs[0]
        s_refs = refs[1:1 + n_s2]
        t_refs = refs[1 + n_s2:1 + n_s2 + n_layers]
        b_refs = refs[1 + n_s2 + n_layers:1 + n_s2 + 2 * n_layers]
        o_ref = refs[1 + n_s2 + 2 * n_layers]
        scratch = refs[2 + n_s2 + 2 * n_layers:]

        # Zero the scratch buffers whose borders implement the next layer's
        # zero padding (interiors are fully overwritten below).
        for z in range(n_layers - 1):
            if geom[z + 1]["pad"] > 0:
                scratch[z][...] = jnp.zeros(scratch[z].shape, scratch[z].dtype)

        si = 0
        for l, g in enumerate(geom):
            ho, cout, stride = g["ho"], g["cout"], g["stride"]
            t_ref, b_ref = t_refs[l], b_refs[l]
            acc = None
            if stride == 2:
                # Stride-2 row sub-sampling via a tiny 0/1 selection matmul
                # (exact; avoids any strided VMEM access), then the banded
                # weight matmul on the MXU with f32 accumulation.
                x2d = x_ref[0] if l == 0 else scratch[l - 1][...]
                s_ref = s_refs[si]
                si += 1
                for kh in range(3):
                    rows = jnp.dot(s_ref[kh], x2d,
                                   preferred_element_type=jnp.float32)
                    rows = rows.astype(jnp.bfloat16)      # exact row copies
                    c = jnp.dot(rows, t_ref[kh],
                                preferred_element_type=jnp.float32)
                    acc = c if acc is None else acc + c
            else:
                # Stride-1: contiguous row window [kh, kh+ho) of the padded
                # input slab, one banded matmul per kh.
                for kh in range(3):
                    if l == 0:
                        lhs = x_ref[0, pl.ds(kh, ho), :]
                    else:
                        lhs = scratch[l - 1][pl.ds(kh, ho), :]
                    c = jnp.dot(lhs, t_ref[kh],
                                preferred_element_type=jnp.float32)
                    acc = c if acc is None else acc + c

            y = acc + b_ref[...]          # folded BN shift (f32 epilogue)
            if g["relu"]:
                y = jnp.maximum(y, 0.0)

            if l == n_layers - 1:
                o_ref[0] = y.astype(o_ref.dtype)
            else:
                dst = scratch[l]
                p_next = geom[l + 1]["pad"]
                if p_next > 0:
                    dst[pl.ds(p_next, ho),
                        pl.ds(p_next * cout, ho * cout)] = y.astype(dst.dtype)
                else:
                    dst[...] = y.astype(dst.dtype)

    return kernel


def stem_forward(params, x_nchw):
    geom = params["geom"]
    g0, g_last = geom[0], geom[-1]
    B = x_nchw.shape[0]
    hp0, cin0, p0 = g0["hp"], g0["cin"], g0["pad"]
    ho_l, cout_l = g_last["ho"], g_last["cout"]

    # Single layout conversion: NCHW -> spatially padded row-major
    # (B, Hp, Wp*Cin) bf16 slab; all 5 layers stay in this layout in VMEM.
    xr = jnp.pad(x_nchw, ((0, 0), (0, 0), (p0, p0), (p0, p0)))
    xr = xr.transpose(0, 2, 3, 1).reshape(B, hp0, hp0 * cin0).astype(jnp.bfloat16)

    def const_map(ndim):
        zeros = (0,) * ndim
        return lambda b: zeros

    in_specs = [pl.BlockSpec((1, hp0, hp0 * cin0), lambda b: (b, 0, 0))]
    args = [xr]
    for a in list(params["S"]) + list(params["T"]) + list(params["shift_rows"]):
        in_specs.append(pl.BlockSpec(a.shape, const_map(a.ndim)))
        args.append(a)

    scratch_shapes = []
    for l in range(len(geom) - 1):
        ho, cout = geom[l]["ho"], geom[l]["cout"]
        p_next = geom[l + 1]["pad"]
        hp = ho + 2 * p_next
        scratch_shapes.append(pltpu.VMEM((hp, hp * cout), jnp.bfloat16))

    out = pl.pallas_call(
        _make_stem_kernel(geom),
        grid=(B,),
        in_specs=in_specs,
        out_specs=pl.BlockSpec((1, ho_l, ho_l * cout_l), lambda b: (b, 0, 0)),
        out_shape=jax.ShapeDtypeStruct((B, ho_l, ho_l * cout_l), jnp.float32),
        scratch_shapes=scratch_shapes,
        compiler_params=pltpu.CompilerParams(
            dimension_semantics=("parallel",),          # v7x: 2 TCs, 1 batch each
            vmem_limit_bytes=32 * 1024 * 1024),
    )(*args)

    # (B, Ho, Wo*Cout) -> NCHW, once at the end.
    return out.reshape(B, ho_l, ho_l, cout_l).transpose(0, 3, 1, 2)


# ---------------------------------------------------------------------------
# Pure-JAX reference (f32) for correctness
# ---------------------------------------------------------------------------
def stem_reference(params, x):
    y = x
    for p, g in zip(params["layers"], params["geom"]):
        y = jax.lax.conv_general_dilated(
            y, p["w"], window_strides=(g["stride"], g["stride"]),
            padding=[(g["pad"], g["pad"]), (g["pad"], g["pad"])],
            dimension_numbers=("NCHW", "OIHW", "NCHW"),
            precision=jax.lax.Precision.HIGHEST)
        y = y * p["scale"][None, :, None, None] + p["shift"][None, :, None, None]
        if g["relu"]:
            y = jnp.maximum(y, 0.0)
    return y


# ---------------------------------------------------------------------------
if __name__ == "__main__":
    B, img_size, in_dim, out_dim = 2, 32, 3, 64   # small config of Stem_tiny

    params = build_stem_params(0, img_size, in_dim, out_dim)
    x = jax.random.normal(jax.random.PRNGKey(0),
                          (B, in_dim, img_size, img_size), jnp.float32)

    out = stem_forward(params, x)
    out = jax.block_until_ready(out)

    g_last = params["geom"][-1]
    assert out.shape == (B, out_dim, g_last["ho"], g_last["ho"]), out.shape

    ref = jax.block_until_ready(stem_reference(params, x))
    max_err = float(jnp.max(jnp.abs(out - ref)))
    # bf16 MXU operands with f32 accumulation: errors are O(1e-2) here.
    assert max_err < 0.5, f"max abs err vs f32 reference: {max_err}"

    print("KERNEL_OK")
</pallas_src>

<mosaic_0001>
module attributes {stable_mosaic.version = 11 : i64} {
  func.func @kernel(%arg0: i32, %arg1: memref<1x34x102xbf16, #tpu.memory_space<vmem>>, %arg2: memref<3x16x34xbf16, #tpu.memory_space<vmem>>, %arg3: memref<3x8x18xbf16, #tpu.memory_space<vmem>>, %arg4: memref<3x102x128xbf16, #tpu.memory_space<vmem>>, %arg5: memref<3x144x128xbf16, #tpu.memory_space<vmem>>, %arg6: memref<3x160x256xbf16, #tpu.memory_space<vmem>>, %arg7: memref<3x320x512xbf16, #tpu.memory_space<vmem>>, %arg8: memref<3x512x384xbf16, #tpu.memory_space<vmem>>, %arg9: memref<1x128xf32, #tpu.memory_space<vmem>>, %arg10: memref<1x128xf32, #tpu.memory_space<vmem>>, %arg11: memref<1x256xf32, #tpu.memory_space<vmem>>, %arg12: memref<1x512xf32, #tpu.memory_space<vmem>>, %arg13: memref<1x384xf32, #tpu.memory_space<vmem>>, %arg14: memref<1x6x384xf32, #tpu.memory_space<vmem>>, %arg15: memref<18x144xbf16, #tpu.memory_space<vmem>>, %arg16: memref<10x160xbf16, #tpu.memory_space<vmem>>, %arg17: memref<10x320xbf16, #tpu.memory_space<vmem>>, %arg18: memref<8x512xbf16, #tpu.memory_space<vmem>>) attributes {dimension_semantics = [#tpu.dimension_semantics<parallel>], iteration_bounds = array<i64: 2>, scalar_prefetch = 0 : i64, scratch_operands = 4 : i64, tpu.core_type = #tpu.core_type<tc>, window_params = [{transform_indices = @transform_0, window_bounds = array<i64: 1, 34, 102>}, {pipeline_mode = #tpu.pipeline_mode<synchronous>, transform_indices = @transform_1, window_bounds = array<i64: 3, 16, 34>}, {pipeline_mode = #tpu.pipeline_mode<synchronous>, transform_indices = @transform_2, window_bounds = array<i64: 3, 8, 18>}, {pipeline_mode = #tpu.pipeline_mode<synchronous>, transform_indices = @transform_3, window_bounds = array<i64: 3, 102, 128>}, {pipeline_mode = #tpu.pipeline_mode<synchronous>, transform_indices = @transform_4, window_bounds = array<i64: 3, 144, 128>}, {pipeline_mode = #tpu.pipeline_mode<synchronous>, transform_indices = @transform_5, window_bounds = array<i64: 3, 160, 256>}, {pipeline_mode = #tpu.pipeline_mode<synchronous>, transform_indices = @transform_6, window_bounds = array<i64: 3, 320, 512>}, {pipeline_mode = #tpu.pipeline_mode<synchronous>, transform_indices = @transform_7, window_bounds = array<i64: 3, 512, 384>}, {pipeline_mode = #tpu.pipeline_mode<synchronous>, transform_indices = @transform_8, window_bounds = array<i64: 1, 128>}, {pipeline_mode = #tpu.pipeline_mode<synchronous>, transform_indices = @transform_9, window_bounds = array<i64: 1, 128>}, {pipeline_mode = #tpu.pipeline_mode<synchronous>, transform_indices = @transform_10, window_bounds = array<i64: 1, 256>}, {pipeline_mode = #tpu.pipeline_mode<synchronous>, transform_indices = @transform_11, window_bounds = array<i64: 1, 512>}, {pipeline_mode = #tpu.pipeline_mode<synchronous>, transform_indices = @transform_12, window_bounds = array<i64: 1, 384>}, {transform_indices = @transform_13, window_bounds = array<i64: 1, 6, 384>}]} {
    %cst = arith.constant 0.000000e+00 : bf16
    %0 = vector.broadcast %cst : bf16 to vector<18x144xbf16>
    %c0 = arith.constant 0 : index
    %c0_0 = arith.constant 0 : index
    %1 = vector.load %arg15[%c0, %c0_0] : memref<18x144xbf16, #tpu.memory_space<vmem>>, vector<18x144xbf16>
    tpu.vector_store %arg15[%c0, %c0_0], %0 {strides = array<i32>} : memref<18x144xbf16, #tpu.memory_space<vmem>>, vector<18x144xbf16>,
    %cst_1 = arith.constant 0.000000e+00 : bf16
    %2 = vector.broadcast %cst_1 : bf16 to vector<10x160xbf16>
    %c0_2 = arith.constant 0 : index
    %c0_3 = arith.constant 0 : index
    %3 = vector.load %arg16[%c0_2, %c0_3] : memref<10x160xbf16, #tpu.memory_space<vmem>>, vector<10x160xbf16>
    tpu.vector_store %arg16[%c0_2, %c0_3], %2 {strides = array<i32>} : memref<10x160xbf16, #tpu.memory_space<vmem>>, vector<10x160xbf16>,
    %cst_4 = arith.constant 0.000000e+00 : bf16
    %4 = vector.broadcast %cst_4 : bf16 to vector<10x320xbf16>
    %c0_5 = arith.constant 0 : index
    %c0_6 = arith.constant 0 : index
    %5 = vector.load %arg17[%c0_5, %c0_6] : memref<10x320xbf16, #tpu.memory_space<vmem>>, vector<10x320xbf16>
    tpu.vector_store %arg17[%c0_5, %c0_6], %4 {strides = array<i32>} : memref<10x320xbf16, #tpu.memory_space<vmem>>, vector<10x320xbf16>,
    %c0_7 = arith.constant 0 : index
    %c0_8 = arith.constant 0 : index
    %c0_9 = arith.constant 0 : index
    %6 = vector.load %arg1[%c0_7, %c0_8, %c0_9] : memref<1x34x102xbf16, #tpu.memory_space<vmem>>, vector<1x34x102xbf16>
    %7 = vector.shape_cast %6 : vector<1x34x102xbf16> to vector<34x102xbf16>
    %c0_10 = arith.constant 0 : index
    %c0_11 = arith.constant 0 : index
    %c0_12 = arith.constant 0 : index
    %8 = vector.load %arg2[%c0_10, %c0_11, %c0_12] : memref<3x16x34xbf16, #tpu.memory_space<vmem>>, vector<1x16x34xbf16>
    %9 = vector.shape_cast %8 : vector<1x16x34xbf16> to vector<16x34xbf16>
    %cst_13 = arith.constant dense<0.000000e+00> : vector<16x102xf32>
    %10 = tpu.matmul %9, %7, %cst_13 {dimension_numbers = #tpu.dot_dimension_numbers<[1], [0], [0], [1], [0, 0, 1, 1], [], []>} : vector<16x34xbf16>, vector<34x102xbf16>, vector<16x102xf32> -> vector<16x102xf32>
    %11 = arith.truncf %10 : vector<16x102xf32> to vector<16x102xbf16>
    %c0_14 = arith.constant 0 : index
    %c0_15 = arith.constant 0 : index
    %c0_16 = arith.constant 0 : index
    %12 = vector.load %arg4[%c0_14, %c0_15, %c0_16] : memref<3x102x128xbf16, #tpu.memory_space<vmem>>, vector<1x102x128xbf16>
    %13 = vector.shape_cast %12 : vector<1x102x128xbf16> to vector<102x128xbf16>
    %cst_17 = arith.constant dense<0.000000e+00> : vector<16x128xf32>
    %14 = tpu.matmul %11, %13, %cst_17 {dimension_numbers = #tpu.dot_dimension_numbers<[1], [0], [0], [1], [0, 0, 1, 1], [], []>} : vector<16x102xbf16>, vector<102x128xbf16>, vector<16x128xf32> -> vector<16x128xf32>
    %c1 = arith.constant 1 : index
    %c0_18 = arith.constant 0 : index
    %c0_19 = arith.constant 0 : index
    %15 = vector.load %arg2[%c1, %c0_18, %c0_19] : memref<3x16x34xbf16, #tpu.memory_space<vmem>>, vector<1x16x34xbf16>
    %16 = vector.shape_cast %15 : vector<1x16x34xbf16> to vector<16x34xbf16>
    %cst_20 = arith.constant dense<0.000000e+00> : vector<16x102xf32>
    %17 = tpu.matmul %16, %7, %cst_20 {dimension_numbers = #tpu.dot_dimension_numbers<[1], [0], [0], [1], [0, 0, 1, 1], [], []>} : vector<16x34xbf16>, vector<34x102xbf16>, vector<16x102xf32> -> vector<16x102xf32>
    %18 = arith.truncf %17 : vector<16x102xf32> to vector<16x102xbf16>
    %c1_21 = arith.constant 1 : index
    %c0_22 = arith.constant 0 : index
    %c0_23 = arith.constant 0 : index
    %19 = vector.load %arg4[%c1_21, %c0_22, %c0_23] : memref<3x102x128xbf16, #tpu.memory_space<vmem>>, vector<1x102x128xbf16>
    %20 = vector.shape_cast %19 : vector<1x102x128xbf16> to vector<102x128xbf16>
    %cst_24 = arith.constant dense<0.000000e+00> : vector<16x128xf32>
    %21 = tpu.matmul %18, %20, %cst_24 {dimension_numbers = #tpu.dot_dimension_numbers<[1], [0], [0], [1], [0, 0, 1, 1], [], []>} : vector<16x102xbf16>, vector<102x128xbf16>, vector<16x128xf32> -> vector<16x128xf32>
    %22 = arith.addf %14, %21 : vector<16x128xf32>
    %c2 = arith.constant 2 : index
    %c0_25 = arith.constant 0 : index
    %c0_26 = arith.constant 0 : index
    %23 = vector.load %arg2[%c2, %c0_25, %c0_26] : memref<3x16x34xbf16, #tpu.memory_space<vmem>>, vector<1x16x34xbf16>
    %24 = vector.shape_cast %23 : vector<1x16x34xbf16> to vector<16x34xbf16>
    %cst_27 = arith.constant dense<0.000000e+00> : vector<16x102xf32>
    %25 = tpu.matmul %24, %7, %cst_27 {dimension_numbers = #tpu.dot_dimension_numbers<[1], [0], [0], [1], [0, 0, 1, 1], [], []>} : vector<16x34xbf16>, vector<34x102xbf16>, vector<16x102xf32> -> vector<16x102xf32>
    %26 = arith.truncf %25 : vector<16x102xf32> to vector<16x102xbf16>
    %c2_28 = arith.constant 2 : index
    %c0_29 = arith.constant 0 : index
    %c0_30 = arith.constant 0 : index
    %27 = vector.load %arg4[%c2_28, %c0_29, %c0_30] : memref<3x102x128xbf16, #tpu.memory_space<vmem>>, vector<1x102x128xbf16>
    %28 = vector.shape_cast %27 : vector<1x102x128xbf16> to vector<102x128xbf16>
    %cst_31 = arith.constant dense<0.000000e+00> : vector<16x128xf32>
    %29 = tpu.matmul %26, %28, %cst_31 {dimension_numbers = #tpu.dot_dimension_numbers<[1], [0], [0], [1], [0, 0, 1, 1], [], []>} : vector<16x102xbf16>, vector<102x128xbf16>, vector<16x128xf32> -> vector<16x128xf32>
    %30 = arith.addf %22, %29 : vector<16x128xf32>
    %c0_32 = arith.constant 0 : index
    %c0_33 = arith.constant 0 : index
    %31 = vector.load %arg9[%c0_32, %c0_33] : memref<1x128xf32, #tpu.memory_space<vmem>>, vector<1x128xf32>
    %32 = vector.broadcast %31 : vector<1x128xf32> to vector<16x128xf32>
    %33 = arith.addf %30, %32 : vector<16x128xf32>
    %cst_34 = arith.constant 0.000000e+00 : f32
    %34 = vector.broadcast %cst_34 : f32 to vector<16x128xf32>
    %35 = arith.maximumf %33, %34 : vector<16x128xf32>
    %36 = arith.truncf %35 : vector<16x128xf32> to vector<16x128xbf16>
    %c1_35 = arith.constant 1 : index
    %c8 = arith.constant 8 : index
    %37 = vector.load %arg15[%c1_35, %c8] : memref<18x144xbf16, #tpu.memory_space<vmem>>, vector<16x128xbf16>
    tpu.vector_store %arg15[%c1_35, %c8], %36 {strides = array<i32>} : memref<18x144xbf16, #tpu.memory_space<vmem>>, vector<16x128xbf16>,
    %c0_36 = arith.constant 0 : index
    %c0_37 = arith.constant 0 : index
    %38 = vector.load %arg15[%c0_36, %c0_37] : memref<18x144xbf16, #tpu.memory_space<vmem>>, vector<18x144xbf16>
    %c0_38 = arith.constant 0 : index
    %c0_39 = arith.constant 0 : index
    %c0_40 = arith.constant 0 : index
    %39 = vector.load %arg3[%c0_38, %c0_39, %c0_40] : memref<3x8x18xbf16, #tpu.memory_space<vmem>>, vector<1x8x18xbf16>
    %40 = vector.shape_cast %39 : vector<1x8x18xbf16> to vector<8x18xbf16>
    %cst_41 = arith.constant dense<0.000000e+00> : vector<8x144xf32>
    %41 = tpu.matmul %40, %38, %cst_41 {dimension_numbers = #tpu.dot_dimension_numbers<[1], [0], [0], [1], [0, 0, 1, 1], [], []>} : vector<8x18xbf16>, vector<18x144xbf16>, vector<8x144xf32> -> vector<8x144xf32>
    %42 = arith.truncf %41 : vector<8x144xf32> to vector<8x144xbf16>
    %c0_42 = arith.constant 0 : index
    %c0_43 = arith.constant 0 : index
    %c0_44 = arith.constant 0 : index
    %43 = vector.load %arg5[%c0_42, %c0_43, %c0_44] : memref<3x144x128xbf16, #tpu.memory_space<vmem>>, vector<1x144x128xbf16>
    %44 = vector.shape_cast %43 : vector<1x144x128xbf16> to vector<144x128xbf16>
    %cst_45 = arith.constant dense<0.000000e+00> : vector<8x128xf32>
    %45 = tpu.matmul %42, %44, %cst_45 {dimension_numbers = #tpu.dot_dimension_numbers<[1], [0], [0], [1], [0, 0, 1, 1], [], []>} : vector<8x144xbf16>, vector<144x128xbf16>, vector<8x128xf32> -> vector<8x128xf32>
    %c1_46 = arith.constant 1 : index
    %c0_47 = arith.constant 0 : index
    %c0_48 = arith.constant 0 : index
    %46 = vector.load %arg3[%c1_46, %c0_47, %c0_48] : memref<3x8x18xbf16, #tpu.memory_space<vmem>>, vector<1x8x18xbf16>
    %47 = vector.shape_cast %46 : vector<1x8x18xbf16> to vector<8x18xbf16>
    %cst_49 = arith.constant dense<0.000000e+00> : vector<8x144xf32>
    %48 = tpu.matmul %47, %38, %cst_49 {dimension_numbers = #tpu.dot_dimension_numbers<[1], [0], [0], [1], [0, 0, 1, 1], [], []>} : vector<8x18xbf16>, vector<18x144xbf16>, vector<8x144xf32> -> vector<8x144xf32>
    %49 = arith.truncf %48 : vector<8x144xf32> to vector<8x144xbf16>
    %c1_50 = arith.constant 1 : index
    %c0_51 = arith.constant 0 : index
    %c0_52 = arith.constant 0 : index
    %50 = vector.load %arg5[%c1_50, %c0_51, %c0_52] : memref<3x144x128xbf16, #tpu.memory_space<vmem>>, vector<1x144x128xbf16>
    %51 = vector.shape_cast %50 : vector<1x144x128xbf16> to vector<144x128xbf16>
    %cst_53 = arith.constant dense<0.000000e+00> : vector<8x128xf32>
    %52 = tpu.matmul %49, %51, %cst_53 {dimension_numbers = #tpu.dot_dimension_numbers<[1], [0], [0], [1], [0, 0, 1, 1], [], []>} : vector<8x144xbf16>, vector<144x128xbf16>, vector<8x128xf32> -> vector<8x128xf32>
    %53 = arith.addf %45, %52 : vector<8x128xf32>
    %c2_54 = arith.constant 2 : index
    %c0_55 = arith.constant 0 : index
    %c0_56 = arith.constant 0 : index
    %54 = vector.load %arg3[%c2_54, %c0_55, %c0_56] : memref<3x8x18xbf16, #tpu.memory_space<vmem>>, vector<1x8x18xbf16>
    %55 = vector.shape_cast %54 : vector<1x8x18xbf16> to vector<8x18xbf16>
    %cst_57 = arith.constant dense<0.000000e+00> : vector<8x144xf32>
    %56 = tpu.matmul %55, %38, %cst_57 {dimension_numbers = #tpu.dot_dimension_numbers<[1], [0], [0], [1], [0, 0, 1, 1], [], []>} : vector<8x18xbf16>, vector<18x144xbf16>, vector<8x144xf32> -> vector<8x144xf32>
    %57 = arith.truncf %56 : vector<8x144xf32> to vector<8x144xbf16>
    %c2_58 = arith.constant 2 : index
    %c0_59 = arith.constant 0 : index
    %c0_60 = arith.constant 0 : index
    %58 = vector.load %arg5[%c2_58, %c0_59, %c0_60] : memref<3x144x128xbf16, #tpu.memory_space<vmem>>, vector<1x144x128xbf16>
    %59 = vector.shape_cast %58 : vector<1x144x128xbf16> to vector<144x128xbf16>
    %cst_61 = arith.constant dense<0.000000e+00> : vector<8x128xf32>
    %60 = tpu.matmul %57, %59, %cst_61 {dimension_numbers = #tpu.dot_dimension_numbers<[1], [0], [0], [1], [0, 0, 1, 1], [], []>} : vector<8x144xbf16>, vector<144x128xbf16>, vector<8x128xf32> -> vector<8x128xf32>
    %61 = arith.addf %53, %60 : vector<8x128xf32>
    %c0_62 = arith.constant 0 : index
    %c0_63 = arith.constant 0 : index
    %62 = vector.load %arg10[%c0_62, %c0_63] : memref<1x128xf32, #tpu.memory_space<vmem>>, vector<1x128xf32>
    %63 = vector.broadcast %62 : vector<1x128xf32> to vector<8x128xf32>
    %64 = arith.addf %61, %63 : vector<8x128xf32>
    %cst_64 = arith.constant 0.000000e+00 : f32
    %65 = vector.broadcast %cst_64 : f32 to vector<8x128xf32>
    %66 = arith.maximumf %64, %65 : vector<8x128xf32>
    %67 = arith.truncf %66 : vector<8x128xf32> to vector<8x128xbf16>
    %c1_65 = arith.constant 1 : index
    %c16 = arith.constant 16 : index
    %68 = vector.load %arg16[%c1_65, %c16] : memref<10x160xbf16, #tpu.memory_space<vmem>>, vector<8x128xbf16>
    tpu.vector_store %arg16[%c1_65, %c16], %67 {strides = array<i32>} : memref<10x160xbf16, #tpu.memory_space<vmem>>, vector<8x128xbf16>,
    %c0_66 = arith.constant 0 : index
    %c0_67 = arith.constant 0 : index
    %69 = vector.load %arg16[%c0_66, %c0_67] : memref<10x160xbf16, #tpu.memory_space<vmem>>, vector<8x160xbf16>
    %c0_68 = arith.constant 0 : index
    %c0_69 = arith.constant 0 : index
    %c0_70 = arith.constant 0 : index
    %70 = vector.load %arg6[%c0_68, %c0_69, %c0_70] : memref<3x160x256xbf16, #tpu.memory_space<vmem>>, vector<1x160x256xbf16>
    %71 = vector.shape_cast %70 : vector<1x160x256xbf16> to vector<160x256xbf16>
    %cst_71 = arith.constant dense<0.000000e+00> : vector<8x256xf32>
    %72 = tpu.matmul %69, %71, %cst_71 {dimension_numbers = #tpu.dot_dimension_numbers<[1], [0], [0], [1], [0, 0, 1, 1], [], []>} : vector<8x160xbf16>, vector<160x256xbf16>, vector<8x256xf32> -> vector<8x256xf32>
    %c1_72 = arith.constant 1 : index
    %c0_73 = arith.constant 0 : index
    %73 = vector.load %arg16[%c1_72, %c0_73] : memref<10x160xbf16, #tpu.memory_space<vmem>>, vector<8x160xbf16>
    %c1_74 = arith.constant 1 : index
    %c0_75 = arith.constant 0 : index
    %c0_76 = arith.constant 0 : index
    %74 = vector.load %arg6[%c1_74, %c0_75, %c0_76] : memref<3x160x256xbf16, #tpu.memory_space<vmem>>, vector<1x160x256xbf16>
    %75 = vector.shape_cast %74 : vector<1x160x256xbf16> to vector<160x256xbf16>
    %cst_77 = arith.constant dense<0.000000e+00> : vector<8x256xf32>
    %76 = tpu.matmul %73, %75, %cst_77 {dimension_numbers = #tpu.dot_dimension_numbers<[1], [0], [0], [1], [0, 0, 1, 1], [], []>} : vector<8x160xbf16>, vector<160x256xbf16>, vector<8x256xf32> -> vector<8x256xf32>
    %77 = arith.addf %72, %76 : vector<8x256xf32>
    %c2_78 = arith.constant 2 : index
    %c0_79 = arith.constant 0 : index
    %78 = vector.load %arg16[%c2_78, %c0_79] : memref<10x160xbf16, #tpu.memory_space<vmem>>, vector<8x160xbf16>
    %c2_80 = arith.constant 2 : index
    %c0_81 = arith.constant 0 : index
    %c0_82 = arith.constant 0 : index
    %79 = vector.load %arg6[%c2_80, %c0_81, %c0_82] : memref<3x160x256xbf16, #tpu.memory_space<vmem>>, vector<1x160x256xbf16>
    %80 = vector.shape_cast %79 : vector<1x160x256xbf16> to vector<160x256xbf16>
    %cst_83 = arith.constant dense<0.000000e+00> : vector<8x256xf32>
    %81 = tpu.matmul %78, %80, %cst_83 {dimension_numbers = #tpu.dot_dimension_numbers<[1], [0], [0], [1], [0, 0, 1, 1], [], []>} : vector<8x160xbf16>, vector<160x256xbf16>, vector<8x256xf32> -> vector<8x256xf32>
    %82 = arith.addf %77, %81 : vector<8x256xf32>
    %c0_84 = arith.constant 0 : index
    %c0_85 = arith.constant 0 : index
    %83 = vector.load %arg11[%c0_84, %c0_85] : memref<1x256xf32, #tpu.memory_space<vmem>>, vector<1x256xf32>
    %84 = vector.broadcast %83 : vector<1x256xf32> to vector<8x256xf32>
    %85 = arith.addf %82, %84 : vector<8x256xf32>
    %cst_86 = arith.constant 0.000000e+00 : f32
    %86 = vector.broadcast %cst_86 : f32 to vector<8x256xf32>
    %87 = arith.maximumf %85, %86 : vector<8x256xf32>
    %88 = arith.truncf %87 : vector<8x256xf32> to vector<8x256xbf16>
    %c1_87 = arith.constant 1 : index
    %c32 = arith.constant 32 : index
    %89 = vector.load %arg17[%c1_87, %c32] : memref<10x320xbf16, #tpu.memory_space<vmem>>, vector<8x256xbf16>
    tpu.vector_store %arg17[%c1_87, %c32], %88 {strides = array<i32>} : memref<10x320xbf16, #tpu.memory_space<vmem>>, vector<8x256xbf16>,
    %c0_88 = arith.constant 0 : index
    %c0_89 = arith.constant 0 : index
    %90 = vector.load %arg17[%c0_88, %c0_89] : memref<10x320xbf16, #tpu.memory_space<vmem>>, vector<8x320xbf16>
    %c0_90 = arith.constant 0 : index
    %c0_91 = arith.constant 0 : index
    %c0_92 = arith.constant 0 : index
    %91 = vector.load %arg7[%c0_90, %c0_91, %c0_92] : memref<3x320x512xbf16, #tpu.memory_space<vmem>>, vector<1x320x512xbf16>
    %92 = vector.shape_cast %91 : vector<1x320x512xbf16> to vector<320x512xbf16>
    %cst_93 = arith.constant dense<0.000000e+00> : vector<8x512xf32>
    %93 = tpu.matmul %90, %92, %cst_93 {dimension_numbers = #tpu.dot_dimension_numbers<[1], [0], [0], [1], [0, 0, 1, 1], [], []>} : vector<8x320xbf16>, vector<320x512xbf16>, vector<8x512xf32> -> vector<8x512xf32>
    %c1_94 = arith.constant 1 : index
    %c0_95 = arith.constant 0 : index
    %94 = vector.load %arg17[%c1_94, %c0_95] : memref<10x320xbf16, #tpu.memory_space<vmem>>, vector<8x320xbf16>
    %c1_96 = arith.constant 1 : index
    %c0_97 = arith.constant 0 : index
    %c0_98 = arith.constant 0 : index
    %95 = vector.load %arg7[%c1_96, %c0_97, %c0_98] : memref<3x320x512xbf16, #tpu.memory_space<vmem>>, vector<1x320x512xbf16>
    %96 = vector.shape_cast %95 : vector<1x320x512xbf16> to vector<320x512xbf16>
    %cst_99 = arith.constant dense<0.000000e+00> : vector<8x512xf32>
    %97 = tpu.matmul %94, %96, %cst_99 {dimension_numbers = #tpu.dot_dimension_numbers<[1], [0], [0], [1], [0, 0, 1, 1], [], []>} : vector<8x320xbf16>, vector<320x512xbf16>, vector<8x512xf32> -> vector<8x512xf32>
    %98 = arith.addf %93, %97 : vector<8x512xf32>
    %c2_100 = arith.constant 2 : index
    %c0_101 = arith.constant 0 : index
    %99 = vector.load %arg17[%c2_100, %c0_101] : memref<10x320xbf16, #tpu.memory_space<vmem>>, vector<8x320xbf16>
    %c2_102 = arith.constant 2 : index
    %c0_103 = arith.constant 0 : index
    %c0_104 = arith.constant 0 : index
    %100 = vector.load %arg7[%c2_102, %c0_103, %c0_104] : memref<3x320x512xbf16, #tpu.memory_space<vmem>>, vector<1x320x512xbf16>
    %101 = vector.shape_cast %100 : vector<1x320x512xbf16> to vector<320x512xbf16>
    %cst_105 = arith.constant dense<0.000000e+00> : vector<8x512xf32>
    %102 = tpu.matmul %99, %101, %cst_105 {dimension_numbers = #tpu.dot_dimension_numbers<[1], [0], [0], [1], [0, 0, 1, 1], [], []>} : vector<8x320xbf16>, vector<320x512xbf16>, vector<8x512xf32> -> vector<8x512xf32>
    %103 = arith.addf %98, %102 : vector<8x512xf32>
    %c0_106 = arith.constant 0 : index
    %c0_107 = arith.constant 0 : index
    %104 = vector.load %arg12[%c0_106, %c0_107] : memref<1x512xf32, #tpu.memory_space<vmem>>, vector<1x512xf32>
    %105 = vector.broadcast %104 : vector<1x512xf32> to vector<8x512xf32>
    %106 = arith.addf %103, %105 : vector<8x512xf32>
    %cst_108 = arith.constant 0.000000e+00 : f32
    %107 = vector.broadcast %cst_108 : f32 to vector<8x512xf32>
    %108 = arith.maximumf %106, %107 : vector<8x512xf32>
    %109 = arith.truncf %108 : vector<8x512xf32> to vector<8x512xbf16>
    %c0_109 = arith.constant 0 : index
    %c0_110 = arith.constant 0 : index
    %110 = vector.load %arg18[%c0_109, %c0_110] : memref<8x512xbf16, #tpu.memory_space<vmem>>, vector<8x512xbf16>
    tpu.vector_store %arg18[%c0_109, %c0_110], %109 {strides = array<i32>} : memref<8x512xbf16, #tpu.memory_space<vmem>>, vector<8x512xbf16>,
    %c0_111 = arith.constant 0 : index
    %c0_112 = arith.constant 0 : index
    %111 = vector.load %arg18[%c0_111, %c0_112] : memref<8x512xbf16, #tpu.memory_space<vmem>>, vector<6x512xbf16>
    %c0_113 = arith.constant 0 : index
    %c0_114 = arith.constant 0 : index
    %c0_115 = arith.constant 0 : index
    %112 = vector.load %arg8[%c0_113, %c0_114, %c0_115] : memref<3x512x384xbf16, #tpu.memory_space<vmem>>, vector<1x512x384xbf16>
    %113 = vector.shape_cast %112 : vector<1x512x384xbf16> to vector<512x384xbf16>
    %cst_116 = arith.constant dense<0.000000e+00> : vector<6x384xf32>
    %114 = tpu.matmul %111, %113, %cst_116 {dimension_numbers = #tpu.dot_dimension_numbers<[1], [0], [0], [1], [0, 0, 1, 1], [], []>} : vector<6x512xbf16>, vector<512x384xbf16>, vector<6x384xf32> -> vector<6x384xf32>
    %c1_117 = arith.constant 1 : index
    %c0_118 = arith.constant 0 : index
    %115 = vector.load %arg18[%c1_117, %c0_118] : memref<8x512xbf16, #tpu.memory_space<vmem>>, vector<6x512xbf16>
    %c1_119 = arith.constant 1 : index
    %c0_120 = arith.constant 0 : index
    %c0_121 = arith.constant 0 : index
    %116 = vector.load %arg8[%c1_119, %c0_120, %c0_121] : memref<3x512x384xbf16, #tpu.memory_space<vmem>>, vector<1x512x384xbf16>
    %117 = vector.shape_cast %116 : vector<1x512x384xbf16> to vector<512x384xbf16>
    %cst_122 = arith.constant dense<0.000000e+00> : vector<6x384xf32>
    %118 = tpu.matmul %115, %117, %cst_122 {dimension_numbers = #tpu.dot_dimension_numbers<[1], [0], [0], [1], [0, 0, 1, 1], [], []>} : vector<6x512xbf16>, vector<512x384xbf16>, vector<6x384xf32> -> vector<6x384xf32>
    %119 = arith.addf %114, %118 : vector<6x384xf32>
    %c2_123 = arith.constant 2 : index
    %c0_124 = arith.constant 0 : index
    %120 = vector.load %arg18[%c2_123, %c0_124] : memref<8x512xbf16, #tpu.memory_space<vmem>>, vector<6x512xbf16>
    %c2_125 = arith.constant 2 : index
    %c0_126 = arith.constant 0 : index
    %c0_127 = arith.constant 0 : index
    %121 = vector.load %arg8[%c2_125, %c0_126, %c0_127] : memref<3x512x384xbf16, #tpu.memory_space<vmem>>, vector<1x512x384xbf16>
    %122 = vector.shape_cast %121 : vector<1x512x384xbf16> to vector<512x384xbf16>
    %cst_128 = arith.constant dense<0.000000e+00> : vector<6x384xf32>
    %123 = tpu.matmul %120, %122, %cst_128 {dimension_numbers = #tpu.dot_dimension_numbers<[1], [0], [0], [1], [0, 0, 1, 1], [], []>} : vector<6x512xbf16>, vector<512x384xbf16>, vector<6x384xf32> -> vector<6x384xf32>
    %124 = arith.addf %119, %123 : vector<6x384xf32>
    %c0_129 = arith.constant 0 : index
    %c0_130 = arith.constant 0 : index
    %125 = vector.load %arg13[%c0_129, %c0_130] : memref<1x384xf32, #tpu.memory_space<vmem>>, vector<1x384xf32>
    %126 = vector.broadcast %125 : vector<1x384xf32> to vector<6x384xf32>
    %127 = arith.addf %124, %126 : vector<6x384xf32>
    %c0_131 = arith.constant 0 : index
    %c0_132 = arith.constant 0 : index
    %c0_133 = arith.constant 0 : index
    %128 = vector.load %arg14[%c0_131, %c0_132, %c0_133] : memref<1x6x384xf32, #tpu.memory_space<vmem>>, vector<1x6x384xf32>
    %129 = vector.shape_cast %128 : vector<1x6x384xf32> to vector<6x384xf32>
    %130 = vector.shape_cast %127 : vector<6x384xf32> to vector<1x6x384xf32>
    tpu.vector_store %arg14[%c0_131, %c0_132, %c0_133], %130 {strides = array<i32>} : memref<1x6x384xf32, #tpu.memory_space<vmem>>, vector<1x6x384xf32>,
    return
  }
  func.func @transform_0(%arg0: i32) -> (i32, i32, i32) {
    %c0_i32 = arith.constant 0 : i32
    %c0_i32_0 = arith.constant 0 : i32
    %c0_i32_1 = arith.constant 0 : i32
    return %arg0, %c0_i32, %c0_i32_0 : i32, i32, i32
  }
  func.func @transform_1(%arg0: i32) -> (i32, i32, i32) {
    %c0_i32 = arith.constant 0 : i32
    %c0_i32_0 = arith.constant 0 : i32
    %c0_i32_1 = arith.constant 0 : i32
    %c0_i32_2 = arith.constant 0 : i32
    return %c0_i32, %c0_i32_0, %c0_i32_1 : i32, i32, i32
  }
  func.func @transform_2(%arg0: i32) -> (i32, i32, i32) {
    %c0_i32 = arith.constant 0 : i32
    %c0_i32_0 = arith.constant 0 : i32
    %c0_i32_1 = arith.constant 0 : i32
    %c0_i32_2 = arith.constant 0 : i32
    return %c0_i32, %c0_i32_0, %c0_i32_1 : i32, i32, i32
  }
  func.func @transform_3(%arg0: i32) -> (i32, i32, i32) {
    %c0_i32 = arith.constant 0 : i32
    %c0_i32_0 = arith.constant 0 : i32
    %c0_i32_1 = arith.constant 0 : i32
    %c0_i32_2 = arith.constant 0 : i32
    return %c0_i32, %c0_i32_0, %c0_i32_1 : i32, i32, i32
  }
  func.func @transform_4(%arg0: i32) -> (i32, i32, i32) {
    %c0_i32 = arith.constant 0 : i32
    %c0_i32_0 = arith.constant 0 : i32
    %c0_i32_1 = arith.constant 0 : i32
    %c0_i32_2 = arith.constant 0 : i32
    return %c0_i32, %c0_i32_0, %c0_i32_1 : i32, i32, i32
  }
  func.func @transform_5(%arg0: i32) -> (i32, i32, i32) {
    %c0_i32 = arith.constant 0 : i32
    %c0_i32_0 = arith.constant 0 : i32
    %c0_i32_1 = arith.constant 0 : i32
    %c0_i32_2 = arith.constant 0 : i32
    return %c0_i32, %c0_i32_0, %c0_i32_1 : i32, i32, i32
  }
  func.func @transform_6(%arg0: i32) -> (i32, i32, i32) {
    %c0_i32 = arith.constant 0 : i32
    %c0_i32_0 = arith.constant 0 : i32
    %c0_i32_1 = arith.constant 0 : i32
    %c0_i32_2 = arith.constant 0 : i32
    return %c0_i32, %c0_i32_0, %c0_i32_1 : i32, i32, i32
  }
  func.func @transform_7(%arg0: i32) -> (i32, i32, i32) {
    %c0_i32 = arith.constant 0 : i32
    %c0_i32_0 = arith.constant 0 : i32
    %c0_i32_1 = arith.constant 0 : i32
    %c0_i32_2 = arith.constant 0 : i32
    return %c0_i32, %c0_i32_0, %c0_i32_1 : i32, i32, i32
  }
  func.func @transform_8(%arg0: i32) -> (i32, i32) {
    %c0_i32 = arith.constant 0 : i32
    %c0_i32_0 = arith.constant 0 : i32
    %c0_i32_1 = arith.constant 0 : i32
    return %c0_i32, %c0_i32_0 : i32, i32
  }
  func.func @transform_9(%arg0: i32) -> (i32, i32) {
    %c0_i32 = arith.constant 0 : i32
    %c0_i32_0 = arith.constant 0 : i32
    %c0_i32_1 = arith.constant 0 : i32
    return %c0_i32, %c0_i32_0 : i32, i32
  }
  func.func @transform_10(%arg0: i32) -> (i32, i32) {
    %c0_i32 = arith.constant 0 : i32
    %c0_i32_0 = arith.constant 0 : i32
    %c0_i32_1 = arith.constant 0 : i32
    return %c0_i32, %c0_i32_0 : i32, i32
  }
  func.func @transform_11(%arg0: i32) -> (i32, i32) {
    %c0_i32 = arith.constant 0 : i32
    %c0_i32_0 = arith.constant 0 : i32
    %c0_i32_1 = arith.constant 0 : i32
    return %c0_i32, %c0_i32_0 : i32, i32
  }
  func.func @transform_12(%arg0: i32) -> (i32, i32) {
    %c0_i32 = arith.constant 0 : i32
    %c0_i32_0 = arith.constant 0 : i32
    %c0_i32_1 = arith.constant 0 : i32
    return %c0_i32, %c0_i32_0 : i32, i32
  }
  func.func @transform_13(%arg0: i32) -> (i32, i32, i32) {
    %c0_i32 = arith.constant 0 : i32
    %c0_i32_0 = arith.constant 0 : i32
    %c0_i32_1 = arith.constant 0 : i32
    return %arg0, %c0_i32, %c0_i32_0 : i32, i32, i32
  }
}

</mosaic_0001>

<bundles_post_ra>
// kernel: tpu_custom_call.1
= control target key start
LH: loop header
LB: loop body
LE: loop exit
PB: predicated region body
PF: predicated region fallthrough
CT: control target
= control target key end

     0   :  { %18 = vsyncpa [#allocation7], 0  ;;  %s10167_s0 = inlined_call_operand.vmem [shape: bf16[2,34,102], index: 0, kind: input, shape index: {}]   ;;  %s10168_s1 = inlined_call_operand.hbm [shape: bf16[3,16,34], index: 1, kind: input, shape index: {}]   ;;  %s10169_s2 = inlined_call_operand.hbm [shape: bf16[3,8,18], index: 2, kind: input, shape index: {}]   ;;  %s10170_s3 = inlined_call_operand.hbm [shape: bf16[3,102,128], index: 3, kind: input, shape index: {}]   ;;  %s10171_s4 = inlined_call_operand.hbm [shape: bf16[3,144,128], index: 4, kind: input, shape index: {}]   ;;  %s10172_s5 = inlined_call_operand.hbm [shape: bf16[3,160,256], index: 5, kind: input, shape index: {}]   ;;  %s10173_s6 = inlined_call_operand.hbm [shape: bf16[3,320,512], index: 6, kind: input, shape index: {}]   ;;  %s10174_s7 = inlined_call_operand.hbm [shape: bf16[3,512,384], index: 7, kind: input, shape index: {}]   ;;  %s10175_s8 = inlined_call_operand.hbm [shape: f32[1,128], index: 8, kind: input, shape index: {}]   ;;  %s10176_s9 = inlined_call_operand.hbm [shape: f32[1,128], index: 9, kind: input, shape index: {}]   ;;  %s10177_s10 = inlined_call_operand.hbm [shape: f32[1,256], index: 10, kind: input, shape index: {}]   ;;  %s10178_s11 = inlined_call_operand.hbm [shape: f32[1,512], index: 11, kind: input, shape index: {}]   ;;  %s10179_s12 = inlined_call_operand.hbm [shape: f32[1,384], index: 12, kind: input, shape index: {}]   ;;  %s10180_s13 = inlined_call_operand.vmem [shape: f32[2,6,384], index: 13, kind: output, shape index: {}]  }
   0x1   :  { %19 = vsyncpa [#allocation9], 0 }
   0x2   :  { %20 = vsyncpa [#allocation12], 0 }
   0x3   :  { %21 = vsyncpa [#allocation15], 0 }
   0x4   :  { %22 = vsyncpa [#allocation18], 0 }
   0x5   :  { %23 = vsyncpa [#allocation21], 0 }
   0x6   :  { %24 = vsyncpa [#allocation24], 0  ;;  %s9596_s25 = smov 0  }
   0x7 LB: > { %s9602_s26 = sadd.s32 4294967295, %s9498_s25   ;;  %p7102_p0 = scmp.ge.s32.totalorder %s9498_s25, 1  ;;  %s9498_s25 = sphi %s9596_s25, %s30_s25  }
   0x8   : > { %p339_p1 = scmp.lt.s32.totalorder %s9498_s25, 3  ;;  %p10183_p2 = scmp.eq.s32.totalorder %s9602_s26, 0 }
   0x9   : > { %s9500_s28 = smov [#allocation8]   ;;  %s9501_s30 = smov [#allocation11]  }
   0xa   : > { %p9607_p3 = pnand %p7102_p0, %p339_p1  ;;  %s364_s29 = sshll.u32 %s9500_s28, 4  ;;  %s365_s29 = int_to_ptr.vmem [resolvable:$true] %s364_s29 }
   0xb   : > { %s390_s14 = sshll.u32 %s9501_s30, 4  ;;  %s9502_s16 = smov [#allocation14]   ;;  %s9613_s14 = int_to_ptr.vmem [resolvable:$true] %s390_s14 }
   0xc   : > { %s10185_s27 = scalar_select %p9607_p3, 1, 0 }
   0xd   : > { %p8146_p4 = pneg %p9607_p3  ;;  %s416_s17 = sshll.u32 %s9502_s16, 4  ;;  %s9621_s17 = int_to_ptr.vmem [resolvable:$true] %s416_s17 }
   0xe   : > { %s9163_s19 = scalar_lea.vmem %s365_s29, 192  ;;  %p9171_p10 = scmp.lt.s32.totalorder %s365_s29, %s365_s29 }
   0xf   : > { %p9617_p5 = pnand %p10183_p2, %p8146_p4  ;;  %p9164_p7 = scmp.ne.s32.totalorder %s365_s29, %s9163_s19 }
  0x10   : > { %p9172_p11 = scmp.lt.s32.totalorder %s9163_s19, %s9163_s19 }
  0x11   : > { %p9625_p6 = pneg %p9617_p5 }
  0x12   : > { %p9173_p12 = por %p9172_p11, %p9171_p10 }
  0x13   : > { %p9166_p8 = pnand %p9164_p7, %p9625_p6 }
  0x15   : > { %p9167_p9 = pneg %p9166_p8 }
  0x17   : > { %p9174_p13 = pnand %p9173_p12, %p9167_p9 }
  0x19   : > { %9177 = shalt.err (!%p9174_p13)
}
  0x1a   : > { %s10181_s20 = smov 64   ;;  %s9504_s21 = smov 4  }
  0x1b   : > { %8152 = dma.hbm_to_vmem [thread:$0]  (!%p9617_p5), %s10169_s2, 192, %s365_s29, [#allocation9], %s10181_s20, %s10181_s20, %s9504_s21  }
  0x1c   : > { %s9189_s24 = scalar_lea.vmem %s9613_s14, 3456  ;;  %p9197_p7 = scmp.lt.s32.totalorder %s9613_s14, %s9613_s14 }
  0x1d   : > { %p9190_p0 = scmp.ne.s32.totalorder %s9613_s14, %s9189_s24  ;;  %p9198_p8 = scmp.lt.s32.totalorder %s9189_s24, %s9189_s24 }
  0x1f   : > { %p9192_p1 = pnand %p9190_p0, %p9625_p6  ;;  %p9199_p9 = por %p9198_p8, %p9197_p7 }
  0x21   : > { %p9193_p4 = pneg %p9192_p1 }
  0x23   : > { %p9200_p10 = pnand %p9199_p9, %p9193_p4 }
  0x25   : > { %9203 = shalt.err (!%p9200_p10)
}
  0x26   : > { %8158 = dma.hbm_to_vmem [thread:$0]  (!%p9617_p5), %s10171_s4, 3456, %s9613_s14, [#allocation12], %s10181_s20, %s10181_s20, %s9504_s21  }
  0x27   : > { %s9215_s29 = scalar_lea.vmem %s9621_s17, 30720  ;;  %p9223_p0 = scmp.lt.s32.totalorder %s9621_s17, %s9621_s17 }
  0x28   : > { %p9216_p11 = scmp.ne.s32.totalorder %s9621_s17, %s9215_s29  ;;  %p9224_p1 = scmp.lt.s32.totalorder %s9215_s29, %s9215_s29 }
  0x2a   : > { %p9218_p12 = pnand %p9216_p11, %p9625_p6  ;;  %p9225_p4 = por %p9224_p1, %p9223_p0 }
  0x2c   : > { %p9219_p13 = pneg %p9218_p12 }
  0x2e   : > { %p9226_p7 = pnand %p9225_p4, %p9219_p13 }
  0x30   : > { %9229 = shalt.err (!%p9226_p7)
}
  0x31   : > { %s9505_s16 = smov 256   ;;  %s9506_s19 = smov 16  }
  0x32   : > { %8164 = dma.hbm_to_vmem [thread:$0]  (!%p9617_p5), %s10173_s6, 30720, %s9621_s17, [#allocation15], %s9505_s16, %s9505_s16, %s9506_s19  }
  0x33   : > { %s9507_s14 = smov [#allocation17]   ;;  %s9508_s28 = smov [#allocation20]  }
  0x34   : > { %s443_s24 = sshll.u32 %s9507_s14, 4  ;;  %s465_s30 = sshll.u32 %s9508_s28, 4  ;;  %s444_s24 = int_to_ptr.vmem [resolvable:$true] %s443_s24  ;;  %s466_s30 = int_to_ptr.vmem [resolvable:$true] %s465_s30 }
  0x35   : > { %s9241_s29 = scalar_lea.vmem %s444_s24, 16  ;;  %s9248_s20 = scalar_lea.vmem %s444_s24, 32 }
  0x36   : > { %p9242_p8 = scmp.ne.s32.totalorder %s444_s24, %s9241_s29  ;;  %p9249_p11 = scmp.lt.s32.totalorder %s444_s24, %s444_s24 }
  0x37   : > { %p9250_p12 = scmp.lt.s32.totalorder %s9248_s20, %s9241_s29 }
  0x38   : > { %p9244_p9 = pnand %p9242_p8, %p9625_p6 }
  0x39   : > { %p9251_p13 = por %p9250_p12, %p9249_p11 }
  0x3a   : > { %p9245_p10 = pneg %p9244_p9 }
  0x3c   : > { %p9252_p0 = pnand %p9251_p13, %p9245_p10 }
  0x3e   : > { %9255 = shalt.err (!%p9252_p0)
}
  0x3f   : > { %8170 = dma.hbm_to_vmem [thread:$0]  (!%p9617_p5), %s10175_s8, 16, %s444_s24, [#allocation18]  }
  0x40   : > { %s9267_s19 = scalar_lea.vmem %s466_s30, 32  ;;  %p9275_p8 = scmp.lt.s32.totalorder %s466_s30, %s466_s30 }
  0x41   : > { %p9268_p1 = scmp.ne.s32.totalorder %s466_s30, %s9267_s19  ;;  %p9276_p9 = scmp.lt.s32.totalorder %s9267_s19, %s9267_s19 }
  0x43   : > { %p9270_p4 = pnand %p9268_p1, %p9625_p6  ;;  %p9277_p2 = por %p9276_p9, %p9275_p8 }
  0x45   : > { %p9271_p7 = pneg %p9270_p4 }
  0x47   : > { %p9278_p3 = pnand %p9277_p2, %p9271_p7 }
  0x49   : > { %9281 = shalt.err (!%p9278_p3)
}
  0x4a   : > { %8176 = dma.hbm_to_vmem [thread:$0]  (!%p9617_p5), %s10177_s10, 32, %s466_s30, [#allocation21]  }
  0x4b   : > { %s9509_s23 = smov [#allocation6]   ;;  %s9510_s24 = smov [#allocation10]  }
  0x4c   : > { %s351_s14 = sshll.u32 %s9509_s23, 4  ;;  %s377_s28 = sshll.u32 %s9510_s24, 4  ;;  %s352_s14 = int_to_ptr.vmem [resolvable:$true] %s351_s14  ;;  %s378_s28 = int_to_ptr.vmem [resolvable:$true] %s377_s28 }
  0x4d   : > { %s9293_s29 = scalar_lea.vmem %s352_s14, 384  ;;  %p9301_p2 = scmp.lt.s32.totalorder %s352_s14, %s352_s14 }
  0x4e   : > { %p9294_p10 = scmp.ne.s32.totalorder %s352_s14, %s9293_s29  ;;  %p9302_p3 = scmp.lt.s32.totalorder %s9293_s29, %s9293_s29 }
  0x50   : > { %p9296_p11 = pnand %p9294_p10, %p9625_p6  ;;  %p9303_p13 = por %p9302_p3, %p9301_p2 }
  0x52   : > { %p9297_p12 = pneg %p9296_p11 }
  0x54   : > { %p9304_p0 = pnand %p9303_p13, %p9297_p12 }
  0x56   : > { %9307 = shalt.err (!%p9304_p0)
}
  0x57   : > { %s10188_s30 = smov 64   ;;  %s9319_s19 = scalar_lea.vmem %s378_s28, 2496 }
  0x58   : > { %8149 = dma.hbm_to_vmem [thread:$0]  (!%p9617_p5), %s10168_s1, 384, %s352_s14, [#allocation7], %s10188_s30, %s10188_s30, %s9504_s21  }
  0x59   : > { %p9320_p1 = scmp.ne.s32.totalorder %s378_s28, %s9319_s19  ;;  %p9327_p8 = scmp.lt.s32.totalorder %s378_s28, %s378_s28 }
  0x5a   : > { %p9328_p9 = scmp.lt.s32.totalorder %s9319_s19, %s9319_s19 }
  0x5b   : > { %p9322_p4 = pnand %p9320_p1, %p9625_p6 }
  0x5c   : > { %p9329_p10 = por %p9328_p9, %p9327_p8 }
  0x5d   : > { %p9323_p7 = pneg %p9322_p4 }
  0x5f   : > { %p9330_p11 = pnand %p9329_p10, %p9323_p7 }
  0x61   : > { %9333 = shalt.err (!%p9330_p11)
}
  0x62   : > { %8155 = dma.hbm_to_vmem [thread:$0]  (!%p9617_p5), %s10170_s3, 2496, %s378_s28, [#allocation9], %s10188_s30, %s10188_s30, %s9504_s21  }
  0x63   : > { %s9511_s23 = smov [#allocation13]  }
  0x64   : > { %s403_s14 = sshll.u32 %s9511_s23, 4  ;;  %s404_s14 = int_to_ptr.vmem [resolvable:$true] %s403_s14 }
  0x65   : > { %s9345_s24 = scalar_lea.vmem %s404_s14, 7680  ;;  %p9353_p13 = scmp.lt.s32.totalorder %s404_s14, %s404_s14 }
  0x66   : > { %p9346_p12 = scmp.ne.s32.totalorder %s404_s14, %s9345_s24  ;;  %p9354_p0 = scmp.lt.s32.totalorder %s9345_s24, %s9345_s24 }
  0x68   : > { %p9348_p2 = pnand %p9346_p12, %p9625_p6  ;;  %p9355_p1 = por %p9354_p0, %p9353_p13 }
  0x6a   : > { %p9349_p3 = pneg %p9348_p2 }
  0x6c   : > { %p9356_p4 = pnand %p9355_p1, %p9349_p3 }
  0x6e   : > { %9359 = shalt.err (!%p9356_p4)
}
  0x6f   : > { %s9512_s29 = smov 128   ;;  %s9513_s17 = smov 8  }
  0x70   : > { %8161 = dma.hbm_to_vmem [thread:$0]  (!%p9617_p5), %s10172_s5, 7680, %s404_s14, [#allocation12], %s9512_s29, %s9512_s29, %s9513_s17  }
  0x71   : > { %s9514_s28 = smov [#allocation16]  }
  0x72   : > { %s429_s30 = sshll.u32 %s9514_s28, 4  ;;  %s430_s30 = int_to_ptr.vmem [resolvable:$true] %s429_s30 }
  0x73   : > { %s9371_s19 = scalar_lea.vmem %s430_s30, 36864  ;;  %p9379_p10 = scmp.lt.s32.totalorder %s430_s30, %s430_s30 }
  0x74   : > { %p9372_p7 = scmp.ne.s32.totalorder %s430_s30, %s9371_s19  ;;  %p9380_p11 = scmp.lt.s32.totalorder %s9371_s19, %s9371_s19 }
  0x76   : > { %p9374_p8 = pnand %p9372_p7, %p9625_p6  ;;  %p9381_p12 = por %p9380_p11, %p9379_p10 }
  0x78   : > { %p9375_p9 = pneg %p9374_p8 }
  0x7a   : > { %p9382_p2 = pnand %p9381_p12, %p9375_p9 }
  0x7c   : > { %9385 = shalt.err (!%p9382_p2)
}
  0x7d   : > { %s9515_s20 = smov 192   ;;  %s9516_s22 = smov 12  }
  0x7e   : > { %8167 = dma.hbm_to_vmem [thread:$0]  (!%p9617_p5), %s10174_s7, 36864, %s430_s30, [#allocation15], %s9515_s20, %s9515_s20, %s9516_s22  }
  0x7f   : > { %s9517_s24 = smov [#allocation19]   ;;  %s9518_s17 = smov [#allocation22]  }
  0x80   : > { %s454_s29 = sshll.u32 %s9517_s24, 4  ;;  %s476_s16 = sshll.u32 %s9518_s17, 4  ;;  %s455_s29 = int_to_ptr.vmem [resolvable:$true] %s454_s29  ;;  %s477_s16 = int_to_ptr.vmem [resolvable:$true] %s476_s16 }
  0x81   : > { %s9397_s21 = scalar_lea.vmem %s455_s29, 16  ;;  %s9404_s28 = scalar_lea.vmem %s455_s29, 32 }
  0x82   : > { %p9398_p3 = scmp.ne.s32.totalorder %s455_s29, %s9397_s21  ;;  %p9405_p1 = scmp.lt.s32.totalorder %s455_s29, %s455_s29 }
  0x83   : > { %p9406_p4 = scmp.lt.s32.totalorder %s9404_s28, %s9397_s21 }
  0x84   : > { %p9400_p13 = pnand %p9398_p3, %p9625_p6 }
  0x85   : > { %p9407_p7 = por %p9406_p4, %p9405_p1 }
  0x86   : > { %p9401_p0 = pneg %p9400_p13 }
  0x88   : > { %p9408_p8 = pnand %p9407_p7, %p9401_p0 }
  0x8a   : > { %9411 = shalt.err (!%p9408_p8)
}
  0x8b   : > { %8173 = dma.hbm_to_vmem [thread:$0]  (!%p9617_p5), %s10176_s9, 16, %s455_s29, [#allocation18]  }
  0x8c   : > { %s9423_s20 = scalar_lea.vmem %s477_s16, 64  ;;  %p9431_p12 = scmp.lt.s32.totalorder %s477_s16, %s477_s16 }
  0x8d   : > { %p9424_p9 = scmp.ne.s32.totalorder %s477_s16, %s9423_s20  ;;  %p9432_p2 = scmp.lt.s32.totalorder %s9423_s20, %s9423_s20 }
  0x8f   : > { %p9426_p10 = pnand %p9424_p9, %p9625_p6  ;;  %p9433_p3 = por %p9432_p2, %p9431_p12 }
  0x91   : > { %p9427_p11 = pneg %p9426_p10 }
  0x93   : > { %p9434_p13 = pnand %p9433_p3, %p9427_p11 }
  0x95   : > { %9437 = shalt.err (!%p9434_p13)
}
  0x96   : > { %8179 = dma.hbm_to_vmem [thread:$0]  (!%p9617_p5), %s10178_s11, 64, %s477_s16, [#allocation21]  }
  0x97   : > { %s9519_s14 = smov [#allocation23]  }
  0x98   : > { %s487_s24 = sshll.u32 %s9519_s14, 4  ;;  %s488_s24 = int_to_ptr.vmem [resolvable:$true] %s487_s24 }
  0x99   : > { %s9449_s29 = scalar_lea.vmem %s488_s24, 48  ;;  %s9456_s17 = scalar_lea.vmem %s488_s24, 64 }
  0x9a   : > { %p9450_p0 = scmp.ne.s32.totalorder %s488_s24, %s9449_s29  ;;  %p9457_p7 = scmp.lt.s32.totalorder %s488_s24, %s488_s24 }
  0x9b   : > { %p9458_p8 = scmp.lt.s32.totalorder %s9456_s17, %s9449_s29 }
  0x9c   : > { %p9452_p1 = pnand %p9450_p0, %p9625_p6 }
  0x9d   : > { %p9459_p9 = por %p9458_p8, %p9457_p7 }
  0x9e   : > { %p9453_p4 = pneg %p9452_p1 }
  0xa0   : > { %p9460_p10 = pnand %p9459_p9, %p9453_p4 }
  0xa2   : > { %9463 = shalt.err (!%p9460_p10)
}
  0xa3   : > { %8182 = dma.hbm_to_vmem [thread:$0]  (!%p9617_p5), %s10179_s12, 48, %s488_s24, [#allocation24]  }
  0xa4   : > { %p10189_p11 = scmp.ne.s32.totalorder %s10185_s27, 0 }
  0xa5   : > { %p10190_p12 = scmp.eq.s32.totalorder (!%p10189_p11), %s9602_s26, 0 }
  0xa6   : > { %508 = sbr.rel (%p10189_p11) target bundleno = 2962 (0xb92), region = 72 }
  0xab   : > { %9469 = dma.done.wait (%p10190_p12), [#allocation7], 384   ;;  %p10191_p6 = pmov %p10190_p12 }
  0xad   : > { %9471 = vsyncadd (%p10191_p6), [#allocation7], 4294966912  ;;  %p10192_p2 = pmov %p10191_p6 }
  0xaf   : > { %9473 = dma.done.wait (%p10192_p2), [#allocation9], 2688   ;;  %p10193_p3 = pmov %p10192_p2 }
  0xb0   : > { %p10194_p13 = pmov %p10192_p2 }
  0xb1   : > { %9475 = vsyncadd (%p10193_p3), [#allocation9], 4294964608 }
  0xb2   : > { %9477 = dma.done.wait (%p10194_p13), [#allocation12], 11136   ;;  %p10195_p5 = pmov %p10192_p2 }
  0xb3   : > { %p10196_p0 = pmov %p10192_p2 }
  0xb4   : > { %9479 = vsyncadd (%p10195_p5), [#allocation12], 4294956160 }
  0xb5   : > { %9481 = dma.done.wait (%p10196_p0), [#allocation15], 67584   ;;  %p10197_p1 = pmov %p10196_p0 }
  0xb6   : > { %p10198_p4 = pmov %p10196_p0 }
  0xb7   : > { %9483 = vsyncadd (%p10197_p1), [#allocation15], 4294899712 }
  0xb8   : > { %9485 = dma.done.wait (%p10198_p4), [#allocation18], 32   ;;  %p10199_p7 = pmov %p10196_p0 }
  0xb9   : > { %p10200_p8 = pmov %p10196_p0 }
  0xba   : > { %9487 = vsyncadd (%p10199_p7), [#allocation18], 4294967264 }
  0xbb   : > { %9489 = dma.done.wait (%p10200_p8), [#allocation21], 96   ;;  %p10201_p9 = pmov %p10196_p0 }
  0xbc   : > { %p10202_p10 = pmov %p10196_p0 }
  0xbd   : > { %9491 = vsyncadd (%p10201_p9), [#allocation21], 4294967200 }
  0xbe   : > { %9493 = dma.done.wait (%p10202_p10), [#allocation24], 48   ;;  %p10203_p11 = pmov %p10196_p0 }
  0xbf   : > { %p596_p12 = scmp.lt.s32.totalorder %s9602_s26, 1  ;;  %v9520_v0 = vmov 0.0   ;;  %vm9521_vm0 = vmmov 0   ;;  %vm612_vm1 = vcmask 1040384   ;;  %v8244_v7 = vld [vmem:[#allocation6] sm:$0xff]   ;;  %vm827_vm2 = vcmask 1042432  }
  0xc0   : > { %9495 = vsyncadd (%p10203_p11), [#allocation24], 4294967248  ;;  %8012 = vmatprep.subr.bf16.mxu0 %v9520_v0  ;;  %8022 = vmatprep.subr.bf16.mxu1 %v9520_v0  ;;  %v8246_v4 = vld [vmem:[#allocation10 + $0x64] ss:$0 sps:$4 sm:$0x77]   ;;  %vm655_vm3 = vcmask 277504  }
  0xc1   : > { %s10217_s26 = smov (!%p596_p12, %s9602_s26), 1  ;;  %8018 = vmatprep.mubr.msk.bf16.mxu0 %vm9521_vm0, %v9520_v0  ;;  %8028 = vmatprep.mubr.msk.bf16.mxu1 %vm9521_vm0, %v9520_v0  ;;  %v8247_v5 = vld [vmem:[#allocation10 + $0x30] ss:$0 sps:$4 sm:$0x77]   ;;  %v8245_v8 = vld [vmem:[#allocation6 + $0x8] sm:$0xff]   ;;  %v829_v9 = vsel %vm827_vm2, %v8246_v4, 0 }
  0xc2   : > { %s8096_s27 = smul.u32 20, %s10217_s26  ;;  %v915_v10 = vsel %vm827_vm2, %v8247_v5, 0  ;;  %v8248_v11 = vld [vmem:[#allocation10 + $0x5c] sm:$0xff]   ;;  %v8249_v12 = vld [vmem:[#allocation10 + $0x28] sm:$0xff]   ;;  %v8250_v13 = vld [vmem:[#allocation10 + $0x54] sm:$0xff]   ;;  %vm823_vm4 = vcmask 834560  }
  0xc3   : > { %v8251_v14 = vld [vmem:[#allocation10 + $0x20] sm:$0xff]   ;;  %v8252_v15 = vld [vmem:[#allocation10 + $0x4c] sm:$0xff]   ;;  %v8253_v16 = vld [vmem:[#allocation10 + $0x18] sm:$0xff]   ;;  %vm613_vm5 = vcmask 126980   ;;  %v9522_v59 = vmov 0   ;;  %vm607_vm7 = vcmask 1043456  }
  0xc4   : > { %s9779_s16 = scalar_lea.vmem %s10167_s0, %s8096_s27  ;;  %v8254_v17 = vld [vmem:[#allocation10 + $0x44] sm:$0xff]   ;;  %v8255_v18 = vld [vmem:[#allocation10 + $0x10] sm:$0xff]   ;;  %v8256_v19 = vld [vmem:[#allocation10 + $0x3c] sm:$0xff]   ;;  %625 = vst [vmem:[#allocation4 + $0xc] sm:$0x11] %v9522_v59  ;;  %vm608_vm8 = vcmask 130052  }
  0xc5   : > { %v8241_v1 = vld [vmem:[%s9779_s16 + $0x10] ss:$0 sps:$4 sm:$0x11]   ;;  %v8242_v3 = vld [vmem:[%s9779_s16 + $0x8] sm:$0xff]   ;;  %v8243_v6 = vld [vmem:[%s9779_s16] sm:$0xff]   ;;  %vm616_vm10 = vcmask 261124  }
  0xc6   : > { %v9783_v2 = vsel %vm612_vm1, %v8241_v1, 0  ;;  %v8257_v20 = vld [vmem:[#allocation10 + $0x8] sm:$0xff]   ;;  %v8258_v21 = vld [vmem:[#allocation10 + $0x34] sm:$0xff]   ;;  %v8259_v22 = vld [vmem:[#allocation10] sm:$0xff]   ;;  %vm1130_vm12 = vsmask.f32 256 }
  0xc7   : > { %8013 = vmatpush3.bf16.msra.mxu0 %v9783_v2  ;;  %8023 = vmatpush3.bf16.msra.mxu1 %v9783_v2  ;;  %v8261_v25 = vld [vmem:[#allocation10 + $0x98] ss:$0 sps:$4 sm:$0x77]   ;;  %v8262_v35 = vld [vmem:[#allocation10 + $0x90] sm:$0xff]   ;;  %v8263_v36 = vld [vmem:[#allocation10 + $0x88] sm:$0xff]   ;;  %s9523_s30 = smov 8  }
  0xc8   : > { %8014 = vmatprep.subr.bf16.mxu0 %v9520_v0  ;;  %8024 = vmatprep.subr.bf16.mxu1 %v9520_v0  ;;  %v1068_v34 = vsel %vm827_vm2, %v8261_v25, 0  ;;  %v9146_v37 = vld [vmem:[%s9779_s16 + $0x8] sm:$0xff]   ;;  %v8260_v38 = vld [vmem:[#allocation6 + $0x10] sm:$0xff]   ;;  %v8264_v40 = vld [vmem:[#allocation10 + $0x80] sm:$0xff]   ;;  %vm1131_vm13 = vsmask.f32 4368 }
  0xc9   : > { %v9147_v39 = vld [vmem:[%s9779_s16] sm:$0xff]   ;;  %v8265_v41 = vld [vmem:[#allocation10 + $0x78] sm:$0xff]   ;;  %vm614_vm6 = vmor %vm613_vm5, %vm612_vm1  ;;  %vm1180_vm15 = vcmask 1040448   ;;  %vm1183_vm2 = vsmask.f32 4352  ;;  %s9524_s19 = smov 16  }
  0xca   : > { %v8266_v42 = vld [vmem:[#allocation10 + $0x70] sm:$0xff]   ;;  %v8267_v43 = vld [vmem:[#allocation10 + $0x68] sm:$0xff]   ;;  %615 = vst.msk [vmem:[#allocation2 + $0x10] sm:$0x11] %vm614_vm6, %v9522_v59  ;;  %vm609_vm9 = vmor %vm608_vm8, %vm607_vm7  ;;  %vm1166_vm6 = vcmask 1043520   ;;  %s9525_s20 = smov 32  }
  0xcb   : > { %8015 = vmatpush3.bf16.msra.mxu0 %v8242_v3  ;;  %8025 = vmatpush3.bf16.msra.mxu1 %v8242_v3  ;;  %v7164_v61 = vld [vmem:[#allocation17] ss:$0 sm:$0xff]  ;;  %611 = vst.msk [vmem:[#allocation2 + $0x8] sm:$0xff] %vm609_vm9, %v9522_v59  ;;  %610 = vst.msk [vmem:[#allocation2] sm:$0xff] %vm609_vm9, %v9522_v59  ;;  %vm1167_vm9 = vsmask.f32 7938 }
  0xcc   : > { %8016 = vmatprep.subr.bf16.mxu0 %v9520_v0  ;;  %8026 = vmatprep.subr.bf16.mxu1 %v9520_v0  ;;  %vm617_vm11 = vmor %vm616_vm10, %vm607_vm7  ;;  %vm1169_vm7 = vcmask 64516   ;;  %s8097_s22 = smul.u32 24, %s10217_s26 }
  0xcd   : > { %618 = vst.msk [vmem:[#allocation3] sm:$0xff] %vm617_vm11, %v9522_v59  ;;  %vm1132_vm14 = vmor %vm1130_vm12, %vm1131_vm13  ;;  %vm1170_vm11 = vsmask.f32 7954  ;;  %vm1159_vm13 = vcmask 64512  }
  0xce   : > { %s605_s24 = scalar_lea.vmem %s10180_s13, %s8097_s22 }
  0xcf   : > { %8017 = vmatpush3.bf16.msra.mxu0 %v8243_v6  ;;  %8027 = vmatpush3.bf16.msra.mxu1 %v8243_v6 }
  0xd0   : > { %8032 = vmatprep.subr.bf16.mxu0 %v9520_v0  ;;  %8050 = vmatprep.subr.bf16.mxu1 %v9520_v0 }
  0xd2   : > { %8019 = vmatmul.mubr.msk.bf16.vlgmr.msra.gmra.mxu0 %vm655_vm3, %v8244_v7  ;;  %8029 = vmatmul.mubr.msk.bf16.vlgmr.msra.gmra.mxu1 %vm655_vm3, %v8245_v8 }
  0xd3   : > { %8033 = vmatpush3.bf16.msra.mxu0 %v829_v9  ;;  %8051 = vmatpush3.bf16.msra.mxu1 %v915_v10 }
  0xd4   : > { %8034 = vmatprep.subr.bf16.mxu0 %v9520_v0  ;;  %8052 = vmatprep.subr.bf16.mxu1 %v9520_v0 }
  0xd5   : > { %8046 = vmatprep.mubr.msk.bf16.mxu0 %vm9521_vm0, %v9520_v0  ;;  %8064 = vmatprep.mubr.msk.bf16.mxu1 %vm9521_vm0, %v9520_v0 }
  0xd7   : > { %8035 = vmatpush3.bf16.msra.mxu0 %v8248_v11  ;;  %8053 = vmatpush3.bf16.msra.mxu1 %v8249_v12 }
  0xd8   : > { %8036 = vmatprep.subr.bf16.mxu0 %v9520_v0  ;;  %8054 = vmatprep.subr.bf16.mxu1 %v9520_v0 }
  0xdb   : > { %8037 = vmatpush3.bf16.msra.mxu0 %v8250_v13  ;;  %8055 = vmatpush3.bf16.msra.mxu1 %v8251_v14 }
  0xdc   : > { %8038 = vmatprep.subr.bf16.mxu0 %v9520_v0  ;;  %8056 = vmatprep.subr.bf16.mxu1 %v9520_v0 }
  0xdf   : > { %8039 = vmatpush3.bf16.msra.mxu0 %v8252_v15  ;;  %8057 = vmatpush3.bf16.msra.mxu1 %v8253_v16 }
  0xe0   : > { %8040 = vmatprep.subr.bf16.mxu0 %v9520_v0  ;;  %8058 = vmatprep.subr.bf16.mxu1 %v9520_v0 }
  0xe3   : > { %8041 = vmatpush3.bf16.msra.mxu0 %v8254_v17  ;;  %8059 = vmatpush3.bf16.msra.mxu1 %v8255_v18 }
  0xe4   : > { %8042 = vmatprep.subr.bf16.mxu0 %v9520_v0  ;;  %8060 = vmatprep.subr.bf16.mxu1 %v9520_v0 }
  0xe7   : > { %8043 = vmatpush3.bf16.msra.mxu0 %v8256_v19  ;;  %8061 = vmatpush3.bf16.msra.mxu1 %v8257_v20  ;;  %v8296_v20 = vld [vmem:[#allocation11 + $0xd0] sm:$0xff]  }
  0xe8   : > { %8044 = vmatprep.subr.bf16.mxu0 %v9520_v0  ;;  %8062 = vmatprep.subr.bf16.mxu1 %v9520_v0 }
  0xeb   : > { %8045 = vmatpush3.bf16.msra.mxu0 %v8258_v21  ;;  %8063 = vmatpush3.bf16.msra.mxu1 %v8259_v22 }
  0xec   : > { %8068 = vmatprep.subr.bf16.mxu0 %v9520_v0  ;;  %8078 = vmatprep.subr.bf16.mxu1 %v9520_v0 }
 0x192   : > { %v696_v23 = vpop.f32.mrf.mxu0  ;;  %v762_v24 = vpop.f32.mrf.mxu1 }
 0x194   : > { %v8020_v26 = vpop.f32.mrf.mxu0  ;;  %v8030_v27 = vpop.f32.mrf.mxu1 }
 0x196   : > { %v699_v28 = vpop.f32.mrf.mxu0  ;;  %v765_v29 = vpop.f32.mrf.mxu1 }
 0x197   : > { %v703_v30 = vpack.c.bf16 %v699_v28, %v696_v23  ;;  %v769_v31 = vpack.c.bf16 %v765_v29, %v762_v24  ;;  %v1186_v24 = vld [vmem:[#allocation2 + $0x10] sm:$0x11] }
 0x198   : > { %v8031_v32 = vpop.f32.mrf.mxu1  ;;  %v8021_v33 = vpop.f32.mrf.mxu0 }
 0x199   : > { %8047 = vmatmul.mubr.msk.bf16.vlgmr.msra.gmra.mxu0 %vm823_vm4, %v769_v31  ;;  %8065 = vmatmul.mubr.msk.bf16.vlgmr.msra.gmra.mxu1 %vm823_vm4, %v703_v30  ;;  %v1173_v32 = vld [vmem:[#allocation2] sm:$0xff] }
 0x19a   : > { %8069 = vmatpush3.bf16.msra.mxu0 %v9783_v2  ;;  %8074 = vmatprep.mubr.msk.bf16.mxu0 %vm9521_vm0, %v9520_v0 }
 0x19b   : > { %8070 = vmatprep.subr.bf16.mxu0 %v9520_v0  ;;  %8079 = vmatpush3.bf16.msra.mxu1 %v1068_v34 }
 0x19c   : > { %8080 = vmatprep.subr.bf16.mxu1 %v9520_v0  ;;  %8092 = vmatprep.mubr.msk.bf16.mxu1 %vm9521_vm0, %v9520_v0  ;;  %vm1182_vm0 = vcmask 61444  }
 0x19e   : > { %8071 = vmatpush3.bf16.msra.mxu0 %v9146_v37 }
 0x19f   : > { %8072 = vmatprep.subr.bf16.mxu0 %v9520_v0  ;;  %8081 = vmatpush3.bf16.msra.mxu1 %v8262_v35 }
 0x1a0   : > { %8082 = vmatprep.subr.bf16.mxu1 %v9520_v0 }
 0x1a2   : > { %8073 = vmatpush3.bf16.msra.mxu0 %v9147_v39 }
 0x1a3   : > { %8083 = vmatpush3.bf16.msra.mxu1 %v8263_v36 }
 0x1a4   : > { %8084 = vmatprep.subr.bf16.mxu1 %v9520_v0 }
 0x1a5   : > { %8075 = vmatmul.mubr.msk.bf16.vlgmr.msra.gmra.mxu0 %vm655_vm3, %v8260_v38  ;;  %vm9851_vm3 = vmand %vm1180_vm15, %vm1130_vm12 }
 0x1a6   : > { %1316 = vmatprep.mubr.bf16.mxu0 %v9522_v59  ;;  %vm1168_vm15 = vmand %vm1166_vm6, %vm1167_vm9 }
 0x1a7   : > { %8085 = vmatpush3.bf16.msra.mxu1 %v8264_v40 }
 0x1a8   : > { %8086 = vmatprep.subr.bf16.mxu1 %v9520_v0 }
 0x1ab   : > { %8087 = vmatpush3.bf16.msra.mxu1 %v8265_v41 }
 0x1ac   : > { %8088 = vmatprep.subr.bf16.mxu1 %v9520_v0 }
 0x1af   : > { %8089 = vmatpush3.bf16.msra.mxu1 %v8266_v42  ;;  %v1192_v42 = vld [vmem:[#allocation8] sm:$0xf] }
 0x1b0   : > { %8090 = vmatprep.subr.bf16.mxu1 %v9520_v0 }
 0x1b3   : > { %8091 = vmatpush3.bf16.msra.mxu1 %v8267_v43  ;;  %v1280_v43 = vld [vmem:[#allocation8 + $0x4] sm:$0xf] }
 0x259   : > { %v865_v44 = vpop.f32.mrf.mxu0  ;;  %v951_v45 = vpop.f32.mrf.mxu1 }
 0x25a   : > { %v952_v46 = vadd.f32 %v951_v45, %v865_v44  ;;  %v8270_v44 = vld [vmem:[#allocation11 + $0x80] sm:$0xff]   ;;  %v8279_v45 = vld [vmem:[#allocation11 + $0x38] sm:$0xff]  }
 0x25b   : > { %v8048_v47 = vpop.f32.mrf.mxu0  ;;  %v8066_v48 = vpop.f32.mrf.mxu1 }
 0x25c   : > { %v8280_v47 = vld [vmem:[#allocation11 + $0x30] sm:$0xff]  }
 0x25d   : > { %v868_v49 = vpop.f32.mrf.mxu0  ;;  %v954_v50 = vpop.f32.mrf.mxu1  ;;  %v8272_v48 = vld [vmem:[#allocation11 + $0x70] sm:$0xff]  }
 0x25e   : > { %v955_v51 = vadd.f32 %v954_v50, %v868_v49  ;;  %v8281_v49 = vld [vmem:[#allocation11 + $0x28] sm:$0xff]  }
 0x25f   : > { %v8049_v52 = vpop.f32.mrf.mxu0  ;;  %v8067_v53 = vpop.f32.mrf.mxu1  ;;  %v8273_v50 = vld [vmem:[#allocation11 + $0x68] sm:$0xff]  }
 0x260   : > { %v8274_v52 = vld [vmem:[#allocation11 + $0x60] sm:$0xff]   ;;  %v8283_v53 = vld [vmem:[#allocation11 + $0x18] sm:$0xff]  }
 0x265   : > { %v1003_v54 = vpop.f32.mrf.mxu0 }
 0x267   : > { %v8076_v55 = vpop.f32.mrf.mxu0 }
 0x268   : > { %v8284_v55 = vld [vmem:[#allocation11 + $0x10] sm:$0xff]  }
 0x269   : > { %v1006_v56 = vpop.f32.mrf.mxu0 }
 0x26a   : > { %v1010_v57 = vpack.c.bf16 %v1006_v56, %v1003_v54  ;;  %v8275_v54 = vld [vmem:[#allocation11 + $0x58] sm:$0xff]   ;;  %v8276_v56 = vld [vmem:[#allocation11 + $0x50] sm:$0xff]  }
 0x26b   : > { %v8077_v58 = vpop.f32.mrf.mxu0 }
 0x26c   : > { %8093 = vmatmul.mubr.msk.bf16.vlgmr.msra.gmra.mxu1 %vm823_vm4, %v1010_v57  ;;  %vm9856_vm4 = vmand %vm1182_vm0, %vm1183_vm2  ;;  %v8285_v57 = vld [vmem:[#allocation11 + $0x8] sm:$0xff]  }
 0x26d   : > { %1250 = vmatprep.mubr.bf16.mxu1 %v9522_v59  ;;  %vm1185_vm10 = vmor %vm9856_vm4, %vm9851_vm3  ;;  %vm1208_vm4 = vcmask 146432   ;;  %v8277_v58 = vld [vmem:[#allocation11 + $0x48] sm:$0xff]  }
 0x26e   : > { %vm1171_vm0 = vmand %vm1169_vm7, %vm1170_vm11 }
 0x26f   : > { %vm1172_vm3 = vmor %vm1171_vm0, %vm1168_vm15 }
 0x32c   : > { %v1104_v60 = vpop.f32.mrf.mxu1 }
 0x32d   : > { %v1111_v62 = vadd.f32 %v1104_v60, %v952_v46  ;;  %v8271_v46 = vld [vmem:[#allocation11 + $0x78] sm:$0xff]   ;;  %v8286_v60 = vld [vmem:[#allocation11] sm:$0xff]  }
 0x32e   : > { %v8094_v63 = vpop.f32.mrf.mxu1 }
 0x32f   : > { %v1120_v0 = vadd.f32 %v7164_v61, %v1111_v62  ;;  %v8287_v62 = vld [vmem:[#allocation11 + $0x40] sm:$0xff]  }
 0x330   : > { %v1107_v1 = vpop.f32.mrf.mxu1 }
 0x331   : > { %v1122_v2 = vmax.f32 %v1120_v0, 0.0  ;;  %v1112_v3 = vadd.f32 %v1107_v1, %v955_v51  ;;  %v8282_v51 = vld [vmem:[#allocation11 + $0x20] sm:$0xff]  }
 0x332   : > { %v8095_v4 = vpop.f32.mrf.mxu1 }
 0x333   : > { %v7838_v5 = vpack.c.bf16 %v1122_v2, %v1122_v2  ;;  %v1121_v6 = vadd.f32 %v7164_v61, %v1112_v3  ;;  %v8278_v61 = vld [vmem:[#allocation11 + $0x88] sm:$0xff]  }
 0x335   : > { %v1134_v7 = vshrl.u32 %v7838_v5, 16  ;;  %v1123_v8 = vmax.f32 %v1121_v6, 0.0  ;;  %v1137_v17 = vshll.u32 %v7838_v5, 16 }
 0x337   : > { %v7839_v9 = vpack.c.bf16 %v1123_v8, %v1123_v8  ;;  %v1136_v10 = vrot.slane %v1134_v7, 7 }
 0x339   : > { %v1142_v11 = vshrl.u32 %v7839_v9, 16  ;;  %v1145_v12 = vshll.u32 %v7839_v9, 16  ;;  %v1140_v15 = vrot.slane %v1136_v10, 4  ;;  %v1139_v19 = vor.u32 %v1137_v17, %v1136_v10  ;;  %v8288_v9 = vld [vmem:[#allocation11 + $0xc8] sm:$0xff]   ;;  %v8293_v17 = vld [vmem:[#allocation11 + $0xa0] sm:$0xff]  }
 0x33b   : > { %v1144_v13 = vrot.slane %v1142_v11, 7 }
 0x33d   : > { %v1149_v14 = vrot.slane %v1144_v13, 4  ;;  %v1147_v16 = vor.u32 %v1145_v12, %v1144_v13  ;;  %v8289_v12 = vld [vmem:[#allocation11 + $0xc0] sm:$0xff]  }
 0x33e   : > { %v1542_v13 = vld [vmem:[#allocation8 + $0x8] sm:$0xf] }
 0x33f   : > { %1154 = vrot.lane.b32.xlu0 %v1149_v14, %s9523_s30  ;;  %v1148_v18 = vsel %vm1132_vm14, %v1140_v15, %v1147_v16  ;;  %vm1178_vm14 = vmor %vm1169_vm7, %vm1166_vm6  ;;  %vm1400_vm6 = vcmask 130048   ;;  %v8290_v14 = vld [vmem:[#allocation11 + $0xb8] sm:$0xff]   ;;  %v8291_v15 = vld [vmem:[#allocation11 + $0xb0] sm:$0xff]   ;;  %vm619_vm7 = vcmask 258052  }
 0x340   : > { %1152 = vrot.lane.b32.xlu1 %v1148_v18, %s9523_s30  ;;  %v8292_v16 = vld [vmem:[#allocation11 + $0xa8] sm:$0xff]   ;;  %v8294_v18 = vld [vmem:[#allocation11 + $0x98] sm:$0xff]  }
 0x343   : > { %1150 = vrot.lane.b32.xlu0 %v1139_v19, %s9523_s30  ;;  %v8295_v19 = vld [vmem:[#allocation11 + $0x90] sm:$0xff]  }
 0x3b1   : > { %v1155_v22 = vpop.permute.xlu0 %1154 }
 0x3b2   : > { %v1158_v23 = vrot.slane %v1155_v22, 4  ;;  %v1153_v25 = vpop.permute.xlu1 %1152 }
 0x3b3   : > { %v1157_v26 = vrot.slane %v1153_v25, 4 }
 0x3b4   : > { %v1162_v27 = vsel %vm1159_vm13, %v1158_v23, %v1155_v22 }
 0x3b5   : > { %v1187_v28 = vsel %vm1185_vm10, %v1162_v27, %v1186_v24  ;;  %v1161_v29 = vsel %vm1159_vm13, %v1157_v26, %v1153_v25  ;;  %v1151_v30 = vpop.permute.xlu0 %1150  ;;  %vm620_vm10 = vmor %vm619_vm7, %vm612_vm1 }
 0x3b6   : > { %1188 = vst [vmem:[#allocation2 + $0x10] sm:$0x11] %v1187_v28  ;;  %1179 = vst.msk [vmem:[#allocation2 + $0x8] sm:$0xff] %vm1178_vm14, %v1161_v29  ;;  %v1156_v31 = vrot.slane %v1151_v30, 4 }
 0x3b7   : > { %621 = vst.msk [vmem:[#allocation3 + $0x8] sm:$0x11] %vm620_vm10, %v9522_v59  ;;  %vm1749_vm14 = vmand %vm613_vm5, %vm1183_vm2  ;;  %vm1920_vm5 = vcmask 261120   ;;  %vm2345_vm10 = vcmask 1040640  }
 0x3b8   : > { %v1160_v33 = vsel %vm1159_vm13, %v1156_v31, %v1151_v30  ;;  %vm1738_vm13 = vcmask 1043584  }
 0x3b9   : > { %v1174_v34 = vsel %vm1172_vm3, %v1160_v33, %v1173_v32  ;;  %vm1739_vm0 = vmand %vm1738_vm13, %vm1167_vm9 }
 0x3ba   : > { %1175 = vst [vmem:[#allocation2] sm:$0xff] %v1174_v34  ;;  %vm1741_vm3 = vmand %vm608_vm8, %vm1170_vm11  ;;  %vm626_vm8 = vcmask 516096  }
 0x3bb   : > { %vm1742_vm7 = vmor %vm1741_vm3, %vm1739_vm0  ;;  %627 = vst.msk [vmem:[#allocation4 + $0x14] sm:$0x1] %vm626_vm8, %v9522_v59  ;;  %vm2334_vm0 = vcmask 1047556   ;;  %vm2340_vm8 = vcmask 257024  }
 0x3bc   : > { %vm9957_vm13 = vmand %vm2345_vm10, %vm1130_vm12 }
 0x3bd   : > { %v1191_v35 = vld [vmem:[#allocation2 + $0x10] sm:$0x11]  ;;  %v1190_v36 = vld [vmem:[#allocation2 + $0x8] sm:$0xff]  ;;  %vm2341_vm10 = vmand %vm2340_vm8, %vm1167_vm9 }
 0x3be   : > { %v9869_v37 = vcombine.high %v1191_v35, %v1191_v35  ;;  %v7169_v38 = vcombine.low %v1191_v35, %v1191_v35  ;;  %v9878_v40 = vcombine.high %v1174_v34, %v1190_v36  ;;  %v9884_v41 = vcombine.low %v1174_v34, %v1190_v36  ;;  %v8297_v36 = vld [vmem:[#allocation13 + $0x70] ss:$8 sps:$4 sm:$0xff]  }
 0x3c0   : > { %7171 = vmatprep.subr.msk.bf16.mxu1 %vm612_vm1, %v9869_v37  ;;  %7173 = vmatprep.subr.msk.bf16.mxu0 %vm612_vm1, %v9869_v37  ;;  %v9876_v39 = vsel %vm612_vm1, %v7169_v38, 0  ;;  %v8302_v38 = vld [vmem:[#allocation13 + $0x64] ss:$8 sps:$4 sm:$0xff]  }
 0x3c1   : > { %1231 = vmatpush1.bf16.msra.mxu1 %v9876_v39  ;;  %1297 = vmatpush1.bf16.msra.mxu0 %v9876_v39 }
 0x3c2   : > { %1232 = vmatprep.subr.bf16.mxu1 %v9878_v40  ;;  %1298 = vmatprep.subr.bf16.mxu0 %v9878_v40 }
 0x3c5   : > { %1233 = vmatpush1.bf16.msra.mxu1 %v9884_v41  ;;  %1299 = vmatpush1.bf16.msra.mxu0 %v9884_v41 }
 0x3c6   : > { %1404 = vmatprep.subr.bf16.mxu0 %v9522_v59  ;;  %1501 = vmatprep.subr.bf16.mxu1 %v9522_v59 }
 0x3c8   : > { %7172 = vmatmul.mubr.msk.bf16.vlgmr.msra.gmra.mxu1 %vm1208_vm4, %v1192_v42  ;;  %7174 = vmatmul.mubr.msk.bf16.vlgmr.msra.gmra.mxu0 %vm1208_vm4, %v1280_v43  ;;  %v8311_v42 = vld [vmem:[#allocation13 + $0x104] ss:$8 sps:$4 sm:$0xff]   ;;  %v8308_v43 = vld [vmem:[#allocation13 + $0x54] ss:$8 sps:$4 sm:$0xff]  }
 0x3c9   : > { %1405 = vmatpush1.bf16.msra.mxu0 %v8270_v44  ;;  %1502 = vmatpush1.bf16.msra.mxu1 %v8279_v45  ;;  %v8309_v44 = vld [vmem:[#allocation13 + $0x100] ss:$8 sps:$4 sm:$0xff]   ;;  %v8317_v45 = vld [vmem:[#allocation13 + $0xf4] ss:$8 sps:$4 sm:$0xff]  }
 0x3ca   : > { %1406 = vmatprep.subr.bf16.mxu0 %v9522_v59  ;;  %1503 = vmatprep.subr.bf16.mxu1 %v9522_v59 }
 0x3cd   : > { %1407 = vmatpush1.bf16.msra.mxu0 %v8271_v46  ;;  %1504 = vmatpush1.bf16.msra.mxu1 %v8280_v47  ;;  %v8306_v46 = vld [vmem:[#allocation13 + $0x50] ss:$8 sps:$4 sm:$0xff]   ;;  %v8314_v47 = vld [vmem:[#allocation13 + $0x44] ss:$8 sps:$4 sm:$0xff]  }
 0x3ce   : > { %1408 = vmatprep.subr.bf16.mxu0 %v9522_v59  ;;  %1505 = vmatprep.subr.bf16.mxu1 %v9522_v59 }
 0x3d1   : > { %1409 = vmatpush1.bf16.msra.mxu0 %v8272_v48  ;;  %1506 = vmatpush1.bf16.msra.mxu1 %v8281_v49  ;;  %v8315_v48 = vld [vmem:[#allocation13 + $0xf0] ss:$8 sps:$4 sm:$0xff]   ;;  %v8323_v49 = vld [vmem:[#allocation13 + $0xe4] ss:$8 sps:$4 sm:$0xff]  }
 0x3d2   : > { %1410 = vmatprep.subr.bf16.mxu0 %v9522_v59  ;;  %1507 = vmatprep.subr.bf16.mxu1 %v9522_v59 }
 0x3d5   : > { %1411 = vmatpush1.bf16.msra.mxu0 %v8273_v50  ;;  %1508 = vmatpush1.bf16.msra.mxu1 %v8282_v51  ;;  %v8312_v50 = vld [vmem:[#allocation13 + $0x40] ss:$8 sps:$4 sm:$0xff]   ;;  %v8320_v51 = vld [vmem:[#allocation13 + $0x34] ss:$8 sps:$4 sm:$0xff]  }
 0x3d6   : > { %1412 = vmatprep.subr.bf16.mxu0 %v9522_v59  ;;  %1509 = vmatprep.subr.bf16.mxu1 %v9522_v59 }
 0x3d9   : > { %1413 = vmatpush1.bf16.msra.mxu0 %v8274_v52  ;;  %1510 = vmatpush1.bf16.msra.mxu1 %v8283_v53  ;;  %v8321_v52 = vld [vmem:[#allocation13 + $0xe0] ss:$8 sps:$4 sm:$0xff]   ;;  %v8329_v53 = vld [vmem:[#allocation13 + $0xd4] ss:$8 sps:$4 sm:$0xff]  }
 0x3da   : > { %1414 = vmatprep.subr.bf16.mxu0 %v9522_v59  ;;  %1511 = vmatprep.subr.bf16.mxu1 %v9522_v59 }
 0x3dd   : > { %1415 = vmatpush1.bf16.msra.mxu0 %v8275_v54  ;;  %1512 = vmatpush1.bf16.msra.mxu1 %v8284_v55  ;;  %v8318_v54 = vld [vmem:[#allocation13 + $0x30] ss:$8 sps:$4 sm:$0xff]   ;;  %v8326_v55 = vld [vmem:[#allocation13 + $0x24] ss:$8 sps:$4 sm:$0xff]  }
 0x3de   : > { %1416 = vmatprep.subr.bf16.mxu0 %v9522_v59  ;;  %1513 = vmatprep.subr.bf16.mxu1 %v9522_v59 }
 0x3e1   : > { %1417 = vmatpush1.bf16.msra.mxu0 %v8276_v56  ;;  %1514 = vmatpush1.bf16.msra.mxu1 %v8285_v57  ;;  %v8327_v56 = vld [vmem:[#allocation13 + $0xd0] ss:$8 sps:$4 sm:$0xff]   ;;  %v8324_v57 = vld [vmem:[#allocation13 + $0x20] ss:$8 sps:$4 sm:$0xff]  }
 0x3e2   : > { %1418 = vmatprep.subr.bf16.mxu0 %v9522_v59  ;;  %1515 = vmatprep.subr.bf16.mxu1 %v9522_v59 }
 0x3e5   : > { %1419 = vmatpush1.bf16.msra.mxu0 %v8277_v58  ;;  %1516 = vmatpush1.bf16.msra.mxu1 %v8286_v60  ;;  %v8332_v58 = vld [vmem:[#allocation13 + $0x14] ss:$8 sps:$4 sm:$0xff]   ;;  %v8330_v60 = vld [vmem:[#allocation13 + $0x10] ss:$8 sps:$4 sm:$0xff]  }
 0x3e6   : > { %1434 = vmatprep.subr.bf16.mxu0 %v9522_v59  ;;  %1531 = vmatprep.subr.bf16.mxu1 %v9522_v59 }
 0x3e9   : > { %1435 = vmatpush2.bf16.msra.mxu0 %v8278_v61  ;;  %1532 = vmatpush2.bf16.msra.mxu1 %v8287_v62  ;;  %v8338_v61 = vld [vmem:[#allocation13 + $0x4] ss:$8 sps:$4 sm:$0xff]   ;;  %v8336_v62 = vld [vmem:[#allocation13] ss:$8 sps:$4 sm:$0xff]  }
 0x3ea   : > { %7195 = vmatprep.subr.msk.bf16.mxu0 %vm612_vm1, %v9869_v37  ;;  %1665 = vmatprep.subr.bf16.mxu1 %v9522_v59  ;;  %v8299_v37 = vld [vmem:[#allocation13 + $0x74] ss:$8 sps:$4 sm:$0xff]   ;;  %vm1746_vm1 = vcmask 1040512  }
 0x3eb   : > { %vm1747_vm15 = vmand %vm1746_vm1, %vm1130_vm12  ;;  %vm2347_vm1 = vcmask 1044484  }
 0x488   : > { %v1252_v63 = vpop.f32.mrf.mxu1  ;;  %v1318_v0 = vpop.f32.mrf.mxu0 }
 0x489   : > { %v1259_v1 = vpack.c.bf16 %v1252_v63, %v1252_v63  ;;  %v1325_v6 = vpack.c.bf16 %v1318_v0, %v1318_v0  ;;  %v7207_v0 = vld [vmem:[#allocation19] ss:$0 sm:$0xff] }
 0x48a   : > { %v1254_v2 = vpop.f32.mrf.mxu1  ;;  %v1320_v3 = vpop.f32.mrf.mxu0 }
 0x48b   : > { %v1260_v4 = vpack.c.bf16 %v1254_v2, %v1254_v2  ;;  %v1326_v5 = vpack.c.bf16 %v1320_v3, %v1320_v3  ;;  %v8335_v3 = vld [vmem:[#allocation13 + $0xc4] ss:$8 sps:$4 sm:$0xff]  }
 0x48c   : > { %v1322_v7 = vpop.f32.mrf.mxu0  ;;  %v1256_v8 = vpop.f32.mrf.mxu1 }
 0x48d   : > { %7184 = vmatprep.mubr.msk.bf16.mxu0 %vm1400_vm6, %v1326_v5  ;;  %7194 = vmatprep.mubr.msk.bf16.mxu1 %vm1400_vm6, %v1260_v4  ;;  %v8342_v4 = vld [vmem:[#allocation13 + $0x90] ss:$8 sps:$4 sm:$0xff]  }
 0x48e   : > { %v1323_v10 = vpop.f32.mrf.mxu0  ;;  %1437 = vmatmul.mubr.bf16.vlgmr.msra.gmra.mxu0 %v1325_v6  ;;  %1534 = vmatmul.mubr.bf16.vlgmr.msra.gmra.mxu1 %v1259_v1  ;;  %v1257_v11 = vpop.f32.mrf.mxu1  ;;  %v8344_v1 = vld [vmem:[#allocation13 + $0x94] ss:$8 sps:$4 sm:$0xff]   ;;  %v8333_v6 = vld [vmem:[#allocation13 + $0xc0] ss:$8 sps:$4 sm:$0xff]  }
 0x48f   : > { %1559 = vmatpush1.bf16.msra.mxu0 %v9876_v39  ;;  %1578 = vmatprep.mubr.bf16.mxu0 %v9522_v59  ;;  %v8303_v39 = vld [vmem:[#allocation13 + $0x110] ss:$8 sps:$4 sm:$0xff]   ;;  %v8341_v11 = vld [vmem:[#allocation13 + $0xb4] ss:$8 sps:$4 sm:$0xff]  }
 0x490   : > { %1560 = vmatprep.subr.bf16.mxu0 %v9878_v40  ;;  %1666 = vmatpush1.bf16.msra.mxu1 %v8288_v9  ;;  %v8305_v40 = vld [vmem:[#allocation13 + $0x114] ss:$8 sps:$4 sm:$0xff]   ;;  %v8350_v9 = vld [vmem:[#allocation13 + $0x84] ss:$8 sps:$4 sm:$0xff]  }
 0x491   : > { %1667 = vmatprep.subr.bf16.mxu1 %v9522_v59 }
 0x493   : > { %1561 = vmatpush1.bf16.msra.mxu0 %v9884_v41  ;;  %v8300_v41 = vld [vmem:[#allocation13 + $0x60] ss:$8 sps:$4 sm:$0xff]  }
 0x494   : > { %1668 = vmatpush1.bf16.msra.mxu1 %v8289_v12  ;;  %1924 = vmatprep.subr.bf16.mxu0 %v8305_v40 }
 0x495   : > { %1669 = vmatprep.subr.bf16.mxu1 %v9522_v59 }
 0x496   : > { %7196 = vmatmul.mubr.msk.bf16.vlgmr.msra.gmra.mxu0 %vm1208_vm4, %v1542_v13  ;;  %v8339_v13 = vld [vmem:[#allocation13 + $0xb0] ss:$8 sps:$4 sm:$0xff]   ;;  %vm1750_vm4 = vmor %vm1749_vm14, %vm1747_vm15  ;;  %vm2332_vm15 = vcmask 1043712  }
 0x497   : > { %1925 = vmatpush1.bf16.msra.mxu0 %v8303_v39  ;;  %vm9962_vm14 = vmand %vm2347_vm1, %vm1183_vm2 }
 0x498   : > { %1670 = vmatpush1.bf16.msra.mxu1 %v8290_v14  ;;  %1926 = vmatprep.subr.bf16.mxu0 %v8311_v42  ;;  %vm2349_vm3 = vmor %vm9962_vm14, %vm9957_vm13 }
 0x499   : > { %1671 = vmatprep.subr.bf16.mxu1 %v9522_v59 }
 0x49b   : > { %1927 = vmatpush1.bf16.msra.mxu0 %v8309_v44 }
 0x49c   : > { %1672 = vmatpush1.bf16.msra.mxu1 %v8291_v15  ;;  %1928 = vmatprep.subr.bf16.mxu0 %v8317_v45  ;;  %v8347_v15 = vld [vmem:[#allocation13 + $0xa4] ss:$8 sps:$4 sm:$0xff]  }
 0x49d   : > { %1673 = vmatprep.subr.bf16.mxu1 %v9522_v59 }
 0x49f   : > { %1929 = vmatpush1.bf16.msra.mxu0 %v8315_v48 }
 0x4a0   : > { %1674 = vmatpush1.bf16.msra.mxu1 %v8292_v16  ;;  %1930 = vmatprep.subr.bf16.mxu0 %v8323_v49  ;;  %v8348_v16 = vld [vmem:[#allocation13 + $0x80] ss:$8 sps:$4 sm:$0xff]  }
 0x4a1   : > { %1675 = vmatprep.subr.bf16.mxu1 %v9522_v59 }
 0x4a3   : > { %1931 = vmatpush1.bf16.msra.mxu0 %v8321_v52  ;;  %v8357_v52 = vld [vmem:[#allocation13 + $0x1b0] ss:$8 sps:$4 sm:$0xff]  }
 0x4a4   : > { %1676 = vmatpush1.bf16.msra.mxu1 %v8293_v17  ;;  %1932 = vmatprep.subr.bf16.mxu0 %v8329_v53  ;;  %v8345_v17 = vld [vmem:[#allocation13 + $0xa0] ss:$8 sps:$4 sm:$0xff]  }
 0x4a5   : > { %1677 = vmatprep.subr.bf16.mxu1 %v9522_v59 }
 0x4a7   : > { %1933 = vmatpush1.bf16.msra.mxu0 %v8327_v56  ;;  %v8361_v56 = vld [vmem:[#allocation13 + $0x1a0] ss:$8 sps:$4 sm:$0xff]  }
 0x4a8   : > { %1678 = vmatpush1.bf16.msra.mxu1 %v8294_v18  ;;  %1934 = vmatprep.subr.bf16.mxu0 %v8335_v3  ;;  %v8376_v3 = vld [vmem:[#allocation13 + $0x150] ss:$8 sps:$4 sm:$0xff]  }
 0x4a9   : > { %1679 = vmatprep.subr.bf16.mxu1 %v9522_v59 }
 0x4ab   : > { %1935 = vmatpush1.bf16.msra.mxu0 %v8333_v6  ;;  %v8384_v6 = vld [vmem:[#allocation13 + $0x1d4] ss:$8 sps:$4 sm:$0xff]  }
 0x4ac   : > { %1680 = vmatpush1.bf16.msra.mxu1 %v8295_v19  ;;  %1936 = vmatprep.subr.bf16.mxu0 %v8341_v11  ;;  %v8353_v19 = vld [vmem:[#allocation13 + $0x134] ss:$8 sps:$4 sm:$0xff]  }
 0x4ad   : > { %1695 = vmatprep.subr.bf16.mxu1 %v9522_v59 }
 0x4af   : > { %1937 = vmatpush1.bf16.msra.mxu0 %v8339_v13  ;;  %v8391_v13 = vld [vmem:[#allocation14 + $0x364] ss:$16 sps:$4 sm:$0xff]  }
 0x4b0   : > { %1696 = vmatpush2.bf16.msra.mxu1 %v8296_v20  ;;  %1938 = vmatprep.subr.bf16.mxu0 %v8347_v15  ;;  %v8392_v15 = vld [vmem:[#allocation14 + $0x340] ss:$16 sps:$4 sm:$0xff]  }
 0x4b1   : > { %2071 = vmatprep.subr.bf16.mxu1 %v8299_v37 }
 0x4b3   : > { %1939 = vmatpush1.bf16.msra.mxu0 %v8345_v17  ;;  %v8395_v17 = vld [vmem:[#allocation14 + $0x320] ss:$16 sps:$4 sm:$0xff]  }
 0x4b4   : > { %1952 = vmatprep.subr.bf16.mxu0 %v8353_v19  ;;  %v8398_v19 = vld [vmem:[#allocation14 + $0x300] ss:$16 sps:$4 sm:$0xff]  }
 0x54e   : > { %v1438_v21 = vpop.f32.mrf.mxu0  ;;  %v1535_v22 = vpop.f32.mrf.mxu1 }
 0x54f   : > { %v9926_v23 = vadd.f32 %v1535_v22, %v1438_v21  ;;  %v8351_v22 = vld [vmem:[#allocation13 + $0x130] ss:$8 sps:$4 sm:$0xff]  }
 0x550   : > { %v1440_v24 = vpop.f32.mrf.mxu0  ;;  %v1537_v25 = vpop.f32.mrf.mxu1  ;;  %1953 = vmatpush2.bf16.msra.mxu0 %v8351_v22  ;;  %v8406_v22 = vld [vmem:[#allocation14 + $0x2c4] ss:$16 sps:$4 sm:$0xff]  }
 0x551   : > { %v8356_v25 = vld [vmem:[#allocation13 + $0x124] ss:$8 sps:$4 sm:$0xff]  }
 0x552   : > { %v1441_v26 = vpop.f32.mrf.mxu0  ;;  %v1538_v27 = vpop.f32.mrf.mxu1  ;;  %1954 = vmatprep.subr.bf16.mxu0 %v8356_v25  ;;  %v8407_v25 = vld [vmem:[#allocation14 + $0x2a0] ss:$16 sps:$4 sm:$0xff]  }
 0x553   : > { %v8354_v26 = vld [vmem:[#allocation13 + $0x120] ss:$8 sps:$4 sm:$0xff]   ;;  %v8359_v27 = vld [vmem:[#allocation13 + $0x1b4] ss:$8 sps:$4 sm:$0xff]  }
 0x554   : > { %v1442_v28 = vpop.f32.mrf.mxu0  ;;  %v1539_v29 = vpop.f32.mrf.mxu1  ;;  %1955 = vmatpush2.bf16.msra.mxu0 %v8354_v26  ;;  %v8412_v26 = vld [vmem:[#allocation14 + $0x284] ss:$16 sps:$4 sm:$0xff]  }
 0x555   : > { %2245 = vmatprep.subr.bf16.mxu0 %v8359_v27  ;;  %v8410_v27 = vld [vmem:[#allocation14 + $0x280] ss:$16 sps:$4 sm:$0xff]  }
 0x556   : > { %v1580_v30 = vpop.f32.mrf.mxu0 }
 0x557   : > { %v1587_v33 = vpack.c.bf16 %v1580_v30, %v1580_v30  ;;  %v1751_v30 = vld [vmem:[#allocation3 + $0x8] sm:$0x11] }
 0x558   : > { %v1582_v31 = vpop.f32.mrf.mxu0 }
 0x559   : > { %v1588_v32 = vpack.c.bf16 %v1582_v31, %v1582_v31 }
 0x55a   : > { %v1584_v34 = vpop.f32.mrf.mxu0 }
 0x55b   : > { %7206 = vmatprep.mubr.msk.bf16.mxu1 %vm1400_vm6, %v1588_v32  ;;  %v1743_v32 = vld [vmem:[#allocation3] sm:$0xff] }
 0x55c   : > { %v1585_v35 = vpop.f32.mrf.mxu0  ;;  %1698 = vmatmul.mubr.bf16.vlgmr.msra.gmra.mxu1 %v1587_v33 }
 0x55d   : > { %2072 = vmatpush1.bf16.msra.mxu1 %v8297_v36 }
 0x55e   : > { %2073 = vmatprep.subr.bf16.mxu1 %v8302_v38 }
 0x561   : > { %2074 = vmatpush1.bf16.msra.mxu1 %v8300_v41 }
 0x562   : > { %2075 = vmatprep.subr.bf16.mxu1 %v8308_v43 }
 0x565   : > { %2076 = vmatpush1.bf16.msra.mxu1 %v8306_v46 }
 0x566   : > { %2077 = vmatprep.subr.bf16.mxu1 %v8314_v47 }
 0x569   : > { %2078 = vmatpush1.bf16.msra.mxu1 %v8312_v50 }
 0x56a   : > { %2079 = vmatprep.subr.bf16.mxu1 %v8320_v51 }
 0x56d   : > { %2080 = vmatpush1.bf16.msra.mxu1 %v8318_v54  ;;  %v8363_v54 = vld [vmem:[#allocation13 + $0x1a4] ss:$8 sps:$4 sm:$0xff]  }
 0x56e   : > { %2081 = vmatprep.subr.bf16.mxu1 %v8326_v55 }
 0x571   : > { %2082 = vmatpush1.bf16.msra.mxu1 %v8324_v57  ;;  %v8366_v57 = vld [vmem:[#allocation13 + $0x194] ss:$8 sps:$4 sm:$0xff]  }
 0x572   : > { %2083 = vmatprep.subr.bf16.mxu1 %v8332_v58  ;;  %v8364_v58 = vld [vmem:[#allocation13 + $0x190] ss:$8 sps:$4 sm:$0xff]  }
 0x575   : > { %2084 = vmatpush1.bf16.msra.mxu1 %v8330_v60  ;;  %v8369_v60 = vld [vmem:[#allocation13 + $0x184] ss:$8 sps:$4 sm:$0xff]  }
 0x576   : > { %2085 = vmatprep.subr.bf16.mxu1 %v8338_v61  ;;  %v8367_v61 = vld [vmem:[#allocation13 + $0x180] ss:$8 sps:$4 sm:$0xff]  }
 0x579   : > { %2086 = vmatpush1.bf16.msra.mxu1 %v8336_v62  ;;  %v8372_v62 = vld [vmem:[#allocation13 + $0x174] ss:$8 sps:$4 sm:$0xff]  }
 0x57a   : > { %2099 = vmatprep.subr.bf16.mxu1 %v8344_v1  ;;  %v8373_v1 = vld [vmem:[#allocation13 + $0x160] ss:$8 sps:$4 sm:$0xff]  }
 0x57d   : > { %2100 = vmatpush2.bf16.msra.mxu1 %v8342_v4  ;;  %v8381_v4 = vld [vmem:[#allocation13 + $0x144] ss:$8 sps:$4 sm:$0xff]  }
 0x57e   : > { %2101 = vmatprep.subr.bf16.mxu1 %v8350_v9  ;;  %v8385_v9 = vld [vmem:[#allocation13 + $0x1c0] ss:$8 sps:$4 sm:$0xff]  }
 0x581   : > { %2102 = vmatpush2.bf16.msra.mxu1 %v8348_v16  ;;  %v8397_v16 = vld [vmem:[#allocation14 + $0x324] ss:$16 sps:$4 sm:$0xff]  }
 0x582   : > { %2963 = vmatprep.subr.bf16.mxu1 %v8391_v13  ;;  %v8445_v13 = vld [vmem:[#allocation14 + $0x484] ss:$16 sps:$4 sm:$0xff]  }
 0x61c   : > { %v1699_v63 = vpop.f32.mrf.mxu1 }
 0x61d   : > { %v1705_v2 = vadd.f32 %v1699_v63, %v9926_v23  ;;  %v8370_v63 = vld [vmem:[#allocation13 + $0x170] ss:$8 sps:$4 sm:$0xff]  }
 0x61e   : > { %v1701_v5 = vpop.f32.mrf.mxu1 }
 0x61f   : > { %v1713_v7 = vadd.f32 %v7207_v0, %v1705_v2  ;;  %v8375_v0 = vld [vmem:[#allocation13 + $0x164] ss:$8 sps:$4 sm:$0xff]   ;;  %v8378_v2 = vld [vmem:[#allocation13 + $0x154] ss:$8 sps:$4 sm:$0xff]   ;;  %v8379_v5 = vld [vmem:[#allocation13 + $0x140] ss:$8 sps:$4 sm:$0xff]  }
 0x620   : > { %v1702_v8 = vpop.f32.mrf.mxu1 }
 0x621   : > { %v1714_v10 = vmax.f32 %v1713_v7, 0.0  ;;  %v8382_v7 = vld [vmem:[#allocation13 + $0x1d0] ss:$8 sps:$4 sm:$0xff]   ;;  %v8387_v8 = vld [vmem:[#allocation13 + $0x1c4] ss:$8 sps:$4 sm:$0xff]  }
 0x622   : > { %v1703_v12 = vpop.f32.mrf.mxu1 }
 0x623   : > { %v7840_v14 = vpack.c.bf16 %v1714_v10, %v1714_v10  ;;  %v8389_v12 = vld [vmem:[#allocation14 + $0x360] ss:$16 sps:$4 sm:$0xff]  }
 0x625   : > { %v1720_v18 = vshrl.u32 %v7840_v14, 16  ;;  %v1723_v20 = vshll.u32 %v7840_v14, 16  ;;  %v8394_v14 = vld [vmem:[#allocation14 + $0x344] ss:$16 sps:$4 sm:$0xff]  }
 0x627   : > { %v1722_v21 = vrot.slane %v1720_v18, 7  ;;  %v8400_v18 = vld [vmem:[#allocation14 + $0x304] ss:$16 sps:$4 sm:$0xff]  }
 0x629   : > { %v1726_v23 = vrot.slane %v1722_v21, 4  ;;  %v1725_v24 = vor.u32 %v1723_v20, %v1722_v21  ;;  %v8403_v20 = vld [vmem:[#allocation14 + $0x2e4] ss:$16 sps:$4 sm:$0xff]   ;;  %v8401_v21 = vld [vmem:[#allocation14 + $0x2e0] ss:$16 sps:$4 sm:$0xff]  }
 0x62b   : > { %1729 = vrot.lane.b32.xlu0 %v1726_v23, %s9524_s19  ;;  %1727 = vrot.lane.b32.xlu1 %v1725_v24, %s9524_s19  ;;  %v8404_v23 = vld [vmem:[#allocation14 + $0x2c0] ss:$16 sps:$4 sm:$0xff]   ;;  %v8409_v24 = vld [vmem:[#allocation14 + $0x2a4] ss:$16 sps:$4 sm:$0xff]  }
 0x69d   : > { %v1730_v28 = vpop.permute.xlu0 %1729  ;;  %v1728_v29 = vpop.permute.xlu1 %1727 }
 0x69e   : > { %v1732_v31 = vrot.slane %v1730_v28, 4  ;;  %v1731_v33 = vrot.slane %v1728_v29, 4 }
 0x6a0   : > { %v1735_v34 = vsel %vm1400_vm6, %v1732_v31, %v1730_v28  ;;  %v1734_v35 = vsel %vm1400_vm6, %v1731_v33, %v1728_v29  ;;  %v8415_v28 = vld [vmem:[#allocation14 + $0x464] ss:$16 sps:$4 sm:$0xff]   ;;  %v8413_v29 = vld [vmem:[#allocation14 + $0x460] ss:$16 sps:$4 sm:$0xff]   ;;  %vm623_vm6 = vcmask 519168  }
 0x6a1   : > { %v1752_v36 = vsel %vm1750_vm4, %v1735_v34, %v1751_v30  ;;  %v1744_v37 = vsel %vm1742_vm7, %v1734_v35, %v1743_v32  ;;  %v8418_v30 = vld [vmem:[#allocation14 + $0x444] ss:$16 sps:$4 sm:$0xff]   ;;  %v8416_v31 = vld [vmem:[#allocation14 + $0x440] ss:$16 sps:$4 sm:$0xff]   ;;  %624 = vst.msk [vmem:[#allocation4 + $0x8] sm:$0xf] %vm623_vm6, %v9522_v59  ;;  %vm9971_vm7 = vmand %vm2332_vm15, %vm1167_vm9 }
 0x6a2   : > { %1753 = vst [vmem:[#allocation3 + $0x8] sm:$0x11] %v1752_v36  ;;  %1745 = vst [vmem:[#allocation3] sm:$0xff] %v1744_v37  ;;  %v7233_v38 = vcombine.high %v1744_v37, %v1744_v37  ;;  %v7232_v39 = vcombine.low %v1744_v37, %v1744_v37  ;;  %v8421_v32 = vld [vmem:[#allocation14 + $0x424] ss:$16 sps:$4 sm:$0xff]   ;;  %vm2353_vm4 = vcmask 253952  }
 0x6a3   : > { %v8419_v33 = vld [vmem:[#allocation14 + $0x420] ss:$16 sps:$4 sm:$0xff]   ;;  %vm9976_vm6 = vmand %vm2334_vm0, %vm1170_vm11 }
 0x6a4   : > { %7254 = vmatprep.mubr.msk.bf16.mxu1 %vm1920_vm5, %v7233_v38  ;;  %vm2354_vm2 = vmand %vm2353_vm4, %vm1130_vm12  ;;  %vm2959_vm12 = vcmask 523264  }
 0x6a5   : > { %2104 = vmatmul.mubr.bf16.vlgmr.msra.gmra.mxu1 %v7232_v39  ;;  %vm2336_vm1 = vmor %vm9976_vm6, %vm9971_vm7 }
 0x6a6   : > { %2964 = vmatpush1.bf16.msra.mxu1 %v8389_v12  ;;  %v8437_v12 = vld [vmem:[#allocation14 + $0x4a0] ss:$16 sps:$4 sm:$0xff]  }
 0x6a7   : > { %2965 = vmatprep.subr.bf16.mxu1 %v8394_v14 }
 0x6a9   : > { %v1775_v40 = vld [vmem:[#allocation3 + $0x8] sm:$0x11]  ;;  %v2112_v43 = vld [vmem:[#allocation3] sm:$0xee] }
 0x6aa   : > { %v7210_v41 = vcombine.high %v1744_v37, %v1775_v40  ;;  %v7209_v42 = vcombine.low %v1744_v37, %v1775_v40  ;;  %v7256_v46 = vcombine.high %v2112_v43, %v1775_v40  ;;  %v7255_v10 = vcombine.low %v2112_v43, %v1775_v40  ;;  %2966 = vmatpush1.bf16.msra.mxu1 %v8392_v15 }
 0x6ab   : > { %2967 = vmatprep.subr.bf16.mxu1 %v8397_v16  ;;  %v8440_v16 = vld [vmem:[#allocation14 + $0x3a0] ss:$16 sps:$4 sm:$0xff]  }
 0x6ac   : > { %v1815_v44 = vshll.u32 %v7210_v41, 16  ;;  %v1808_v45 = vshll.u32 %v7209_v42, 16  ;;  %v1813_v47 = vshrl.u32 %v7210_v41, 16  ;;  %v1806_v49 = vshrl.u32 %v7209_v42, 16 }
 0x6ad   : > { %v2140_v55 = vrot.slane %v7256_v46, 1  ;;  %v2139_v11 = vrot.slane %v7255_v10, 1  ;;  %v2290_v42 = vlaneseq  ;;  %v8442_v10 = vld [vmem:[#allocation14 + $0x3a4] ss:$16 sps:$4 sm:$0xff]  }
 0x6ae   : > { %v1817_v48 = vrot.slane %v1815_v44, 1  ;;  %v1810_v50 = vrot.slane %v1808_v45, 1  ;;  %2968 = vmatpush1.bf16.msra.mxu1 %v8395_v17  ;;  %v2288_v45 = vld [vmem:[#allocation20] sm:$0x3] }
 0x6af   : > { %2969 = vmatprep.subr.bf16.mxu1 %v8400_v18  ;;  %v9945_v43 = vshrl.u32 %v2290_v42, 7 }
 0x6b0   : > { %v1818_v51 = vor.u32 %v1817_v48, %v1813_v47  ;;  %v1811_v53 = vor.u32 %v1810_v50, %v1806_v49 }
 0x6b1   : > { %v9948_v44 = vsub.s32 0, %v9945_v43  ;;  %v9951_v46 = vsub.s32 1, %v9945_v43 }
 0x6b2   : > { %7231 = vmatprep.mubr.msk.bf16.mxu0 %vm1920_vm5, %v1818_v51  ;;  %2970 = vmatpush1.bf16.msra.mxu1 %v8398_v19  ;;  %v8443_v19 = vld [vmem:[#allocation14 + $0x480] ss:$16 sps:$4 sm:$0xff]  }
 0x6b3   : > { %1957 = vmatmul.mubr.bf16.vlgmr.msra.gmra.mxu0 %v1811_v53  ;;  %2971 = vmatprep.subr.bf16.mxu1 %v8403_v20  ;;  %v2293_v48 = vrot.slane %v2288_v45, %v9948_v44  ;;  %v8448_v20 = vld [vmem:[#allocation14 + $0x384] ss:$16 sps:$4 sm:$0xff]  }
 0x6b4   : > { %2246 = vmatpush1.bf16.msra.mxu0 %v8357_v52  ;;  %7277 = vmatprep.mubr.msk.bf16.mxu0 %vm1920_vm5, %v2140_v55  ;;  %v2297_v52 = vrot.slane %v2288_v45, %v9951_v46 }
 0x6b5   : > { %2247 = vmatprep.subr.bf16.mxu0 %v8363_v54  ;;  %v8424_v54 = vld [vmem:[#allocation14 + $0x404] ss:$16 sps:$4 sm:$0xff]  }
 0x6b6   : > { %2972 = vmatpush1.bf16.msra.mxu1 %v8401_v21  ;;  %v8451_v21 = vld [vmem:[#allocation14 + $0x36c] ss:$16 sps:$4 sm:$0xff]  }
 0x6b7   : > { %2973 = vmatprep.subr.bf16.mxu1 %v8406_v22  ;;  %v8446_v22 = vld [vmem:[#allocation14 + $0x380] ss:$16 sps:$4 sm:$0xff]  }
 0x6b8   : > { %2248 = vmatpush1.bf16.msra.mxu0 %v8361_v56 }
 0x6b9   : > { %2249 = vmatprep.subr.bf16.mxu0 %v8366_v57  ;;  %v8422_v57 = vld [vmem:[#allocation14 + $0x400] ss:$16 sps:$4 sm:$0xff]  }
 0x6ba   : > { %2974 = vmatpush1.bf16.msra.mxu1 %v8404_v23  ;;  %v8455_v23 = vld [vmem:[#allocation14 + $0x4ec] ss:$16 sps:$4 sm:$0xff]  }
 0x6bb   : > { %2975 = vmatprep.subr.bf16.mxu1 %v8409_v24  ;;  %v8486_v24 = vld [vmem:[#allocation14 + $0x2a8] ss:$16 sps:$4 sm:$0xff]  }
 0x6bc   : > { %2250 = vmatpush1.bf16.msra.mxu0 %v8364_v58 }
 0x6bd   : > { %2251 = vmatprep.subr.bf16.mxu0 %v8369_v60  ;;  %v8427_v60 = vld [vmem:[#allocation14 + $0x4e4] ss:$16 sps:$4 sm:$0xff]  }
 0x6be   : > { %2976 = vmatpush1.bf16.msra.mxu1 %v8407_v25  ;;  %v8494_v25 = vld [vmem:[#allocation14 + $0x28c] ss:$16 sps:$4 sm:$0xff]  }
 0x6bf   : > { %2977 = vmatprep.subr.bf16.mxu1 %v8412_v26  ;;  %v8489_v26 = vld [vmem:[#allocation14 + $0xa0] ss:$16 sps:$4 sm:$0xff]  }
 0x6c0   : > { %2252 = vmatpush1.bf16.msra.mxu0 %v8367_v61 }
 0x6c1   : > { %2253 = vmatprep.subr.bf16.mxu0 %v8372_v62  ;;  %v8425_v62 = vld [vmem:[#allocation14 + $0x4e0] ss:$16 sps:$4 sm:$0xff]  }
 0x6c2   : > { %2978 = vmatpush1.bf16.msra.mxu1 %v8410_v27  ;;  %v8497_v27 = vld [vmem:[#allocation14 + $0x84] ss:$16 sps:$4 sm:$0xff]  }
 0x6c3   : > { %2979 = vmatprep.subr.bf16.mxu1 %v8415_v28  ;;  %v2355_v28 = vld [vmem:[#allocation4 + $0x14] sm:$0x1] }
 0x6c4   : > { %2254 = vmatpush1.bf16.msra.mxu0 %v8370_v63 }
 0x6c5   : > { %2255 = vmatprep.subr.bf16.mxu0 %v8375_v0  ;;  %v8430_v0 = vld [vmem:[#allocation14 + $0x3e4] ss:$16 sps:$4 sm:$0xff]  }
 0x6c6   : > { %2980 = vmatpush2.bf16.msra.mxu1 %v8413_v29 }
 0x6c7   : > { %2981 = vmatprep.subr.bf16.mxu1 %v8418_v30  ;;  %v2342_v30 = vld [vmem:[#allocation4 + $0x8] sm:$0xf] }
 0x6c8   : > { %2256 = vmatpush1.bf16.msra.mxu0 %v8373_v1 }
 0x6c9   : > { %2257 = vmatprep.subr.bf16.mxu0 %v8378_v2 }
 0x6ca   : > { %2982 = vmatpush2.bf16.msra.mxu1 %v8416_v31 }
 0x6cb   : > { %2983 = vmatprep.subr.bf16.mxu1 %v8421_v32  ;;  %v2350_v32 = vld [vmem:[#allocation4 + $0xc] sm:$0x11] }
 0x6cc   : > { %2258 = vmatpush1.bf16.msra.mxu0 %v8376_v3  ;;  %v8428_v3 = vld [vmem:[#allocation14 + $0x3e0] ss:$16 sps:$4 sm:$0xff]  }
 0x6cd   : > { %2259 = vmatprep.subr.bf16.mxu0 %v8381_v4  ;;  %v8431_v4 = vld [vmem:[#allocation14 + $0x4c0] ss:$16 sps:$4 sm:$0xff]  }
 0x6ce   : > { %2984 = vmatpush2.bf16.msra.mxu1 %v8419_v33 }
 0x6cf   : > { %2985 = vmatprep.subr.bf16.mxu1 %v8424_v54 }
 0x6d0   : > { %2260 = vmatpush1.bf16.msra.mxu0 %v8379_v5  ;;  %v8433_v5 = vld [vmem:[#allocation14 + $0x4c4] ss:$16 sps:$4 sm:$0xff]  }
 0x6d1   : > { %2273 = vmatprep.subr.bf16.mxu0 %v8384_v6 }
 0x6d2   : > { %2986 = vmatpush2.bf16.msra.mxu1 %v8422_v57 }
 0x6d3   : > { %2987 = vmatprep.subr.bf16.mxu1 %v8430_v0 }
 0x6d4   : > { %2274 = vmatpush2.bf16.msra.mxu0 %v8382_v7  ;;  %v8434_v7 = vld [vmem:[#allocation14 + $0x3c0] ss:$16 sps:$4 sm:$0xff]  }
 0x6d5   : > { %2275 = vmatprep.subr.bf16.mxu0 %v8387_v8  ;;  %v8436_v8 = vld [vmem:[#allocation14 + $0x3c4] ss:$16 sps:$4 sm:$0xff]  }
 0x6d6   : > { %2988 = vmatpush2.bf16.msra.mxu1 %v8428_v3  ;;  %v8456_v3 = vld [vmem:[#allocation14 + $0x348] ss:$16 sps:$4 sm:$0xff]  }
 0x6d7   : > { %2989 = vmatprep.subr.bf16.mxu1 %v8436_v8  ;;  %v8470_v8 = vld [vmem:[#allocation14 + $0x30c] ss:$16 sps:$4 sm:$0xff]  }
 0x6d8   : > { %2276 = vmatpush2.bf16.msra.mxu0 %v8385_v9  ;;  %v8439_v9 = vld [vmem:[#allocation14 + $0x4a4] ss:$16 sps:$4 sm:$0xff]  }
 0x6d9   : > { %3012 = vmatprep.subr.bf16.mxu0 %v8427_v60 }
 0x6da   : > { %2990 = vmatpush2.bf16.msra.mxu1 %v8434_v7  ;;  %v8462_v7 = vld [vmem:[#allocation14 + $0x328] ss:$16 sps:$4 sm:$0xff]  }
 0x6db   : > { %2278 = vmatmul.mubr.bf16.vlgmr.msra.gmra.mxu0 %v2139_v11  ;;  %2991 = vmatprep.subr.bf16.mxu1 %v8442_v10  ;;  %v8473_v10 = vld [vmem:[#allocation14 + $0x48c] ss:$16 sps:$4 sm:$0xff]  }
 0x6dc   : > { %3036 = vmatprep.mubr.bf16.mxu0 %v9522_v59  ;;  %3013 = vmatpush1.bf16.msra.mxu0 %v8425_v62 }
 0x6dd   : > { %3014 = vmatprep.subr.bf16.mxu0 %v8433_v5  ;;  %v8459_v5 = vld [vmem:[#allocation14 + $0x4c8] ss:$16 sps:$4 sm:$0xff]  }
 0x6de   : > { %2992 = vmatpush2.bf16.msra.mxu1 %v8440_v16  ;;  %v8482_v16 = vld [vmem:[#allocation14 + $0x2cc] ss:$16 sps:$4 sm:$0xff]  }
 0x6df   : > { %2993 = vmatprep.subr.bf16.mxu1 %v8448_v20  ;;  %v8480_v20 = vld [vmem:[#allocation14 + $0x2c8] ss:$16 sps:$4 sm:$0xff]  }
 0x6e0   : > { %3015 = vmatpush1.bf16.msra.mxu0 %v8431_v4  ;;  %v8464_v4 = vld [vmem:[#allocation14 + $0x32c] ss:$16 sps:$4 sm:$0xff]  }
 0x6e1   : > { %3016 = vmatprep.subr.bf16.mxu0 %v8439_v9  ;;  %v8465_v9 = vld [vmem:[#allocation14 + $0x4a8] ss:$16 sps:$4 sm:$0xff]  }
 0x6e2   : > { %2994 = vmatpush2.bf16.msra.mxu1 %v8446_v22  ;;  %v8483_v22 = vld [vmem:[#allocation14 + $0xc0] ss:$16 sps:$4 sm:$0xff]  }
 0x6e3   : > { %3094 = vmatprep.subr.bf16.mxu1 %v8455_v23  ;;  %v8491_v23 = vld [vmem:[#allocation14 + $0xa4] ss:$16 sps:$4 sm:$0xff]  }
 0x6e4   : > { %3017 = vmatpush1.bf16.msra.mxu0 %v8437_v12  ;;  %v8476_v12 = vld [vmem:[#allocation14 + $0x2ec] ss:$16 sps:$4 sm:$0xff]  }
 0x6e5   : > { %3018 = vmatprep.subr.bf16.mxu0 %v8445_v13  ;;  %v8471_v13 = vld [vmem:[#allocation14 + $0x488] ss:$16 sps:$4 sm:$0xff]  }
 0x6e8   : > { %3019 = vmatpush1.bf16.msra.mxu0 %v8443_v19 }
 0x6e9   : > { %3045 = vmatprep.subr.bf16.mxu0 %v8451_v21  ;;  %v8488_v21 = vld [vmem:[#allocation14 + $0x2ac] ss:$16 sps:$4 sm:$0xff]  }
 0x765   : > { %v2105_v34 = vpop.f32.mrf.mxu1 }
 0x767   : > { %v2107_v35 = vpop.f32.mrf.mxu1 }
 0x769   : > { %v2109_v36 = vpop.f32.mrf.mxu1 }
 0x76b   : > { %v2110_v37 = vpop.f32.mrf.mxu1 }
 0x773   : > { %v1958_v38 = vpop.f32.mrf.mxu0 }
 0x774   : > { %v2106_v47 = vadd.f32 %v2105_v34, %v1958_v38 }
 0x775   : > { %v1960_v39 = vpop.f32.mrf.mxu0 }
 0x776   : > { %v2108_v50 = vadd.f32 %v2107_v35, %v1960_v39 }
 0x777   : > { %v1962_v40 = vpop.f32.mrf.mxu0 }
 0x779   : > { %v1963_v41 = vpop.f32.mrf.mxu0 }
 0x79b   : > { %v2279_v49 = vpop.f32.mrf.mxu0 }
 0x79c   : > { %v2286_v51 = vadd.f32 %v2279_v49, %v2106_v47 }
 0x79d   : > { %v2281_v53 = vpop.f32.mrf.mxu0 }
 0x79e   : > { %v2300_v55 = vadd.f32 %v2293_v48, %v2286_v51  ;;  %v2287_v56 = vadd.f32 %v2281_v53, %v2108_v50 }
 0x79f   : > { %v2283_v58 = vpop.f32.mrf.mxu0 }
 0x7a0   : > { %v2301_v61 = vadd.f32 %v2297_v52, %v2287_v56  ;;  %v2302_v1 = vmax.f32 %v2300_v55, 0.0  ;;  %v8449_v55 = vld [vmem:[#allocation14 + $0x368] ss:$16 sps:$4 sm:$0xff]  }
 0x7a1   : > { %v2284_v63 = vpop.f32.mrf.mxu0 }
 0x7a2   : > { %v2303_v2 = vmax.f32 %v2301_v61, 0.0  ;;  %v8453_v63 = vld [vmem:[#allocation14 + $0x4e8] ss:$16 sps:$4 sm:$0xff]  }
 0x7a4   : > { %v7841_v6 = vpack.c.bf16 %v2303_v2, %v2302_v1  ;;  %v8458_v1 = vld [vmem:[#allocation14 + $0x34c] ss:$16 sps:$4 sm:$0xff]  }
 0x7a5   : > { %v8461_v2 = vld [vmem:[#allocation14 + $0x4cc] ss:$16 sps:$4 sm:$0xff]  }
 0x7a6   : > { %v2312_v11 = vshrl.u32 %v7841_v6, 16  ;;  %v2315_v15 = vshll.u32 %v7841_v6, 16  ;;  %v8467_v6 = vld [vmem:[#allocation14 + $0x4ac] ss:$16 sps:$4 sm:$0xff]  }
 0x7a8   : > { %v2314_v14 = vrot.slane %v2312_v11, 7  ;;  %v8468_v11 = vld [vmem:[#allocation14 + $0x308] ss:$16 sps:$4 sm:$0xff]  }
 0x7aa   : > { %v2318_v17 = vrot.slane %v2314_v14, 4  ;;  %v2317_v18 = vor.u32 %v2315_v15, %v2314_v14  ;;  %v8479_v14 = vld [vmem:[#allocation14 + $0xe4] ss:$16 sps:$4 sm:$0xff]   ;;  %v8474_v15 = vld [vmem:[#allocation14 + $0x2e8] ss:$16 sps:$4 sm:$0xff]  }
 0x7ac   : > { %2321 = vrot.lane.b32.xlu0 %v2318_v17, %s9525_s20  ;;  %2319 = vrot.lane.b32.xlu1 %v2317_v18, %s9525_s20  ;;  %v8477_v17 = vld [vmem:[#allocation14 + $0xe0] ss:$16 sps:$4 sm:$0xff]   ;;  %v8485_v18 = vld [vmem:[#allocation14 + $0xc4] ss:$16 sps:$4 sm:$0xff]  }
 0x81e   : > { %v2322_v29 = vpop.permute.xlu0 %2321  ;;  %v2320_v31 = vpop.permute.xlu1 %2319 }
 0x81f   : > { %v2324_v33 = vrot.slane %v2322_v29, 4  ;;  %v2323_v34 = vrot.slane %v2320_v31, 4 }
 0x821   : > { %v2327_v35 = vsel %vm1920_vm5, %v2324_v33, %v2322_v29  ;;  %v2356_v36 = vsel %vm2354_vm2, %v2324_v33, %v2355_v28  ;;  %v2326_v37 = vsel %vm1920_vm5, %v2323_v34, %v2320_v31  ;;  %v2343_v38 = vsel %vm2341_vm10, %v2323_v34, %v2342_v30  ;;  %v8492_v28 = vld [vmem:[#allocation14 + $0x288] ss:$16 sps:$4 sm:$0xff]   ;;  %v8500_v29 = vld [vmem:[#allocation14 + $0x46c] ss:$16 sps:$4 sm:$0xff]   ;;  %v8495_v30 = vld [vmem:[#allocation14 + $0x80] ss:$16 sps:$4 sm:$0xff]  }
 0x822   : > { %v2351_v39 = vsel %vm2349_vm3, %v2327_v35, %v2350_v32  ;;  %2357 = vst [vmem:[#allocation4 + $0x14] sm:$0x1] %v2356_v36  ;;  %v9993_v40 = vsel %vm2336_vm1, %v2326_v37, 0  ;;  %2344 = vst [vmem:[#allocation4 + $0x8] sm:$0xf] %v2343_v38 }
 0x823   : > { %2352 = vst [vmem:[#allocation4 + $0xc] sm:$0x11] %v2351_v39  ;;  %2339 = vst [vmem:[#allocation4] sm:$0xff] %v9993_v40  ;;  %v10015_v19 = vcombine.high %v9993_v40, %v9993_v40  ;;  %v8503_v31 = vld [vmem:[#allocation14 + $0x64] ss:$16 sps:$4 sm:$0xff]  }
 0x824   : > { %v8498_v32 = vld [vmem:[#allocation14 + $0x468] ss:$16 sps:$4 sm:$0xff]   ;;  %v8506_v33 = vld [vmem:[#allocation14 + $0x44c] ss:$16 sps:$4 sm:$0xff]   ;;  %v8501_v34 = vld [vmem:[#allocation14 + $0x60] ss:$16 sps:$4 sm:$0xff]  }
 0x825   : > { %v8509_v35 = vld [vmem:[#allocation14 + $0x44] ss:$16 sps:$4 sm:$0xff]   ;;  %v8504_v36 = vld [vmem:[#allocation14 + $0x448] ss:$16 sps:$4 sm:$0xff]   ;;  %v8512_v37 = vld [vmem:[#allocation14 + $0x42c] ss:$16 sps:$4 sm:$0xff]  }
 0x826   : > { %v8507_v38 = vld [vmem:[#allocation14 + $0x40] ss:$16 sps:$4 sm:$0xff]   ;;  %v8515_v39 = vld [vmem:[#allocation14 + $0x24] ss:$16 sps:$4 sm:$0xff]  }
 0x829   : > { %v9996_v41 = vld [vmem:[#allocation4 + $0x8] sm:$0xf]  ;;  %v9998_v42 = vld [vmem:[#allocation4 + $0x14] sm:$0x1] }
 0x82a   : > { %v7281_v45 = vcombine.low %v9996_v41, %v9998_v42  ;;  %v10002_v47 = vld [vmem:[#allocation4 + $0xc] sm:$0x11] }
 0x82b   : > { %v7280_v48 = vcombine.high %v9993_v40, %v10002_v47  ;;  %v7279_v49 = vcombine.low %v9993_v40, %v10002_v47 }
 0x82c   : > { %v2553_v50 = vshll.u32 %v7281_v45, 16  ;;  %v2551_v53 = vshrl.u32 %v7281_v45, 16  ;;  %v8510_v45 = vld [vmem:[#allocation14 + $0x428] ss:$16 sps:$4 sm:$0xff]  }
 0x82d   : > { %v2546_v51 = vshll.u32 %v7280_v48, 16  ;;  %v2539_v52 = vshll.u32 %v7279_v49, 16  ;;  %v2544_v56 = vshrl.u32 %v7280_v48, 16  ;;  %v2537_v58 = vshrl.u32 %v7279_v49, 16  ;;  %v8518_v48 = vld [vmem:[#allocation14 + $0x40c] ss:$16 sps:$4 sm:$0xff]  }
 0x82e   : > { %v2555_v54 = vrot.slane %v2553_v50, 1  ;;  %v8513_v49 = vld [vmem:[#allocation14 + $0x20] ss:$16 sps:$4 sm:$0xff]   ;;  %v8521_v50 = vld [vmem:[#allocation14 + $0x4] ss:$16 sps:$4 sm:$0xff]  }
 0x82f   : > { %v2548_v57 = vrot.slane %v2546_v51, 1  ;;  %v2541_v60 = vrot.slane %v2539_v52, 1  ;;  %v8516_v51 = vld [vmem:[#allocation14 + $0x408] ss:$16 sps:$4 sm:$0xff]   ;;  %v8524_v52 = vld [vmem:[#allocation14 + $0x3ec] ss:$16 sps:$4 sm:$0xff]  }
 0x830   : > { %v2556_v61 = vor.u32 %v2555_v54, %v2551_v53  ;;  %v8519_v53 = vld [vmem:[#allocation14] ss:$16 sps:$4 sm:$0xff]   ;;  %v8527_v54 = vld [vmem:[#allocation14 + $0x1e4] ss:$16 sps:$4 sm:$0xff]  }
 0x831   : > { %v2549_v62 = vor.u32 %v2548_v57, %v2544_v56  ;;  %v10008_v0 = vor.u32 %v2541_v60, %v2537_v58  ;;  %v8530_v56 = vld [vmem:[#allocation14 + $0x3cc] ss:$16 sps:$4 sm:$0xff]   ;;  %v8525_v57 = vld [vmem:[#allocation14 + $0x1e0] ss:$16 sps:$4 sm:$0xff]   ;;  %v8533_v58 = vld [vmem:[#allocation14 + $0x1c4] ss:$16 sps:$4 sm:$0xff]  }
 0x832   : > { %7362 = vmatmul.mubr.msk.bf16.vlgmr.msra.gmra.mxu0 %vm2959_vm12, %v2556_v61  ;;  %v8528_v60 = vld [vmem:[#allocation14 + $0x3c8] ss:$16 sps:$4 sm:$0xff]  }
 0x833   : > { %3046 = vmatpush1.bf16.msra.mxu0 %v8449_v55  ;;  %2995 = vmatprep.mubr.bf16.mxu1 %v2549_v62  ;;  %v8522_v55 = vld [vmem:[#allocation14 + $0x3e8] ss:$16 sps:$4 sm:$0xff]  }
 0x834   : > { %3077 = vmatprep.mubr.bf16.mxu0 %v2549_v62  ;;  %2996 = vmatmul.mubr.bf16.vlgmr.msra.gmra.mxu1 %v10008_v0  ;;  %v8531_v62 = vld [vmem:[#allocation14 + $0x1c0] ss:$16 sps:$4 sm:$0xff]  }
 0x835   : > { %3095 = vmatpush1.bf16.msra.mxu1 %v8453_v63  ;;  %3047 = vmatprep.subr.bf16.mxu0 %v8458_v1  ;;  %v8539_v63 = vld [vmem:[#allocation14 + $0x1a4] ss:$16 sps:$4 sm:$0xff]   ;;  %v8534_v1 = vld [vmem:[#allocation14 + $0x3a8] ss:$16 sps:$4 sm:$0xff]  }
 0x836   : > { %3096 = vmatprep.subr.bf16.mxu1 %v8461_v2  ;;  %3118 = vmatprep.mubr.bf16.mxu1 %v9522_v59  ;;  %v8542_v2 = vld [vmem:[#allocation14 + $0x38c] ss:$16 sps:$4 sm:$0xff]  }
 0x837   : > { %3048 = vmatpush1.bf16.msra.mxu0 %v8456_v3  ;;  %v8537_v3 = vld [vmem:[#allocation14 + $0x1a0] ss:$16 sps:$4 sm:$0xff]  }
 0x838   : > { %3049 = vmatprep.subr.bf16.mxu0 %v8464_v4  ;;  %v8545_v4 = vld [vmem:[#allocation14 + $0x184] ss:$16 sps:$4 sm:$0xff]  }
 0x839   : > { %3097 = vmatpush1.bf16.msra.mxu1 %v8459_v5  ;;  %v8540_v5 = vld [vmem:[#allocation14 + $0x388] ss:$16 sps:$4 sm:$0xff]  }
 0x83a   : > { %3098 = vmatprep.subr.bf16.mxu1 %v8467_v6  ;;  %v8548_v6 = vld [vmem:[#allocation14 + $0x264] ss:$16 sps:$4 sm:$0xff]  }
 0x83b   : > { %3050 = vmatpush1.bf16.msra.mxu0 %v8462_v7  ;;  %v8543_v7 = vld [vmem:[#allocation14 + $0x180] ss:$16 sps:$4 sm:$0xff]  }
 0x83c   : > { %3051 = vmatprep.subr.bf16.mxu0 %v8470_v8  ;;  %v8551_v8 = vld [vmem:[#allocation14 + $0x164] ss:$16 sps:$4 sm:$0xff]  }
 0x83d   : > { %3099 = vmatpush1.bf16.msra.mxu1 %v8465_v9  ;;  %v8546_v9 = vld [vmem:[#allocation14 + $0x260] ss:$16 sps:$4 sm:$0xff]  }
 0x83e   : > { %3100 = vmatprep.subr.bf16.mxu1 %v8473_v10  ;;  %v8554_v10 = vld [vmem:[#allocation14 + $0x244] ss:$16 sps:$4 sm:$0xff]  }
 0x83f   : > { %3052 = vmatpush1.bf16.msra.mxu0 %v8468_v11  ;;  %v8549_v11 = vld [vmem:[#allocation14 + $0x160] ss:$16 sps:$4 sm:$0xff]  }
 0x840   : > { %3053 = vmatprep.subr.bf16.mxu0 %v8476_v12  ;;  %v8557_v12 = vld [vmem:[#allocation14 + $0x144] ss:$16 sps:$4 sm:$0xff]  }
 0x841   : > { %3101 = vmatpush1.bf16.msra.mxu1 %v8471_v13  ;;  %v8552_v13 = vld [vmem:[#allocation14 + $0x240] ss:$16 sps:$4 sm:$0xff]  }
 0x842   : > { %3535 = vmatprep.subr.bf16.mxu1 %v8479_v14  ;;  %v8560_v14 = vld [vmem:[#allocation14 + $0x224] ss:$16 sps:$4 sm:$0xff]  }
 0x843   : > { %3054 = vmatpush1.bf16.msra.mxu0 %v8474_v15  ;;  %v8555_v15 = vld [vmem:[#allocation14 + $0x140] ss:$16 sps:$4 sm:$0xff]  }
 0x844   : > { %7363 = vmatmul.mubr.msk.bf16.vlgmr.msra.gmra.mxu1 %vm2959_vm12, %v2556_v61  ;;  %3055 = vmatprep.subr.bf16.mxu0 %v8482_v16  ;;  %v8536_v61 = vld [vmem:[#allocation14 + $0x3ac] ss:$16 sps:$4 sm:$0xff]   ;;  %v8563_v16 = vld [vmem:[#allocation14 + $0x124] ss:$16 sps:$4 sm:$0xff]  }
 0x845   : > { %3536 = vmatpush1.bf16.msra.mxu1 %v8477_v17  ;;  %3567 = vmatprep.mubr.bf16.mxu1 %v10015_v19  ;;  %v8558_v17 = vld [vmem:[#allocation14 + $0x220] ss:$16 sps:$4 sm:$0xff]  }
 0x846   : > { %3537 = vmatprep.subr.bf16.mxu1 %v8485_v18  ;;  %v8566_v18 = vld [vmem:[#allocation14 + $0x204] ss:$16 sps:$4 sm:$0xff]  }
 0x847   : > { %3056 = vmatpush1.bf16.msra.mxu0 %v8480_v20  ;;  %v8561_v20 = vld [vmem:[#allocation14 + $0x120] ss:$16 sps:$4 sm:$0xff]  }
 0x848   : > { %3057 = vmatprep.subr.bf16.mxu0 %v8488_v21  ;;  %v8564_v21 = vld [vmem:[#allocation14 + $0x200] ss:$16 sps:$4 sm:$0xff]  }
 0x849   : > { %3538 = vmatpush1.bf16.msra.mxu1 %v8483_v22  ;;  %v8573_v22 = vld [vmem:[#allocation14 + $0xec] ss:$16 sps:$4 sm:$0xff]  }
 0x84a   : > { %3539 = vmatprep.subr.bf16.mxu1 %v8491_v23  ;;  %v8567_v23 = vld [vmem:[#allocation14 + $0x100] ss:$16 sps:$4 sm:$0xff]  }
 0x84b   : > { %3058 = vmatpush1.bf16.msra.mxu0 %v8486_v24  ;;  %v8576_v24 = vld [vmem:[#allocation14 + $0x26c] ss:$16 sps:$4 sm:$0xff]  }
 0x84c   : > { %3059 = vmatprep.subr.bf16.mxu0 %v8494_v25  ;;  %v8571_v25 = vld [vmem:[#allocation14 + $0xe8] ss:$16 sps:$4 sm:$0xff]  }
 0x84d   : > { %3540 = vmatpush1.bf16.msra.mxu1 %v8489_v26  ;;  %v7366_v26 = vcombine.low %v9996_v41, %v9996_v41  ;;  %v8585_v41 = vld [vmem:[#allocation14 + $0xac] ss:$16 sps:$4 sm:$0xff]  }
 0x84e   : > { %3541 = vmatprep.subr.bf16.mxu1 %v8497_v27  ;;  %v8579_v27 = vld [vmem:[#allocation14 + $0xcc] ss:$16 sps:$4 sm:$0xff]  }
 0x84f   : > { %3060 = vmatpush1.bf16.msra.mxu0 %v8492_v28  ;;  %v8574_v28 = vld [vmem:[#allocation14 + $0x268] ss:$16 sps:$4 sm:$0xff]  }
 0x850   : > { %3061 = vmatprep.subr.bf16.mxu0 %v8500_v29  ;;  %v10026_v29 = vcombine.low %v9993_v40, %v9993_v40  ;;  %v8591_v40 = vld [vmem:[#allocation14 + $0x8c] ss:$16 sps:$4 sm:$0xff]  }
 0x851   : > { %3542 = vmatpush1.bf16.msra.mxu1 %v8495_v30  ;;  %v8582_v30 = vld [vmem:[#allocation14 + $0x24c] ss:$16 sps:$4 sm:$0xff]  }
 0x852   : > { %3543 = vmatprep.subr.bf16.mxu1 %v8503_v31  ;;  %v8577_v31 = vld [vmem:[#allocation14 + $0xc8] ss:$16 sps:$4 sm:$0xff]  }
 0x853   : > { %3062 = vmatpush2.bf16.msra.mxu0 %v8498_v32  ;;  %v8580_v32 = vld [vmem:[#allocation14 + $0x248] ss:$16 sps:$4 sm:$0xff]  }
 0x854   : > { %3063 = vmatprep.subr.bf16.mxu0 %v8506_v33  ;;  %v8588_v33 = vld [vmem:[#allocation14 + $0x22c] ss:$16 sps:$4 sm:$0xff]  }
 0x855   : > { %3544 = vmatpush1.bf16.msra.mxu1 %v8501_v34  ;;  %v8583_v34 = vld [vmem:[#allocation14 + $0xa8] ss:$16 sps:$4 sm:$0xff]  }
 0x856   : > { %3545 = vmatprep.subr.bf16.mxu1 %v8509_v35  ;;  %v8586_v35 = vld [vmem:[#allocation14 + $0x228] ss:$16 sps:$4 sm:$0xff]  }
 0x857   : > { %3064 = vmatpush2.bf16.msra.mxu0 %v8504_v36  ;;  %v8594_v36 = vld [vmem:[#allocation14 + $0x20c] ss:$16 sps:$4 sm:$0xff]  }
 0x858   : > { %3065 = vmatprep.subr.bf16.mxu0 %v8512_v37  ;;  %v8597_v37 = vld [vmem:[#allocation14 + $0x6c] ss:$16 sps:$4 sm:$0xff]  }
 0x859   : > { %3546 = vmatpush1.bf16.msra.mxu1 %v8507_v38  ;;  %v10031_v38 = vld [vmem:[#allocation4] sm:$0xee] }
 0x85a   : > { %3547 = vmatprep.subr.bf16.mxu1 %v8515_v39  ;;  %v8592_v39 = vld [vmem:[#allocation14 + $0x208] ss:$16 sps:$4 sm:$0xff]  }
 0x85b   : > { %3066 = vmatpush2.bf16.msra.mxu0 %v8510_v45  ;;  %v8600_v45 = vld [vmem:[#allocation14 + $0x5e4] ss:$16 sps:$4 sm:$0xff]  }
 0x85c   : > { %3067 = vmatprep.subr.bf16.mxu0 %v8518_v48  ;;  %v8595_v48 = vld [vmem:[#allocation14 + $0x68] ss:$16 sps:$4 sm:$0xff]  }
 0x85d   : > { %3548 = vmatpush1.bf16.msra.mxu1 %v8513_v49  ;;  %v7450_v49 = vcombine.high %v10031_v38, %v10002_v47 }
 0x85e   : > { %3549 = vmatprep.subr.bf16.mxu1 %v8521_v50  ;;  %v8605_v50 = vld [vmem:[#allocation14 + $0x4c] ss:$16 sps:$4 sm:$0xff]  }
 0x85f   : > { %3068 = vmatpush2.bf16.msra.mxu0 %v8516_v51  ;;  %v8598_v51 = vld [vmem:[#allocation14 + $0x5e0] ss:$16 sps:$4 sm:$0xff]  }
 0x860   : > { %3069 = vmatprep.subr.bf16.mxu0 %v8524_v52  ;;  %v8608_v52 = vld [vmem:[#allocation14 + $0x5c4] ss:$16 sps:$4 sm:$0xff]  }
 0x861   : > { %3550 = vmatpush1.bf16.msra.mxu1 %v8519_v53  ;;  %v10035_v53 = vrot.slane %v7450_v49, 1  ;;  %v8686_v49 = vld [vmem:[#allocation14 + $0x624] ss:$16 sps:$4 sm:$0xff]  }
 0x862   : > { %3551 = vmatprep.subr.bf16.mxu1 %v8527_v54  ;;  %v8603_v54 = vld [vmem:[#allocation14 + $0x48] ss:$16 sps:$4 sm:$0xff]  }
 0x863   : > { %3070 = vmatpush2.bf16.msra.mxu0 %v8522_v55  ;;  %v8611_v55 = vld [vmem:[#allocation14 + $0x2c] ss:$16 sps:$4 sm:$0xff]  }
 0x864   : > { %3071 = vmatprep.subr.bf16.mxu0 %v8530_v56  ;;  %v8606_v56 = vld [vmem:[#allocation14 + $0x5c0] ss:$16 sps:$4 sm:$0xff]  }
 0x865   : > { %3552 = vmatpush2.bf16.msra.mxu1 %v8525_v57  ;;  %v8614_v57 = vld [vmem:[#allocation14 + $0x5a4] ss:$16 sps:$4 sm:$0xff]  }
 0x866   : > { %3553 = vmatprep.subr.bf16.mxu1 %v8533_v58  ;;  %v8609_v58 = vld [vmem:[#allocation14 + $0x28] ss:$16 sps:$4 sm:$0xff]  }
 0x867   : > { %3072 = vmatpush2.bf16.msra.mxu0 %v8528_v60  ;;  %v8617_v60 = vld [vmem:[#allocation14 + $0xc] ss:$16 sps:$4 sm:$0xff]  }
 0x868   : > { %3073 = vmatprep.subr.bf16.mxu0 %v8536_v61  ;;  %v8612_v61 = vld [vmem:[#allocation14 + $0x5a0] ss:$16 sps:$4 sm:$0xff]  }
 0x869   : > { %3554 = vmatpush2.bf16.msra.mxu1 %v8531_v62  ;;  %v8620_v62 = vld [vmem:[#allocation14 + $0x584] ss:$16 sps:$4 sm:$0xff]  }
 0x86a   : > { %3555 = vmatprep.subr.bf16.mxu1 %v8539_v63  ;;  %v8615_v63 = vld [vmem:[#allocation14 + $0x8] ss:$16 sps:$4 sm:$0xff]  }
 0x86b   : > { %3074 = vmatpush2.bf16.msra.mxu0 %v8534_v1  ;;  %v8623_v1 = vld [vmem:[#allocation14 + $0x1ec] ss:$16 sps:$4 sm:$0xff]  }
 0x86c   : > { %3075 = vmatprep.subr.bf16.mxu0 %v8542_v2  ;;  %v8618_v2 = vld [vmem:[#allocation14 + $0x580] ss:$16 sps:$4 sm:$0xff]  }
 0x86d   : > { %3556 = vmatpush2.bf16.msra.mxu1 %v8537_v3  ;;  %v8626_v3 = vld [vmem:[#allocation14 + $0x564] ss:$16 sps:$4 sm:$0xff]  }
 0x86e   : > { %3557 = vmatprep.subr.bf16.mxu1 %v8545_v4  ;;  %v8621_v4 = vld [vmem:[#allocation14 + $0x1e8] ss:$16 sps:$4 sm:$0xff]  }
 0x86f   : > { %3076 = vmatpush2.bf16.msra.mxu0 %v8540_v5  ;;  %v8629_v5 = vld [vmem:[#allocation14 + $0x1cc] ss:$16 sps:$4 sm:$0xff]  }
 0x870   : > { %3584 = vmatprep.subr.bf16.mxu0 %v8548_v6  ;;  %v8624_v6 = vld [vmem:[#allocation14 + $0x560] ss:$16 sps:$4 sm:$0xff]  }
 0x871   : > { %3558 = vmatpush2.bf16.msra.mxu1 %v8543_v7  ;;  %v8632_v7 = vld [vmem:[#allocation14 + $0x544] ss:$16 sps:$4 sm:$0xff]  }
 0x872   : > { %3078 = vmatmul.mubr.bf16.vlgmr.msra.gmra.mxu0 %v10008_v0  ;;  %3559 = vmatprep.subr.bf16.mxu1 %v8551_v8  ;;  %v8569_v0 = vld [vmem:[#allocation14 + $0x104] ss:$16 sps:$4 sm:$0xff]   ;;  %v8627_v8 = vld [vmem:[#allocation14 + $0x1c8] ss:$16 sps:$4 sm:$0xff]  }
 0x873   : > { %3585 = vmatpush1.bf16.msra.mxu0 %v8546_v9  ;;  %3608 = vmatprep.mubr.bf16.mxu0 %v9522_v59  ;;  %v8635_v9 = vld [vmem:[#allocation14 + $0x1ac] ss:$16 sps:$4 sm:$0xff]  }
 0x874   : > { %3586 = vmatprep.subr.bf16.mxu0 %v8554_v10  ;;  %v8630_v10 = vld [vmem:[#allocation14 + $0x540] ss:$16 sps:$4 sm:$0xff]  }
 0x875   : > { %3560 = vmatpush2.bf16.msra.mxu1 %v8549_v11  ;;  %v8638_v11 = vld [vmem:[#allocation14 + $0x524] ss:$16 sps:$4 sm:$0xff]  }
 0x876   : > { %3561 = vmatprep.subr.bf16.mxu1 %v8557_v12  ;;  %v8633_v12 = vld [vmem:[#allocation14 + $0x1a8] ss:$16 sps:$4 sm:$0xff]  }
 0x877   : > { %3587 = vmatpush1.bf16.msra.mxu0 %v8552_v13  ;;  %v8641_v13 = vld [vmem:[#allocation14 + $0x18c] ss:$16 sps:$4 sm:$0xff]  }
 0x878   : > { %3588 = vmatprep.subr.bf16.mxu0 %v8560_v14  ;;  %v8636_v14 = vld [vmem:[#allocation14 + $0x520] ss:$16 sps:$4 sm:$0xff]  }
 0x879   : > { %3562 = vmatpush2.bf16.msra.mxu1 %v8555_v15  ;;  %v8644_v15 = vld [vmem:[#allocation14 + $0x504] ss:$16 sps:$4 sm:$0xff]  }
 0x87a   : > { %3563 = vmatprep.subr.bf16.mxu1 %v8563_v16  ;;  %v8639_v16 = vld [vmem:[#allocation14 + $0x188] ss:$16 sps:$4 sm:$0xff]  }
 0x87b   : > { %3589 = vmatpush1.bf16.msra.mxu0 %v8558_v17  ;;  %v8647_v17 = vld [vmem:[#allocation14 + $0x16c] ss:$16 sps:$4 sm:$0xff]  }
 0x87c   : > { %3590 = vmatprep.subr.bf16.mxu0 %v8566_v18  ;;  %v8642_v18 = vld [vmem:[#allocation14 + $0x500] ss:$16 sps:$4 sm:$0xff]  }
 0x87d   : > { %3564 = vmatpush2.bf16.msra.mxu1 %v8561_v20  ;;  %v8650_v20 = vld [vmem:[#allocation14 + $0x6e4] ss:$16 sps:$4 sm:$0xff]  }
 0x87e   : > { %3565 = vmatprep.subr.bf16.mxu1 %v8569_v0  ;;  %v8645_v0 = vld [vmem:[#allocation14 + $0x168] ss:$16 sps:$4 sm:$0xff]  }
 0x87f   : > { %3591 = vmatpush1.bf16.msra.mxu0 %v8564_v21  ;;  %v8653_v21 = vld [vmem:[#allocation14 + $0x14c] ss:$16 sps:$4 sm:$0xff]  }
 0x880   : > { %3617 = vmatprep.subr.bf16.mxu0 %v8573_v22  ;;  %v8648_v22 = vld [vmem:[#allocation14 + $0x6e0] ss:$16 sps:$4 sm:$0xff]  }
 0x881   : > { %3566 = vmatpush2.bf16.msra.mxu1 %v8567_v23  ;;  %v8656_v23 = vld [vmem:[#allocation14 + $0x6c4] ss:$16 sps:$4 sm:$0xff]  }
 0x882   : > { %7447 = vmatmul.mubr.msk.bf16.vlgmr.msra.gmra.mxu0 %vm2959_vm12, %v7366_v26  ;;  %3666 = vmatprep.subr.bf16.mxu1 %v8576_v24  ;;  %v8651_v24 = vld [vmem:[#allocation14 + $0x148] ss:$16 sps:$4 sm:$0xff]  }
 0x883   : > { %3618 = vmatpush1.bf16.msra.mxu0 %v8571_v25  ;;  %3649 = vmatprep.mubr.bf16.mxu0 %v10015_v19  ;;  %v8589_v19 = vld [vmem:[#allocation14 + $0x88] ss:$16 sps:$4 sm:$0xff]   ;;  %v8659_v25 = vld [vmem:[#allocation14 + $0x12c] ss:$16 sps:$4 sm:$0xff]  }
 0x884   : > { %3568 = vmatmul.mubr.bf16.vlgmr.msra.gmra.mxu1 %v10026_v29  ;;  %3619 = vmatprep.subr.bf16.mxu0 %v8579_v27  ;;  %v8662_v27 = vld [vmem:[#allocation14 + $0x6a4] ss:$16 sps:$4 sm:$0xff]  }
 0x885   : > { %3667 = vmatpush1.bf16.msra.mxu1 %v8574_v28  ;;  %3690 = vmatprep.mubr.bf16.mxu1 %v9522_v59  ;;  %v8657_v28 = vld [vmem:[#allocation14 + $0x128] ss:$16 sps:$4 sm:$0xff]  }
 0x886   : > { %3668 = vmatprep.subr.bf16.mxu1 %v8582_v30  ;;  %v8665_v30 = vld [vmem:[#allocation14 + $0x10c] ss:$16 sps:$4 sm:$0xff]  }
 0x887   : > { %3620 = vmatpush1.bf16.msra.mxu0 %v8577_v31  ;;  %v8660_v31 = vld [vmem:[#allocation14 + $0x6a0] ss:$16 sps:$4 sm:$0xff]  }
 0x888   : > { %3621 = vmatprep.subr.bf16.mxu0 %v8585_v41  ;;  %v8668_v41 = vld [vmem:[#allocation14 + $0x684] ss:$16 sps:$4 sm:$0xff]  }
 0x889   : > { %3669 = vmatpush1.bf16.msra.mxu1 %v8580_v32  ;;  %v8663_v32 = vld [vmem:[#allocation14 + $0x108] ss:$16 sps:$4 sm:$0xff]  }
 0x88a   : > { %3670 = vmatprep.subr.bf16.mxu1 %v8588_v33  ;;  %v8671_v33 = vld [vmem:[#allocation14 + $0x764] ss:$16 sps:$4 sm:$0xff]  }
 0x88b   : > { %3622 = vmatpush1.bf16.msra.mxu0 %v8583_v34  ;;  %v8666_v34 = vld [vmem:[#allocation14 + $0x680] ss:$16 sps:$4 sm:$0xff]  }
 0x88c   : > { %3623 = vmatprep.subr.bf16.mxu0 %v8591_v40  ;;  %v8674_v40 = vld [vmem:[#allocation14 + $0x664] ss:$16 sps:$4 sm:$0xff]  }
 0x88d   : > { %3671 = vmatpush1.bf16.msra.mxu1 %v8586_v35  ;;  %v8669_v35 = vld [vmem:[#allocation14 + $0x760] ss:$16 sps:$4 sm:$0xff]  }
 0x88e   : > { %3672 = vmatprep.subr.bf16.mxu1 %v8594_v36  ;;  %v8677_v36 = vld [vmem:[#allocation14 + $0x744] ss:$16 sps:$4 sm:$0xff]  }
 0x88f   : > { %3624 = vmatpush1.bf16.msra.mxu0 %v8589_v19  ;;  %v8672_v19 = vld [vmem:[#allocation14 + $0x660] ss:$16 sps:$4 sm:$0xff]  }
 0x890   : > { %3625 = vmatprep.subr.bf16.mxu0 %v8597_v37  ;;  %v8680_v37 = vld [vmem:[#allocation14 + $0x644] ss:$16 sps:$4 sm:$0xff]  }
 0x891   : > { %3673 = vmatpush1.bf16.msra.mxu1 %v8592_v39  ;;  %v8675_v39 = vld [vmem:[#allocation14 + $0x740] ss:$16 sps:$4 sm:$0xff]  }
 0x892   : > { %4198 = vmatprep.subr.bf16.mxu1 %v8600_v45  ;;  %v8683_v45 = vld [vmem:[#allocation14 + $0x724] ss:$16 sps:$4 sm:$0xff]  }
 0x893   : > { %3626 = vmatpush1.bf16.msra.mxu0 %v8595_v48  ;;  %v8678_v48 = vld [vmem:[#allocation14 + $0x640] ss:$16 sps:$4 sm:$0xff]  }
 0x894   : > { %7448 = vmatmul.mubr.msk.bf16.vlgmr.msra.gmra.mxu1 %vm2959_vm12, %v7366_v26  ;;  %3627 = vmatprep.subr.bf16.mxu0 %v8605_v50  ;;  %v8654_v26 = vld [vmem:[#allocation14 + $0x6c0] ss:$16 sps:$4 sm:$0xff]  }
 0x895   : > { %4199 = vmatpush1.bf16.msra.mxu1 %v8598_v51  ;;  %4230 = vmatprep.mubr.bf16.mxu1 %v10035_v53  ;;  %v8681_v50 = vld [vmem:[#allocation14 + $0x720] ss:$16 sps:$4 sm:$0xff]   ;;  %v8689_v51 = vld [vmem:[#allocation14 + $0x704] ss:$16 sps:$4 sm:$0xff]  }
 0x896   : > { %4200 = vmatprep.subr.bf16.mxu1 %v8608_v52  ;;  %v8684_v52 = vld [vmem:[#allocation14 + $0x620] ss:$16 sps:$4 sm:$0xff]  }
 0x897   : > { %3628 = vmatpush1.bf16.msra.mxu0 %v8603_v54  ;;  %v3700_v54 = vld [vmem:[#allocation4 + $0x8] sm:$0xe] }
 0x898   : > { %3629 = vmatprep.subr.bf16.mxu0 %v8611_v55  ;;  %v8687_v55 = vld [vmem:[#allocation14 + $0x700] ss:$16 sps:$4 sm:$0xff]  }
 0x899   : > { %4201 = vmatpush1.bf16.msra.mxu1 %v8606_v56  ;;  %v7451_v56 = vcombine.low %v3700_v54, %v9998_v42  ;;  %v8705_v42 = vld [vmem:[#allocation14 + $0x74c] ss:$16 sps:$4 sm:$0xff]   ;;  %v8771_v54 = vld [vmem:[#allocation16 + $0x334] ss:$12 sps:$4 sm:$0xff]  }
 0x89a   : > { %4202 = vmatprep.subr.bf16.mxu1 %v8614_v57  ;;  %v8696_v57 = vld [vmem:[#allocation14 + $0x5ec] ss:$16 sps:$4 sm:$0xff]  }
 0x89b   : > { %3630 = vmatpush1.bf16.msra.mxu0 %v8609_v58  ;;  %v8690_v58 = vld [vmem:[#allocation14 + $0x600] ss:$16 sps:$4 sm:$0xff]  }
 0x89c   : > { %3631 = vmatprep.subr.bf16.mxu0 %v8617_v60  ;;  %v7449_v60 = vcombine.low %v10031_v38, %v10002_v47  ;;  %v8708_v47 = vld [vmem:[#allocation14 + $0x5ac] ss:$16 sps:$4 sm:$0xff]   ;;  %v8703_v38 = vld [vmem:[#allocation14 + $0x748] ss:$16 sps:$4 sm:$0xff]  }
 0x89d   : > { %4203 = vmatpush1.bf16.msra.mxu1 %v8612_v61  ;;  %v8699_v61 = vld [vmem:[#allocation14 + $0x76c] ss:$16 sps:$4 sm:$0xff]  }
 0x89e   : > { %4204 = vmatprep.subr.bf16.mxu1 %v8620_v62  ;;  %v8694_v62 = vld [vmem:[#allocation14 + $0x5e8] ss:$16 sps:$4 sm:$0xff]  }
 0x89f   : > { %3632 = vmatpush1.bf16.msra.mxu0 %v8615_v63  ;;  %v3792_v63 = vrot.slane %v7451_v56, 1  ;;  %v8747_v56 = vld [vmem:[#allocation14 + $0x64c] ss:$16 sps:$4 sm:$0xff]  }
 0x8a0   : > { %3633 = vmatprep.subr.bf16.mxu0 %v8623_v1  ;;  %v8702_v1 = vld [vmem:[#allocation14 + $0x5cc] ss:$16 sps:$4 sm:$0xff]  }
 0x8a1   : > { %4205 = vmatpush1.bf16.msra.mxu1 %v8618_v2  ;;  %v8697_v2 = vld [vmem:[#allocation14 + $0x768] ss:$16 sps:$4 sm:$0xff]  }
 0x8a2   : > { %4206 = vmatprep.subr.bf16.mxu1 %v8626_v3  ;;  %v10044_v3 = vrot.slane %v7449_v60, 1  ;;  %v8745_v60 = vld [vmem:[#allocation14 + $0x648] ss:$16 sps:$4 sm:$0xff]  }
 0x8a3   : > { %3634 = vmatpush2.bf16.msra.mxu0 %v8621_v4  ;;  %v8700_v4 = vld [vmem:[#allocation14 + $0x5c8] ss:$16 sps:$4 sm:$0xff]  }
 0x8a4   : > { %3635 = vmatprep.subr.bf16.mxu0 %v8629_v5  ;;  %v8711_v5 = vld [vmem:[#allocation14 + $0x72c] ss:$16 sps:$4 sm:$0xff]  }
 0x8a5   : > { %4207 = vmatpush1.bf16.msra.mxu1 %v8624_v6  ;;  %v8706_v6 = vld [vmem:[#allocation14 + $0x5a8] ss:$16 sps:$4 sm:$0xff]  }
 0x8a6   : > { %4208 = vmatprep.subr.bf16.mxu1 %v8632_v7  ;;  %v8714_v7 = vld [vmem:[#allocation14 + $0x58c] ss:$16 sps:$4 sm:$0xff]  }
 0x8a7   : > { %3636 = vmatpush2.bf16.msra.mxu0 %v8627_v8  ;;  %v8709_v8 = vld [vmem:[#allocation14 + $0x728] ss:$16 sps:$4 sm:$0xff]  }
 0x8a8   : > { %3637 = vmatprep.subr.bf16.mxu0 %v8635_v9  ;;  %v8717_v9 = vld [vmem:[#allocation14 + $0x70c] ss:$16 sps:$4 sm:$0xff]  }
 0x8a9   : > { %4209 = vmatpush1.bf16.msra.mxu1 %v8630_v10  ;;  %v8720_v10 = vld [vmem:[#allocation14 + $0x56c] ss:$16 sps:$4 sm:$0xff]  }
 0x8aa   : > { %4210 = vmatprep.subr.bf16.mxu1 %v8638_v11  ;;  %v8715_v11 = vld [vmem:[#allocation14 + $0x708] ss:$16 sps:$4 sm:$0xff]  }
 0x8ab   : > { %3638 = vmatpush2.bf16.msra.mxu0 %v8633_v12  ;;  %v8756_v12 = vld [vmem:[#allocation16 + $0x3ac] ss:$12 sps:$4 sm:$0xff]  }
 0x8ac   : > { %3639 = vmatprep.subr.bf16.mxu0 %v8641_v13  ;;  %v8723_v13 = vld [vmem:[#allocation14 + $0x54c] ss:$16 sps:$4 sm:$0xff]  }
 0x8ad   : > { %4211 = vmatpush1.bf16.msra.mxu1 %v8636_v14  ;;  %v8754_v14 = vld [vmem:[#allocation16 + $0x3a8] ss:$12 sps:$4 sm:$0xff]  }
 0x8ae   : > { %4212 = vmatprep.subr.bf16.mxu1 %v8644_v15  ;;  %v8759_v15 = vld [vmem:[#allocation16 + $0x394] ss:$12 sps:$4 sm:$0xff]  }
 0x8af   : > { %3640 = vmatpush2.bf16.msra.mxu0 %v8639_v16  ;;  %v8721_v16 = vld [vmem:[#allocation14 + $0x548] ss:$16 sps:$4 sm:$0xff]  }
 0x8b0   : > { %3641 = vmatprep.subr.bf16.mxu0 %v8647_v17  ;;  %v8726_v17 = vld [vmem:[#allocation14 + $0x52c] ss:$16 sps:$4 sm:$0xff]  }
 0x8b1   : > { %4213 = vmatpush1.bf16.msra.mxu1 %v8642_v18  ;;  %v8757_v18 = vld [vmem:[#allocation16 + $0x390] ss:$12 sps:$4 sm:$0xff]  }
 0x8b2   : > { %4214 = vmatprep.subr.bf16.mxu1 %v8650_v20  ;;  %v8762_v20 = vld [vmem:[#allocation16 + $0x37c] ss:$12 sps:$4 sm:$0xff]  }
 0x8b3   : > { %3642 = vmatpush2.bf16.msra.mxu0 %v8645_v0  ;;  %v8724_v0 = vld [vmem:[#allocation14 + $0x528] ss:$16 sps:$4 sm:$0xff]  }
 0x8b4   : > { %3643 = vmatprep.subr.bf16.mxu0 %v8653_v21  ;;  %v8729_v21 = vld [vmem:[#allocation14 + $0x50c] ss:$16 sps:$4 sm:$0xff]  }
 0x8b5   : > { %4215 = vmatpush2.bf16.msra.mxu1 %v8648_v22  ;;  %v8760_v22 = vld [vmem:[#allocation16 + $0x378] ss:$12 sps:$4 sm:$0xff]  }
 0x8b6   : > { %4216 = vmatprep.subr.bf16.mxu1 %v8656_v23  ;;  %v8765_v23 = vld [vmem:[#allocation16 + $0x364] ss:$12 sps:$4 sm:$0xff]  }
 0x8b7   : > { %3644 = vmatpush2.bf16.msra.mxu0 %v8651_v24  ;;  %v8727_v24 = vld [vmem:[#allocation14 + $0x508] ss:$16 sps:$4 sm:$0xff]  }
 0x8b8   : > { %3645 = vmatprep.subr.bf16.mxu0 %v8659_v25  ;;  %v8732_v25 = vld [vmem:[#allocation14 + $0x6ec] ss:$16 sps:$4 sm:$0xff]  }
 0x8b9   : > { %4217 = vmatpush2.bf16.msra.mxu1 %v8654_v26  ;;  %v8763_v26 = vld [vmem:[#allocation16 + $0x360] ss:$12 sps:$4 sm:$0xff]  }
 0x8ba   : > { %4218 = vmatprep.subr.bf16.mxu1 %v8662_v27  ;;  %v8768_v27 = vld [vmem:[#allocation16 + $0x34c] ss:$12 sps:$4 sm:$0xff]  }
 0x8bb   : > { %3646 = vmatpush2.bf16.msra.mxu0 %v8657_v28  ;;  %v8730_v28 = vld [vmem:[#allocation14 + $0x6e8] ss:$16 sps:$4 sm:$0xff]  }
 0x8bc   : > { %3647 = vmatprep.subr.bf16.mxu0 %v8665_v30  ;;  %v8735_v30 = vld [vmem:[#allocation14 + $0x6cc] ss:$16 sps:$4 sm:$0xff]  }
 0x8bd   : > { %4219 = vmatpush2.bf16.msra.mxu1 %v8660_v31  ;;  %v8766_v31 = vld [vmem:[#allocation16 + $0x348] ss:$12 sps:$4 sm:$0xff]  }
 0x8be   : > { %4220 = vmatprep.subr.bf16.mxu1 %v8668_v41 }
 0x8bf   : > { %3648 = vmatpush2.bf16.msra.mxu0 %v8663_v32  ;;  %v8733_v32 = vld [vmem:[#allocation14 + $0x6c8] ss:$16 sps:$4 sm:$0xff]  }
 0x8c0   : > { %4247 = vmatprep.subr.bf16.mxu0 %v8671_v33 }
 0x8c1   : > { %4221 = vmatpush2.bf16.msra.mxu1 %v8666_v34 }
 0x8c2   : > { %3650 = vmatmul.mubr.bf16.vlgmr.msra.gmra.mxu0 %v10026_v29  ;;  %4222 = vmatprep.subr.bf16.mxu1 %v8674_v40  ;;  %v8692_v29 = vld [vmem:[#allocation14 + $0x604] ss:$16 sps:$4 sm:$0xff]   ;;  %v8738_v40 = vld [vmem:[#allocation14 + $0x6ac] ss:$16 sps:$4 sm:$0xff]  }
 0x8c3   : > { %4248 = vmatpush1.bf16.msra.mxu0 %v8669_v35  ;;  %4271 = vmatprep.mubr.bf16.mxu0 %v9522_v59 }
 0x8c4   : > { %4249 = vmatprep.subr.bf16.mxu0 %v8677_v36 }
 0x8c5   : > { %4223 = vmatpush2.bf16.msra.mxu1 %v8672_v19 }
 0x8c6   : > { %4224 = vmatprep.subr.bf16.mxu1 %v8680_v37 }
 0x8c7   : > { %4250 = vmatpush1.bf16.msra.mxu0 %v8675_v39  ;;  %v8736_v39 = vld [vmem:[#allocation14 + $0x6a8] ss:$16 sps:$4 sm:$0xff]  }
 0x8c8   : > { %4251 = vmatprep.subr.bf16.mxu0 %v8683_v45 }
 0x8c9   : > { %4225 = vmatpush2.bf16.msra.mxu1 %v8678_v48 }
 0x8ca   : > { %4226 = vmatprep.subr.bf16.mxu1 %v8686_v49  ;;  %v8741_v49 = vld [vmem:[#allocation14 + $0x68c] ss:$16 sps:$4 sm:$0xff]  }
 0x8cb   : > { %4252 = vmatpush1.bf16.msra.mxu0 %v8681_v50 }
 0x8cc   : > { %4253 = vmatprep.subr.bf16.mxu0 %v8689_v51  ;;  %v8739_v51 = vld [vmem:[#allocation14 + $0x688] ss:$16 sps:$4 sm:$0xff]  }
 0x8cd   : > { %4227 = vmatpush2.bf16.msra.mxu1 %v8684_v52  ;;  %v8744_v52 = vld [vmem:[#allocation14 + $0x66c] ss:$16 sps:$4 sm:$0xff]  }
 0x8ce   : > { %4228 = vmatprep.subr.bf16.mxu1 %v8692_v29  ;;  %v8769_v29 = vld [vmem:[#allocation16 + $0x330] ss:$12 sps:$4 sm:$0xff]  }
 0x8cf   : > { %4254 = vmatpush1.bf16.msra.mxu0 %v8687_v55  ;;  %v8742_v55 = vld [vmem:[#allocation14 + $0x668] ss:$16 sps:$4 sm:$0xff]  }
 0x8d0   : > { %4280 = vmatprep.subr.bf16.mxu0 %v8696_v57  ;;  %v8774_v57 = vld [vmem:[#allocation16 + $0x31c] ss:$12 sps:$4 sm:$0xff]  }
 0x8d1   : > { %4229 = vmatpush2.bf16.msra.mxu1 %v8690_v58  ;;  %v8772_v58 = vld [vmem:[#allocation16 + $0x318] ss:$12 sps:$4 sm:$0xff]  }
 0x8d2   : > { %7532 = vmatmul.mubr.msk.bf16.vlgmr.msra.gmra.mxu0 %vm2959_vm12, %v3792_v63  ;;  %4329 = vmatprep.subr.bf16.mxu1 %v8699_v61 }
 0x8d3   : > { %4281 = vmatpush1.bf16.msra.mxu0 %v8694_v62  ;;  %4312 = vmatprep.mubr.bf16.mxu0 %v10035_v53  ;;  %v8712_v53 = vld [vmem:[#allocation14 + $0x588] ss:$16 sps:$4 sm:$0xff]   ;;  %v8750_v62 = vld [vmem:[#allocation14 + $0x62c] ss:$16 sps:$4 sm:$0xff]  }
 0x8d4   : > { %4231 = vmatmul.mubr.bf16.vlgmr.msra.gmra.mxu1 %v10044_v3  ;;  %4282 = vmatprep.subr.bf16.mxu0 %v8702_v1  ;;  %v8775_v1 = vld [vmem:[#allocation16 + $0x300] ss:$12 sps:$4 sm:$0xff]  }
 0x8d5   : > { %4330 = vmatpush1.bf16.msra.mxu1 %v8697_v2  ;;  %4353 = vmatprep.mubr.bf16.mxu1 %v9522_v59  ;;  %v8718_v59 = vld [vmem:[#allocation14 + $0x568] ss:$16 sps:$4 sm:$0xff]  }
 0x8d6   : > { %4331 = vmatprep.subr.bf16.mxu1 %v8705_v42  ;;  %v8748_v42 = vld [vmem:[#allocation14 + $0x628] ss:$16 sps:$4 sm:$0xff]  }
 0x8d7   : > { %4283 = vmatpush1.bf16.msra.mxu0 %v8700_v4 }
 0x8d8   : > { %4284 = vmatprep.subr.bf16.mxu0 %v8708_v47  ;;  %v8753_v47 = vld [vmem:[#allocation14 + $0x60c] ss:$16 sps:$4 sm:$0xff]  }
 0x8d9   : > { %4332 = vmatpush1.bf16.msra.mxu1 %v8703_v38  ;;  %v8778_v38 = vld [vmem:[#allocation16 + $0x468] ss:$12 sps:$4 sm:$0xff]  }
 0x8da   : > { %4333 = vmatprep.subr.bf16.mxu1 %v8711_v5  ;;  %v8780_v5 = vld [vmem:[#allocation16 + $0x46c] ss:$12 sps:$4 sm:$0xff]  }
 0x8db   : > { %4285 = vmatpush1.bf16.msra.mxu0 %v8706_v6 }
 0x8dc   : > { %4286 = vmatprep.subr.bf16.mxu0 %v8714_v7  ;;  %v8751_v7 = vld [vmem:[#allocation14 + $0x608] ss:$16 sps:$4 sm:$0xff]  }
 0x8dd   : > { %4334 = vmatpush1.bf16.msra.mxu1 %v8709_v8  ;;  %v8783_v8 = vld [vmem:[#allocation16 + $0x454] ss:$12 sps:$4 sm:$0xff]  }
 0x8de   : > { %4335 = vmatprep.subr.bf16.mxu1 %v8717_v9  ;;  %v8781_v9 = vld [vmem:[#allocation16 + $0x450] ss:$12 sps:$4 sm:$0xff]  }
 0x8df   : > { %4287 = vmatpush1.bf16.msra.mxu0 %v8712_v53  ;;  %v8786_v53 = vld [vmem:[#allocation16 + $0x43c] ss:$12 sps:$4 sm:$0xff]  }
 0x8e0   : > { %4288 = vmatprep.subr.bf16.mxu0 %v8720_v10  ;;  %v8784_v10 = vld [vmem:[#allocation16 + $0x438] ss:$12 sps:$4 sm:$0xff]  }
 0x8e1   : > { %4336 = vmatpush1.bf16.msra.mxu1 %v8715_v11  ;;  %v8789_v11 = vld [vmem:[#allocation16 + $0x424] ss:$12 sps:$4 sm:$0xff]  }
 0x8e2   : > { %5229 = vmatprep.subr.bf16.mxu1 %v8756_v12  ;;  %v8787_v12 = vld [vmem:[#allocation16 + $0x420] ss:$12 sps:$4 sm:$0xff]  }
 0x8e3   : > { %4289 = vmatpush1.bf16.msra.mxu0 %v8718_v59  ;;  %v8792_v59 = vld [vmem:[#allocation16 + $0x40c] ss:$12 sps:$4 sm:$0xff]  }
 0x8e4   : > { %7533 = vmatmul.mubr.msk.bf16.vlgmr.msra.gmra.mxu1 %vm2959_vm12, %v3792_v63  ;;  %4290 = vmatprep.subr.bf16.mxu0 %v8723_v13  ;;  %v8777_v63 = vld [vmem:[#allocation16 + $0x304] ss:$12 sps:$4 sm:$0xff]   ;;  %v8790_v13 = vld [vmem:[#allocation16 + $0x408] ss:$12 sps:$4 sm:$0xff]  }
 0x8e5   : > { %5230 = vmatpush1.bf16.msra.mxu1 %v8754_v14  ;;  %v8795_v14 = vld [vmem:[#allocation16 + $0x3f4] ss:$12 sps:$4 sm:$0xff]  }
 0x8e6   : > { %5231 = vmatprep.subr.bf16.mxu1 %v8759_v15  ;;  %v8793_v15 = vld [vmem:[#allocation16 + $0x3f0] ss:$12 sps:$4 sm:$0xff]  }
 0x8e7   : > { %4291 = vmatpush1.bf16.msra.mxu0 %v8721_v16  ;;  %v8798_v16 = vld [vmem:[#allocation16 + $0x3dc] ss:$12 sps:$4 sm:$0xff]  }
 0x8e8   : > { %4292 = vmatprep.subr.bf16.mxu0 %v8726_v17  ;;  %v8796_v17 = vld [vmem:[#allocation16 + $0x3d8] ss:$12 sps:$4 sm:$0xff]  }
 0x8e9   : > { %5232 = vmatpush1.bf16.msra.mxu1 %v8757_v18  ;;  %v8801_v18 = vld [vmem:[#allocation16 + $0x3c4] ss:$12 sps:$4 sm:$0xff]  }
 0x8ea   : > { %5233 = vmatprep.subr.bf16.mxu1 %v8762_v20  ;;  %v8804_v20 = vld [vmem:[#allocation16 + $0x52c] ss:$12 sps:$4 sm:$0xff]  }
 0x8eb   : > { %4293 = vmatpush1.bf16.msra.mxu0 %v8724_v0  ;;  %v8802_v0 = vld [vmem:[#allocation16 + $0x528] ss:$12 sps:$4 sm:$0xff]  }
 0x8ec   : > { %4294 = vmatprep.subr.bf16.mxu0 %v8729_v21  ;;  %v8805_v21 = vld [vmem:[#allocation16 + $0x470] ss:$12 sps:$4 sm:$0xff]  }
 0x8ed   : > { %5234 = vmatpush1.bf16.msra.mxu1 %v8760_v22  ;;  %v8809_v22 = vld [vmem:[#allocation16 + $0x514] ss:$12 sps:$4 sm:$0xff]  }
 0x8ee   : > { %5235 = vmatprep.subr.bf16.mxu1 %v8765_v23  ;;  %v8807_v23 = vld [vmem:[#allocation16 + $0x510] ss:$12 sps:$4 sm:$0xff]  }
 0x8ef   : > { %4295 = vmatpush1.bf16.msra.mxu0 %v8727_v24  ;;  %v8814_v24 = vld [vmem:[#allocation16 + $0x4fc] ss:$12 sps:$4 sm:$0xff]  }
 0x8f0   : > { %4296 = vmatprep.subr.bf16.mxu0 %v8732_v25  ;;  %v8812_v25 = vld [vmem:[#allocation16 + $0x4f8] ss:$12 sps:$4 sm:$0xff]  }
 0x8f1   : > { %5236 = vmatpush1.bf16.msra.mxu1 %v8763_v26 }
 0x8f2   : > { %v3038_v41 = vpop.f32.mrf.mxu0  ;;  %5237 = vmatprep.subr.bf16.mxu1 %v8768_v27  ;;  %v8819_v27 = vld [vmem:[#allocation16 + $0x4e4] ss:$12 sps:$4 sm:$0xff]  }
 0x8f3   : > { %4297 = vmatpush2.bf16.msra.mxu0 %v8730_v28 }
 0x8f4   : > { %v2997_v33 = vpop.f32.mrf.mxu1  ;;  %v3040_v34 = vpop.f32.mrf.mxu0  ;;  %4298 = vmatprep.subr.bf16.mxu0 %v8735_v30  ;;  %v8817_v30 = vld [vmem:[#allocation16 + $0x4e0] ss:$12 sps:$4 sm:$0xff]  }
 0x8f5   : > { %v10051_v35 = vadd.f32 %v3038_v41, %v2997_v33  ;;  %5238 = vmatpush1.bf16.msra.mxu1 %v8766_v31  ;;  %v8824_v33 = vld [vmem:[#allocation16 + $0x4cc] ss:$12 sps:$4 sm:$0xff]  }
 0x8f6   : > { %v2999_v36 = vpop.f32.mrf.mxu1  ;;  %v3042_v19 = vpop.f32.mrf.mxu0  ;;  %5239 = vmatprep.subr.bf16.mxu1 %v8771_v54 }
 0x8f7   : > { %v10053_v37 = vadd.f32 %v3040_v34, %v2999_v36  ;;  %4299 = vmatpush2.bf16.msra.mxu0 %v8733_v32  ;;  %v8822_v34 = vld [vmem:[#allocation16 + $0x4c8] ss:$12 sps:$4 sm:$0xff]   ;;  %v8827_v19 = vld [vmem:[#allocation16 + $0x4b0] ss:$12 sps:$4 sm:$0xff]  }
 0x8f8   : > { %v3001_v45 = vpop.f32.mrf.mxu1  ;;  %v3043_v48 = vpop.f32.mrf.mxu0  ;;  %4300 = vmatprep.subr.bf16.mxu0 %v8738_v40  ;;  %v8829_v36 = vld [vmem:[#allocation16 + $0x4b4] ss:$12 sps:$4 sm:$0xff]  }
 0x8f9   : > { %5240 = vmatpush1.bf16.msra.mxu1 %v8769_v29  ;;  %v8832_v45 = vld [vmem:[#allocation16 + $0x498] ss:$12 sps:$4 sm:$0xff]  }
 0x8fa   : > { %v3002_v50 = vpop.f32.mrf.mxu1  ;;  %5241 = vmatprep.subr.bf16.mxu1 %v8774_v57 }
 0x8fb   : > { %4301 = vmatpush2.bf16.msra.mxu0 %v8736_v39  ;;  %v8834_v39 = vld [vmem:[#allocation16 + $0x49c] ss:$12 sps:$4 sm:$0xff]   ;;  %v8837_v50 = vld [vmem:[#allocation16 + $0x480] ss:$12 sps:$4 sm:$0xff]  }
 0x8fc   : > { %4302 = vmatprep.subr.bf16.mxu0 %v8741_v49  ;;  %v8839_v49 = vld [vmem:[#allocation16 + $0x484] ss:$12 sps:$4 sm:$0xff]  }
 0x8fd   : > { %5242 = vmatpush1.bf16.msra.mxu1 %v8772_v58 }
 0x8fe   : > { %5243 = vmatprep.subr.bf16.mxu1 %v8777_v63 }
 0x8ff   : > { %4303 = vmatpush2.bf16.msra.mxu0 %v8739_v51 }
 0x900   : > { %4304 = vmatprep.subr.bf16.mxu0 %v8744_v52 }
 0x901   : > { %5244 = vmatpush1.bf16.msra.mxu1 %v8775_v1 }
 0x902   : > { %5245 = vmatprep.subr.bf16.mxu1 %v8780_v5 }
 0x903   : > { %4305 = vmatpush2.bf16.msra.mxu0 %v8742_v55 }
 0x904   : > { %v10055_v61 = vpop.f32.mrf.mxu1  ;;  %4306 = vmatprep.subr.bf16.mxu0 %v8747_v56  ;;  %v8844_v56 = vld [vmem:[#allocation16 + $0x5ec] ss:$12 sps:$4 sm:$0xff]  }
 0x905   : > { %5246 = vmatpush2.bf16.msra.mxu1 %v8778_v38  ;;  %v8862_v38 = vld [vmem:[#allocation16 + $0x5a0] ss:$12 sps:$4 sm:$0xff]  }
 0x906   : > { %v10057_v2 = vpop.f32.mrf.mxu1  ;;  %5247 = vmatprep.subr.bf16.mxu1 %v8783_v8 }
 0x907   : > { %4307 = vmatpush2.bf16.msra.mxu0 %v8745_v60  ;;  %v8842_v60 = vld [vmem:[#allocation16 + $0x5e8] ss:$12 sps:$4 sm:$0xff]  }
 0x908   : > { %v3124_v4 = vpop.f32.mrf.mxu1  ;;  %4308 = vmatprep.subr.bf16.mxu0 %v8750_v62 }
 0x909   : > { %5248 = vmatpush2.bf16.msra.mxu1 %v8781_v9  ;;  %v8858_v4 = vld [vmem:[#allocation16 + $0x5bc] ss:$12 sps:$4 sm:$0xff]  }
 0x90a   : > { %v3125_v6 = vpop.f32.mrf.mxu1  ;;  %5249 = vmatprep.subr.bf16.mxu1 %v8786_v53  ;;  %v8876_v53 = vld [vmem:[#allocation16 + $0x574] ss:$12 sps:$4 sm:$0xff]  }
 0x90b   : > { %4309 = vmatpush2.bf16.msra.mxu0 %v8748_v42  ;;  %v8850_v42 = vld [vmem:[#allocation16 + $0x5d0] ss:$12 sps:$4 sm:$0xff]   ;;  %v8870_v6 = vld [vmem:[#allocation16 + $0x58c] ss:$12 sps:$4 sm:$0xff]  }
 0x90c   : > { %4310 = vmatprep.subr.bf16.mxu0 %v8753_v47  ;;  %v8864_v47 = vld [vmem:[#allocation16 + $0x5a4] ss:$12 sps:$4 sm:$0xff]  }
 0x90d   : > { %5250 = vmatpush2.bf16.msra.mxu1 %v8784_v10  ;;  %v8874_v10 = vld [vmem:[#allocation16 + $0x570] ss:$12 sps:$4 sm:$0xff]  }
 0x90e   : > { %5251 = vmatprep.subr.bf16.mxu1 %v8789_v11  ;;  %v8882_v11 = vld [vmem:[#allocation16 + $0x55c] ss:$12 sps:$4 sm:$0xff]  }
 0x90f   : > { %4311 = vmatpush2.bf16.msra.mxu0 %v8751_v7  ;;  %v8868_v7 = vld [vmem:[#allocation16 + $0x588] ss:$12 sps:$4 sm:$0xff]  }
 0x910   : > { %5270 = vmatprep.subr.bf16.mxu0 %v8804_v20 }
 0x911   : > { %5252 = vmatpush2.bf16.msra.mxu1 %v8787_v12  ;;  %v8880_v12 = vld [vmem:[#allocation16 + $0x558] ss:$12 sps:$4 sm:$0xff]  }
 0x912   : > { %4313 = vmatmul.mubr.bf16.vlgmr.msra.gmra.mxu0 %v10044_v3  ;;  %5253 = vmatprep.subr.bf16.mxu1 %v8792_v59  ;;  %v8799_v3 = vld [vmem:[#allocation16 + $0x3c0] ss:$12 sps:$4 sm:$0xff]   ;;  %v8888_v59 = vld [vmem:[#allocation16 + $0x544] ss:$12 sps:$4 sm:$0xff]  }
 0x913   : > { %5271 = vmatpush1.bf16.msra.mxu0 %v8802_v0 }
 0x914   : > { %5272 = vmatprep.subr.bf16.mxu0 %v8809_v22 }
 0x915   : > { %5254 = vmatpush2.bf16.msra.mxu1 %v8790_v13  ;;  %v8886_v13 = vld [vmem:[#allocation16 + $0x540] ss:$12 sps:$4 sm:$0xff]  }
 0x916   : > { %5255 = vmatprep.subr.bf16.mxu1 %v8795_v14  ;;  %v8892_v14 = vld [vmem:[#allocation16 + $0x5f0] ss:$12 sps:$4 sm:$0xff]  }
 0x917   : > { %5273 = vmatpush1.bf16.msra.mxu0 %v8807_v23  ;;  %v10074_v23 = vld [vmem:[#allocation22] sm:$0xf] }
 0x918   : > { %5274 = vmatprep.subr.bf16.mxu0 %v8814_v24 }
 0x919   : > { %5256 = vmatpush2.bf16.msra.mxu1 %v8793_v15 }
 0x91a   : > { %5257 = vmatprep.subr.bf16.mxu1 %v8798_v16 }
 0x91b   : > { %5275 = vmatpush1.bf16.msra.mxu0 %v8812_v25 }
 0x91c   : > { %5276 = vmatprep.subr.bf16.mxu0 %v8819_v27  ;;  %v4371_v27 = vrot.slane %v10074_v23, %v9948_v44 }
 0x91d   : > { %5258 = vmatpush2.bf16.msra.mxu1 %v8796_v17 }
 0x91e   : > { %5259 = vmatprep.subr.bf16.mxu1 %v8801_v18 }
 0x91f   : > { %5277 = vmatpush1.bf16.msra.mxu0 %v8817_v30 }
 0x920   : > { %5278 = vmatprep.subr.bf16.mxu0 %v8824_v33 }
 0x921   : > { %5260 = vmatpush2.bf16.msra.mxu1 %v8799_v3 }
 0x922   : > { %7880 = vmatprep.subr.bf16.mxu1 %v8805_v21 }
 0x923   : > { %5279 = vmatpush1.bf16.msra.mxu0 %v8822_v34 }
 0x924   : > { %5280 = vmatprep.subr.bf16.mxu0 %v8829_v36 }
 0x927   : > { %5281 = vmatpush1.bf16.msra.mxu0 %v8827_v19 }
 0x928   : > { %5282 = vmatprep.subr.bf16.mxu0 %v8834_v39 }
 0x92b   : > { %5283 = vmatpush1.bf16.msra.mxu0 %v8832_v45 }
 0x92c   : > { %5284 = vmatprep.subr.bf16.mxu0 %v8839_v49 }
 0x92f   : > { %5285 = vmatpush1.bf16.msra.mxu0 %v8837_v50 }
 0x930   : > { %5286 = vmatprep.subr.bf16.mxu0 %v8844_v56 }
 0x932   : > { %v3079_v26 = vpop.f32.mrf.mxu0 }
 0x933   : > { %v10061_v28 = vadd.f32 %v10055_v61, %v3079_v26  ;;  %5287 = vmatpush2.bf16.msra.mxu0 %v8842_v60 }
 0x934   : > { %v3081_v31 = vpop.f32.mrf.mxu0 }
 0x935   : > { %v10064_v41 = vadd.f32 %v10057_v2, %v3081_v31  ;;  %v8852_v2 = vld [vmem:[#allocation16 + $0x5d4] ss:$12 sps:$4 sm:$0xff]  }
 0x936   : > { %v3083_v32 = vpop.f32.mrf.mxu0  ;;  %5288 = vmatprep.subr.bf16.mxu0 %v8852_v2  ;;  %v8810_v2 = vld [vmem:[#allocation16 + $0x458] ss:$12 sps:$4 sm:$0xff]  }
 0x937   : > { %5289 = vmatpush2.bf16.msra.mxu0 %v8850_v42 }
 0x938   : > { %v3084_v40 = vpop.f32.mrf.mxu0  ;;  %5290 = vmatprep.subr.bf16.mxu0 %v8858_v4  ;;  %v8811_v4 = vld [vmem:[#allocation16 + $0x398] ss:$12 sps:$4 sm:$0xff]  }
 0x942   : > { %v3610_v48 = vpop.f32.mrf.mxu0 }
 0x944   : > { %v3569_v51 = vpop.f32.mrf.mxu1  ;;  %v3612_v52 = vpop.f32.mrf.mxu0 }
 0x945   : > { %v3570_v54 = vadd.f32 %v3569_v51, %v10051_v35  ;;  %v8856_v35 = vld [vmem:[#allocation16 + $0x5b8] ss:$12 sps:$4 sm:$0xff]  }
 0x946   : > { %v3571_v29 = vpop.f32.mrf.mxu1  ;;  %v3614_v55 = vpop.f32.mrf.mxu0  ;;  %5291 = vmatpush2.bf16.msra.mxu0 %v8856_v35  ;;  %v8815_v35 = vld [vmem:[#allocation16 + $0x440] ss:$12 sps:$4 sm:$0xff]  }
 0x947   : > { %v3611_v57 = vadd.f32 %v3610_v48, %v3570_v54  ;;  %v3572_v58 = vadd.f32 %v3571_v29, %v10053_v37  ;;  %5292 = vmatprep.subr.bf16.mxu0 %v8864_v47  ;;  %v8816_v47 = vld [vmem:[#allocation16 + $0x380] ss:$12 sps:$4 sm:$0xff]  }
 0x948   : > { %v3573_v61 = vpop.f32.mrf.mxu1  ;;  %v3615_v62 = vpop.f32.mrf.mxu0 }
 0x949   : > { %v3613_v63 = vadd.f32 %v3612_v52, %v3572_v58 }
 0x94a   : > { %v3574_v1 = vpop.f32.mrf.mxu1  ;;  %5293 = vmatpush2.bf16.msra.mxu0 %v8862_v38  ;;  %v8820_v38 = vld [vmem:[#allocation16 + $0x428] ss:$12 sps:$4 sm:$0xff]  }
 0x94b   : > { %5294 = vmatprep.subr.bf16.mxu0 %v8870_v6  ;;  %v8826_v6 = vld [vmem:[#allocation16 + $0x350] ss:$12 sps:$4 sm:$0xff]  }
 0x94e   : > { %5295 = vmatpush2.bf16.msra.mxu0 %v8868_v7  ;;  %v8830_v7 = vld [vmem:[#allocation16 + $0x3f8] ss:$12 sps:$4 sm:$0xff]  }
 0x94f   : > { %5296 = vmatprep.subr.bf16.mxu0 %v8876_v53  ;;  %v8836_v53 = vld [vmem:[#allocation16 + $0x320] ss:$12 sps:$4 sm:$0xff]  }
 0x952   : > { %5297 = vmatpush2.bf16.msra.mxu0 %v8874_v10  ;;  %v8840_v10 = vld [vmem:[#allocation16 + $0x3c8] ss:$12 sps:$4 sm:$0xff]  }
 0x953   : > { %5298 = vmatprep.subr.bf16.mxu0 %v8882_v11  ;;  %v8841_v11 = vld [vmem:[#allocation16 + $0x308] ss:$12 sps:$4 sm:$0xff]  }
 0x954   : > { %v3692_v5 = vpop.f32.mrf.mxu1 }
 0x956   : > { %v3694_v37 = vpop.f32.mrf.mxu1  ;;  %5299 = vmatpush2.bf16.msra.mxu0 %v8880_v12  ;;  %v8847_v12 = vld [vmem:[#allocation16 + $0xac] ss:$12 sps:$4 sm:$0xff]  }
 0x957   : > { %5300 = vmatprep.subr.bf16.mxu0 %v8888_v59 }
 0x958   : > { %v3696_v8 = vpop.f32.mrf.mxu1 }
 0x959   : > { %v8831_v8 = vld [vmem:[#allocation16 + $0x338] ss:$12 sps:$4 sm:$0xff]  }
 0x95a   : > { %v3697_v9 = vpop.f32.mrf.mxu1  ;;  %5301 = vmatpush2.bf16.msra.mxu0 %v8886_v13  ;;  %v8845_v13 = vld [vmem:[#allocation16 + $0xa8] ss:$12 sps:$4 sm:$0xff]  }
 0x95b   : > { %7902 = vmatprep.subr.bf16.mxu0 %v8892_v14  ;;  %v8835_v9 = vld [vmem:[#allocation16 + $0x3e0] ss:$12 sps:$4 sm:$0xff]  }
 0x95c   : > { %v8855_v14 = vld [vmem:[#allocation16 + $0x94] ss:$12 sps:$4 sm:$0xff]  }
 0x982   : > { %v3651_v15 = vpop.f32.mrf.mxu0 }
 0x983   : > { %v3652_v16 = vadd.f32 %v3651_v15, %v10061_v28 }
 0x984   : > { %v3653_v17 = vpop.f32.mrf.mxu0 }
 0x985   : > { %v10069_v18 = vadd.f32 %v3692_v5, %v3652_v16  ;;  %v3654_v3 = vadd.f32 %v3653_v17, %v10064_v41  ;;  %v4375_v41 = vrot.slane %v10074_v23, %v9951_v46  ;;  %v8821_v5 = vld [vmem:[#allocation16 + $0x368] ss:$12 sps:$4 sm:$0xff]   ;;  %v8853_v16 = vld [vmem:[#allocation16 + $0x90] ss:$12 sps:$4 sm:$0xff]  }
 0x986   : > { %v3655_v20 = vpop.f32.mrf.mxu0  ;;  %v8861_v17 = vld [vmem:[#allocation16 + $0x7c] ss:$12 sps:$4 sm:$0xff]  }
 0x987   : > { %v10072_v0 = vadd.f32 %v3694_v37, %v3654_v3  ;;  %v8825_v37 = vld [vmem:[#allocation16 + $0x410] ss:$12 sps:$4 sm:$0xff]   ;;  %v4378_v3 = vsub.s32 2, %v9945_v43  ;;  %v8859_v20 = vld [vmem:[#allocation16 + $0x78] ss:$12 sps:$4 sm:$0xff]  }
 0x988   : > { %v3656_v21 = vpop.f32.mrf.mxu0 }
 0x989   : > { %v8867_v21 = vld [vmem:[#allocation16 + $0x64] ss:$12 sps:$4 sm:$0xff]  }
 0x992   : > { %v4273_v22 = vpop.f32.mrf.mxu0 }
 0x994   : > { %v4232_v24 = vpop.f32.mrf.mxu1  ;;  %v4275_v25 = vpop.f32.mrf.mxu0 }
 0x995   : > { %v4274_v26 = vadd.f32 %v4273_v22, %v4232_v24  ;;  %v4382_v22 = vsub.s32 3, %v9945_v43 }
 0x996   : > { %v4234_v30 = vpop.f32.mrf.mxu1  ;;  %v4277_v28 = vpop.f32.mrf.mxu0 }
 0x997   : > { %v4362_v31 = vadd.f32 %v4274_v26, %v3611_v57  ;;  %v4276_v32 = vadd.f32 %v4275_v25, %v4234_v30  ;;  %v4379_v26 = vrot.slane %v10074_v23, %v4378_v3  ;;  %v8873_v28 = vld [vmem:[#allocation16 + $0x4c] ss:$12 sps:$4 sm:$0xff]  }
 0x998   : > { %v4236_v33 = vpop.f32.mrf.mxu1  ;;  %v4278_v34 = vpop.f32.mrf.mxu0 }
 0x999   : > { %v4388_v40 = vadd.f32 %v4371_v27, %v4362_v31  ;;  %v4363_v36 = vadd.f32 %v4276_v32, %v3613_v63  ;;  %v8806_v63 = vld [vmem:[#allocation16 + $0x3b0] ss:$12 sps:$4 sm:$0xff]   ;;  %v8865_v27 = vld [vmem:[#allocation16 + $0x60] ss:$12 sps:$4 sm:$0xff]  }
 0x99a   : > { %v4237_v19 = vpop.f32.mrf.mxu1 }
 0x99b   : > { %v4389_v39 = vadd.f32 %v4375_v41, %v4363_v36  ;;  %v4392_v45 = vmax.f32 %v4388_v40, 0.0  ;;  %v4383_v41 = vrot.slane %v10074_v23, %v4382_v22  ;;  %v8871_v36 = vld [vmem:[#allocation16 + $0x48] ss:$12 sps:$4 sm:$0xff]   ;;  %v8883_v23 = vld [vmem:[#allocation16 + $0x18] ss:$12 sps:$4 sm:$0xff]  }
 0x99c   : > { %v8919_v22 = vld [vmem:[#allocation16 + $0xf0] ss:$12 sps:$4 sm:$0xff]  }
 0x99d   : > { %v4393_v48 = vmax.f32 %v4389_v39, 0.0  ;;  %v9148_v50 = vpack.c.bf16 %v4392_v45, %v4392_v45  ;;  %v8879_v39 = vld [vmem:[#allocation16 + $0x34] ss:$12 sps:$4 sm:$0xff]  }
 0x99f   : > { %v7842_v49 = vpack.c.bf16 %v4393_v48, %v4392_v45  ;;  %v9149_v51 = vpack.c.bf16 %v4393_v48, %v4393_v48  ;;  %v4688_v54 = vshll.u32 %v9148_v50, 16  ;;  %v4686_v57 = vshrl.u32 %v9148_v50, 16  ;;  %v8877_v50 = vld [vmem:[#allocation16 + $0x30] ss:$12 sps:$4 sm:$0xff]  }
 0x9a1   : > { %4412 = vst [vmem:[#allocation5] sm:$0xff] %v7842_v49  ;;  %v4695_v52 = vshll.u32 %v9149_v51, 16  ;;  %v4693_v55 = vshrl.u32 %v9149_v51, 16  ;;  %v4690_v58 = vrot.slane %v4688_v54, 1 }
 0x9a3   : > { %v4697_v56 = vrot.slane %v4695_v52, 1  ;;  %v4691_v62 = vor.u32 %v4690_v58, %v4686_v57 }
 0x9a4   : > { %v4355_v29 = vpop.f32.mrf.mxu1 }
 0x9a5   : > { %v4698_v61 = vor.u32 %v4697_v56, %v4693_v55  ;;  %v8889_v56 = vld [vmem:[#allocation16] ss:$12 sps:$4 sm:$0xff]  }
 0x9a6   : > { %v10080_v60 = vpop.f32.mrf.mxu1 }
 0x9a7   : > { %5261 = vmatprep.mubr.bf16.mxu1 %v4698_v61 }
 0x9a8   : > { %v4359_v1 = vpop.f32.mrf.mxu1  ;;  %5262 = vmatmul.mubr.bf16.vlgmr.msra.gmra.mxu1 %v4691_v62  ;;  %v10082_v59 = vld [vmem:[#allocation5] sm:$0x77] }
 0x9a9   : > { %7881 = vmatpush3.bf16.msra.mxu1 %v8806_v63  ;;  %5343 = vmatprep.mubr.bf16.mxu1 %v4698_v61  ;;  %v10086_v15 = vcombine.high %v10082_v59, %v10082_v59 }
 0x9aa   : > { %v4360_v42 = vpop.f32.mrf.mxu1  ;;  %7882 = vmatprep.subr.bf16.mxu1 %v8810_v2  ;;  %v8893_v2 = vld [vmem:[#allocation16 + $0x530] ss:$12 sps:$4 sm:$0xff]  }
 0x9ab   : > { %v8897_v42 = vld [vmem:[#allocation16 + $0x5d8] ss:$12 sps:$4 sm:$0xff]  }
 0x9ad   : > { %7883 = vmatpush3.bf16.msra.mxu1 %v8811_v4  ;;  %v8894_v4 = vld [vmem:[#allocation16 + $0x168] ss:$12 sps:$4 sm:$0xff]  }
 0x9ae   : > { %7884 = vmatprep.subr.bf16.mxu1 %v8815_v35  ;;  %v8901_v35 = vld [vmem:[#allocation16 + $0x154] ss:$12 sps:$4 sm:$0xff]  }
 0x9b1   : > { %7885 = vmatpush3.bf16.msra.mxu1 %v8816_v47  ;;  %v8898_v47 = vld [vmem:[#allocation16 + $0x518] ss:$12 sps:$4 sm:$0xff]  }
 0x9b2   : > { %7886 = vmatprep.subr.bf16.mxu1 %v8820_v38  ;;  %v8902_v38 = vld [vmem:[#allocation16 + $0x5c0] ss:$12 sps:$4 sm:$0xff]  }
 0x9b5   : > { %7887 = vmatpush3.bf16.msra.mxu1 %v8821_v5  ;;  %v8899_v5 = vld [vmem:[#allocation16 + $0x150] ss:$12 sps:$4 sm:$0xff]  }
 0x9b6   : > { %7888 = vmatprep.subr.bf16.mxu1 %v8825_v37  ;;  %v8906_v37 = vld [vmem:[#allocation16 + $0x13c] ss:$12 sps:$4 sm:$0xff]  }
 0x9b9   : > { %7889 = vmatpush3.bf16.msra.mxu1 %v8826_v6  ;;  %v8903_v6 = vld [vmem:[#allocation16 + $0x500] ss:$12 sps:$4 sm:$0xff]  }
 0x9ba   : > { %7890 = vmatprep.subr.bf16.mxu1 %v8830_v7  ;;  %v8907_v7 = vld [vmem:[#allocation16 + $0x5a8] ss:$12 sps:$4 sm:$0xff]  }
 0x9bd   : > { %7891 = vmatpush3.bf16.msra.mxu1 %v8831_v8  ;;  %v8904_v8 = vld [vmem:[#allocation16 + $0x138] ss:$12 sps:$4 sm:$0xff]  }
 0x9be   : > { %7892 = vmatprep.subr.bf16.mxu1 %v8835_v9  ;;  %v8911_v9 = vld [vmem:[#allocation16 + $0x124] ss:$12 sps:$4 sm:$0xff]  }
 0x9c1   : > { %7893 = vmatpush3.bf16.msra.mxu1 %v8836_v53  ;;  %v8908_v53 = vld [vmem:[#allocation16 + $0x4e8] ss:$12 sps:$4 sm:$0xff]  }
 0x9c2   : > { %7894 = vmatprep.subr.bf16.mxu1 %v8840_v10  ;;  %v8912_v10 = vld [vmem:[#allocation16 + $0x590] ss:$12 sps:$4 sm:$0xff]  }
 0x9c5   : > { %7895 = vmatpush3.bf16.msra.mxu1 %v8841_v11  ;;  %v8909_v11 = vld [vmem:[#allocation16 + $0x120] ss:$12 sps:$4 sm:$0xff]  }
 0x9c6   : > { %5917 = vmatprep.subr.bf16.mxu1 %v8847_v12  ;;  %v8916_v12 = vld [vmem:[#allocation16 + $0x10c] ss:$12 sps:$4 sm:$0xff]  }
 0x9c8   : > { %5344 = vmatmul.mubr.bf16.vlgmr.msra.gmra.mxu1 %v4691_v62  ;;  %v8896_v62 = vld [vmem:[#allocation16 + $0x16c] ss:$12 sps:$4 sm:$0xff]  }
 0x9c9   : > { %5918 = vmatpush1.bf16.msra.mxu1 %v8845_v13  ;;  %5949 = vmatprep.mubr.bf16.mxu1 %v10086_v15  ;;  %v8913_v13 = vld [vmem:[#allocation16 + $0x4d0] ss:$12 sps:$4 sm:$0xff]  }
 0x9ca   : > { %5919 = vmatprep.subr.bf16.mxu1 %v8855_v14  ;;  %v8917_v14 = vld [vmem:[#allocation16 + $0x578] ss:$12 sps:$4 sm:$0xff]  }
 0x9cd   : > { %5920 = vmatpush1.bf16.msra.mxu1 %v8853_v16  ;;  %v8914_v16 = vld [vmem:[#allocation16 + $0x108] ss:$12 sps:$4 sm:$0xff]  }
 0x9ce   : > { %5921 = vmatprep.subr.bf16.mxu1 %v8861_v17  ;;  %v8921_v17 = vld [vmem:[#allocation16 + $0xf4] ss:$12 sps:$4 sm:$0xff]  }
 0x9d1   : > { %5922 = vmatpush1.bf16.msra.mxu1 %v8859_v20  ;;  %v8918_v20 = vld [vmem:[#allocation16 + $0x4b8] ss:$12 sps:$4 sm:$0xff]  }
 0x9d2   : > { %v4314_v24 = vpop.f32.mrf.mxu0  ;;  %5923 = vmatprep.subr.bf16.mxu1 %v8867_v21  ;;  %v8922_v21 = vld [vmem:[#allocation16 + $0x560] ss:$12 sps:$4 sm:$0xff]  }
 0x9d3   : > { %v4356_v25 = vadd.f32 %v4355_v29, %v4314_v24  ;;  %v8926_v24 = vld [vmem:[#allocation16 + $0xdc] ss:$12 sps:$4 sm:$0xff]  }
 0x9d4   : > { %v4316_v30 = vpop.f32.mrf.mxu0 }
 0x9d5   : > { %v4364_v31 = vadd.f32 %v4356_v25, %v10069_v18  ;;  %v4358_v32 = vadd.f32 %v10080_v60, %v4316_v30  ;;  %5924 = vmatpush1.bf16.msra.mxu1 %v8865_v27  ;;  %v8885_v18 = vld [vmem:[#allocation16 + $0x1c] ss:$12 sps:$4 sm:$0xff]   ;;  %v8923_v25 = vld [vmem:[#allocation16 + $0x4a0] ss:$12 sps:$4 sm:$0xff]   ;;  %v8924_v27 = vld [vmem:[#allocation16 + $0xd8] ss:$12 sps:$4 sm:$0xff]  }
 0x9d6   : > { %v4318_v33 = vpop.f32.mrf.mxu0  ;;  %5925 = vmatprep.subr.bf16.mxu1 %v8873_v28  ;;  %v8931_v30 = vld [vmem:[#allocation16 + $0xc4] ss:$12 sps:$4 sm:$0xff]   ;;  %v8928_v28 = vld [vmem:[#allocation16 + $0x488] ss:$12 sps:$4 sm:$0xff]  }
 0x9d7   : > { %v4390_v34 = vadd.f32 %v4379_v26, %v4364_v31  ;;  %v4365_v40 = vadd.f32 %v4358_v32, %v10072_v0  ;;  %v8891_v0 = vld [vmem:[#allocation16 + $0x4] ss:$12 sps:$4 sm:$0xff]   ;;  %v8927_v26 = vld [vmem:[#allocation16 + $0x548] ss:$12 sps:$4 sm:$0xff]   ;;  %v8934_v31 = vld [vmem:[#allocation16 + $0x22c] ss:$12 sps:$4 sm:$0xff]  }
 0x9d8   : > { %v4319_v19 = vpop.f32.mrf.mxu0  ;;  %v8929_v32 = vld [vmem:[#allocation16 + $0xc0] ss:$12 sps:$4 sm:$0xff]   ;;  %v8937_v33 = vld [vmem:[#allocation16 + $0x170] ss:$12 sps:$4 sm:$0xff]  }
 0x9d9   : > { %v4391_v45 = vadd.f32 %v4383_v41, %v4365_v40  ;;  %v4394_v48 = vmax.f32 %v4390_v34, 0.0  ;;  %5926 = vmatpush1.bf16.msra.mxu1 %v8871_v36  ;;  %v8932_v34 = vld [vmem:[#allocation16 + $0x228] ss:$12 sps:$4 sm:$0xff]   ;;  %v8938_v19 = vld [vmem:[#allocation16 + $0xb0] ss:$12 sps:$4 sm:$0xff]  }
 0x9da   : > { %5927 = vmatprep.subr.bf16.mxu1 %v8879_v39  ;;  %v8941_v40 = vld [vmem:[#allocation16 + $0x214] ss:$12 sps:$4 sm:$0xff]   ;;  %v10109_v39 = vcombine.low %v10082_v59, %v10082_v59  ;;  %v8944_v59 = vld [vmem:[#allocation16 + $0x1f8] ss:$12 sps:$4 sm:$0xff]  }
 0x9db   : > { %v4395_v49 = vmax.f32 %v4391_v45, 0.0  ;;  %v9150_v52 = vpack.c.bf16 %v4394_v48, %v4394_v48  ;;  %v8942_v45 = vld [vmem:[#allocation16 + $0x158] ss:$12 sps:$4 sm:$0xff]  }
 0x9dd   : > { %v7843_v51 = vpack.c.bf16 %v4395_v49, %v4394_v48  ;;  %5928 = vmatpush1.bf16.msra.mxu1 %v8877_v50  ;;  %v9151_v54 = vpack.c.bf16 %v4395_v49, %v4395_v49  ;;  %v4702_v55 = vshll.u32 %v9150_v52, 16  ;;  %v4700_v60 = vshrl.u32 %v9150_v52, 16  ;;  %v8939_v48 = vld [vmem:[#allocation16 + $0x210] ss:$12 sps:$4 sm:$0xff]   ;;  %v8943_v50 = vld [vmem:[#allocation16 + $0x98] ss:$12 sps:$4 sm:$0xff]  }
 0x9de   : > { %5929 = vmatprep.subr.bf16.mxu1 %v8885_v18  ;;  %v8946_v49 = vld [vmem:[#allocation16 + $0x1fc] ss:$12 sps:$4 sm:$0xff]   ;;  %v8947_v18 = vld [vmem:[#allocation16 + $0x140] ss:$12 sps:$4 sm:$0xff]  }
 0x9df   : > { %4413 = vst [vmem:[#allocation5 + $0x8] sm:$0xff] %v7843_v51  ;;  %v4709_v29 = vshll.u32 %v9151_v54, 16  ;;  %v4707_v57 = vshrl.u32 %v9151_v54, 16  ;;  %v4704_v61 = vrot.slane %v4702_v55, 1  ;;  %v8951_v51 = vld [vmem:[#allocation16 + $0x1e4] ss:$12 sps:$4 sm:$0xff]  }
 0x9e0   : > { %v8952_v52 = vld [vmem:[#allocation16 + $0x128] ss:$12 sps:$4 sm:$0xff]   ;;  %v8949_v54 = vld [vmem:[#allocation16 + $0x1e0] ss:$12 sps:$4 sm:$0xff]   ;;  %v8957_v55 = vld [vmem:[#allocation16 + $0x110] ss:$12 sps:$4 sm:$0xff]  }
 0x9e1   : > { %5930 = vmatpush1.bf16.msra.mxu1 %v8883_v23  ;;  %v4711_v58 = vrot.slane %v4709_v29, 1  ;;  %v10098_v1 = vor.u32 %v4704_v61, %v4700_v60  ;;  %v8948_v23 = vld [vmem:[#allocation16 + $0x80] ss:$12 sps:$4 sm:$0xff]   ;;  %v8953_v29 = vld [vmem:[#allocation16 + $0x68] ss:$12 sps:$4 sm:$0xff]  }
 0x9e2   : > { %5931 = vmatprep.subr.bf16.mxu1 %v8891_v0  ;;  %v8956_v0 = vld [vmem:[#allocation16 + $0x1cc] ss:$12 sps:$4 sm:$0xff]   ;;  %v8959_v60 = vld [vmem:[#allocation16 + $0x1b0] ss:$12 sps:$4 sm:$0xff]  }
 0x9e3   : > { %v4712_v63 = vor.u32 %v4711_v58, %v4707_v57  ;;  %v8958_v57 = vld [vmem:[#allocation16 + $0x50] ss:$12 sps:$4 sm:$0xff]   ;;  %v8962_v58 = vld [vmem:[#allocation16 + $0xf8] ss:$12 sps:$4 sm:$0xff]  }
 0x9e4   : > { %v8966_v61 = vld [vmem:[#allocation16 + $0x19c] ss:$12 sps:$4 sm:$0xff]  }
 0x9e5   : > { %5932 = vmatpush1.bf16.msra.mxu1 %v8889_v56  ;;  %5302 = vmatprep.mubr.bf16.mxu0 %v4712_v63  ;;  %v8961_v56 = vld [vmem:[#allocation16 + $0x1b4] ss:$12 sps:$4 sm:$0xff]  }
 0x9e6   : > { %5303 = vmatmul.mubr.bf16.vlgmr.msra.gmra.mxu0 %v10098_v1  ;;  %5933 = vmatprep.subr.bf16.mxu1 %v8896_v62  ;;  %v10101_v41 = vld [vmem:[#allocation5 + $0x8] sm:$0x77] }
 0x9e7   : > { %7903 = vmatpush3.bf16.msra.mxu0 %v8893_v2  ;;  %5383 = vmatprep.mubr.bf16.mxu0 %v4712_v63  ;;  %v10105_v36 = vcombine.high %v10101_v41, %v10101_v41  ;;  %v8963_v62 = vld [vmem:[#allocation16 + $0x38] ss:$12 sps:$4 sm:$0xff]   ;;  %v8967_v63 = vld [vmem:[#allocation16 + $0xe0] ss:$12 sps:$4 sm:$0xff]  }
 0x9e8   : > { %7904 = vmatprep.subr.bf16.mxu0 %v8897_v42  ;;  %v8971_v2 = vld [vmem:[#allocation16 + $0x184] ss:$12 sps:$4 sm:$0xff]   ;;  %v8968_v42 = vld [vmem:[#allocation16 + $0x20] ss:$12 sps:$4 sm:$0xff]  }
 0x9e9   : > { %5934 = vmatpush2.bf16.msra.mxu1 %v8894_v4  ;;  %v8972_v4 = vld [vmem:[#allocation16 + $0xc8] ss:$12 sps:$4 sm:$0xff]  }
 0x9ea   : > { %5935 = vmatprep.subr.bf16.mxu1 %v8901_v35  ;;  %v8969_v35 = vld [vmem:[#allocation16 + $0x180] ss:$12 sps:$4 sm:$0xff]  }
 0x9eb   : > { %7905 = vmatpush3.bf16.msra.mxu0 %v8898_v47  ;;  %v8976_v47 = vld [vmem:[#allocation16 + $0x2ec] ss:$12 sps:$4 sm:$0xff]  }
 0x9ec   : > { %7906 = vmatprep.subr.bf16.mxu0 %v8902_v38  ;;  %v10115_v38 = vld [vmem:[#allocation5] sm:$0xee] }
 0x9ed   : > { %5936 = vmatpush2.bf16.msra.mxu1 %v8899_v5  ;;  %v8973_v5 = vld [vmem:[#allocation16 + $0x8] ss:$12 sps:$4 sm:$0xff]  }
 0x9ee   : > { %5937 = vmatprep.subr.bf16.mxu1 %v8906_v37  ;;  %v8979_v37 = vld [vmem:[#allocation16 + $0x6ac] ss:$12 sps:$4 sm:$0xff]  }
 0x9ef   : > { %7907 = vmatpush3.bf16.msra.mxu0 %v8903_v6  ;;  %v8974_v6 = vld [vmem:[#allocation16 + $0x2e8] ss:$12 sps:$4 sm:$0xff]  }
 0x9f0   : > { %7908 = vmatprep.subr.bf16.mxu0 %v8907_v7  ;;  %v7737_v7 = vcombine.high %v10115_v38, %v10115_v38 }
 0x9f1   : > { %5938 = vmatpush2.bf16.msra.mxu1 %v8904_v8  ;;  %v8984_v8 = vld [vmem:[#allocation16 + $0x2d4] ss:$12 sps:$4 sm:$0xff]  }
 0x9f2   : > { %5939 = vmatprep.subr.bf16.mxu1 %v8911_v9  ;;  %v8977_v9 = vld [vmem:[#allocation16 + $0x6a8] ss:$12 sps:$4 sm:$0xff]  }
 0x9f3   : > { %7909 = vmatpush3.bf16.msra.mxu0 %v8908_v53  ;;  %v8987_v53 = vld [vmem:[#allocation16 + $0x694] ss:$12 sps:$4 sm:$0xff]  }
 0x9f4   : > { %7910 = vmatprep.subr.bf16.mxu0 %v8912_v10  ;;  %v10119_v10 = vrot.slane %v7737_v7, 1  ;;  %v9059_v7 = vld [vmem:[#allocation16 + $0x248] ss:$12 sps:$4 sm:$0xff]  }
 0x9f5   : > { %5940 = vmatpush2.bf16.msra.mxu1 %v8909_v11  ;;  %v8982_v11 = vld [vmem:[#allocation16 + $0x2d0] ss:$12 sps:$4 sm:$0xff]  }
 0x9f6   : > { %5941 = vmatprep.subr.bf16.mxu1 %v8916_v12  ;;  %v8990_v12 = vld [vmem:[#allocation16 + $0x2bc] ss:$12 sps:$4 sm:$0xff]  }
 0x9f7   : > { %7911 = vmatpush3.bf16.msra.mxu0 %v8913_v13  ;;  %v8985_v13 = vld [vmem:[#allocation16 + $0x690] ss:$12 sps:$4 sm:$0xff]  }
 0x9f8   : > { %7912 = vmatprep.subr.bf16.mxu0 %v8917_v14  ;;  %v8993_v14 = vld [vmem:[#allocation16 + $0x67c] ss:$12 sps:$4 sm:$0xff]  }
 0x9f9   : > { %5942 = vmatpush2.bf16.msra.mxu1 %v8914_v16  ;;  %v8988_v16 = vld [vmem:[#allocation16 + $0x2b8] ss:$12 sps:$4 sm:$0xff]  }
 0x9fa   : > { %5943 = vmatprep.subr.bf16.mxu1 %v8921_v17  ;;  %v8996_v17 = vld [vmem:[#allocation16 + $0x2a4] ss:$12 sps:$4 sm:$0xff]  }
 0x9fb   : > { %7913 = vmatpush3.bf16.msra.mxu0 %v8918_v20  ;;  %v8991_v20 = vld [vmem:[#allocation16 + $0x678] ss:$12 sps:$4 sm:$0xff]  }
 0x9fc   : > { %7914 = vmatprep.subr.bf16.mxu0 %v8922_v21  ;;  %v8999_v21 = vld [vmem:[#allocation16 + $0x664] ss:$12 sps:$4 sm:$0xff]  }
 0x9fd   : > { %5944 = vmatpush2.bf16.msra.mxu1 %v8919_v22  ;;  %v8994_v22 = vld [vmem:[#allocation16 + $0x2a0] ss:$12 sps:$4 sm:$0xff]  }
 0x9fe   : > { %5945 = vmatprep.subr.bf16.mxu1 %v8926_v24  ;;  %v9002_v24 = vld [vmem:[#allocation16 + $0x28c] ss:$12 sps:$4 sm:$0xff]  }
 0x9ff   : > { %7915 = vmatpush3.bf16.msra.mxu0 %v8923_v25  ;;  %v8997_v25 = vld [vmem:[#allocation16 + $0x660] ss:$12 sps:$4 sm:$0xff]  }
 0xa00   : > { %7916 = vmatprep.subr.bf16.mxu0 %v8927_v26  ;;  %v9005_v26 = vld [vmem:[#allocation16 + $0x64c] ss:$12 sps:$4 sm:$0xff]  }
 0xa01   : > { %5946 = vmatpush2.bf16.msra.mxu1 %v8924_v27  ;;  %v9000_v27 = vld [vmem:[#allocation16 + $0x288] ss:$12 sps:$4 sm:$0xff]  }
 0xa02   : > { %5947 = vmatprep.subr.bf16.mxu1 %v8931_v30  ;;  %v9008_v30 = vld [vmem:[#allocation16 + $0x274] ss:$12 sps:$4 sm:$0xff]  }
 0xa03   : > { %7917 = vmatpush3.bf16.msra.mxu0 %v8928_v28  ;;  %v9003_v28 = vld [vmem:[#allocation16 + $0x648] ss:$12 sps:$4 sm:$0xff]  }
 0xa04   : > { %5958 = vmatprep.subr.bf16.mxu0 %v8934_v31  ;;  %v9011_v31 = vld [vmem:[#allocation16 + $0x634] ss:$12 sps:$4 sm:$0xff]  }
 0xa05   : > { %5948 = vmatpush2.bf16.msra.mxu1 %v8929_v32  ;;  %v9006_v32 = vld [vmem:[#allocation16 + $0x270] ss:$12 sps:$4 sm:$0xff]  }
 0xa06   : > { %5384 = vmatmul.mubr.bf16.vlgmr.msra.gmra.mxu0 %v10098_v1  ;;  %7924 = vmatprep.subr.bf16.mxu1 %v8937_v33  ;;  %v8964_v1 = vld [vmem:[#allocation16 + $0x198] ss:$12 sps:$4 sm:$0xff]   ;;  %v9014_v33 = vld [vmem:[#allocation16 + $0x25c] ss:$12 sps:$4 sm:$0xff]  }
 0xa07   : > { %5959 = vmatpush1.bf16.msra.mxu0 %v8932_v34  ;;  %5990 = vmatprep.mubr.bf16.mxu0 %v10105_v36  ;;  %v9009_v34 = vld [vmem:[#allocation16 + $0x630] ss:$12 sps:$4 sm:$0xff]  }
 0xa08   : > { %5950 = vmatmul.mubr.bf16.vlgmr.msra.gmra.mxu1 %v10109_v39  ;;  %5960 = vmatprep.subr.bf16.mxu0 %v8941_v40  ;;  %v9017_v40 = vld [vmem:[#allocation16 + $0x61c] ss:$12 sps:$4 sm:$0xff]  }
 0xa09   : > { %7925 = vmatpush3.bf16.msra.mxu1 %v8938_v19  ;;  %6031 = vmatprep.mubr.bf16.mxu1 %v10086_v15  ;;  %v8954_v15 = vld [vmem:[#allocation16 + $0x1c8] ss:$12 sps:$4 sm:$0xff]   ;;  %v9012_v19 = vld [vmem:[#allocation16 + $0x258] ss:$12 sps:$4 sm:$0xff]  }
 0xa0a   : > { %7926 = vmatprep.subr.bf16.mxu1 %v8942_v45  ;;  %v9015_v45 = vld [vmem:[#allocation16 + $0x618] ss:$12 sps:$4 sm:$0xff]  }
 0xa0b   : > { %5961 = vmatpush1.bf16.msra.mxu0 %v8939_v48  ;;  %v9023_v48 = vld [vmem:[#allocation16 + $0x604] ss:$12 sps:$4 sm:$0xff]  }
 0xa0c   : > { %5962 = vmatprep.subr.bf16.mxu0 %v8946_v49  ;;  %v9018_v49 = vld [vmem:[#allocation16 + $0x240] ss:$12 sps:$4 sm:$0xff]  }
 0xa0d   : > { %7927 = vmatpush3.bf16.msra.mxu1 %v8943_v50  ;;  %v9024_v50 = vld [vmem:[#allocation16 + $0x2f0] ss:$12 sps:$4 sm:$0xff]  }
 0xa0e   : > { %7928 = vmatprep.subr.bf16.mxu1 %v8947_v18  ;;  %v9021_v18 = vld [vmem:[#allocation16 + $0x600] ss:$12 sps:$4 sm:$0xff]  }
 0xa0f   : > { %5963 = vmatpush1.bf16.msra.mxu0 %v8944_v59  ;;  %v9028_v59 = vld [vmem:[#allocation16 + $0x76c] ss:$12 sps:$4 sm:$0xff]  }
 0xa10   : > { %5964 = vmatprep.subr.bf16.mxu0 %v8951_v51  ;;  %v9025_v51 = vld [vmem:[#allocation16 + $0x230] ss:$12 sps:$4 sm:$0xff]  }
 0xa11   : > { %7929 = vmatpush3.bf16.msra.mxu1 %v8948_v23  ;;  %v10125_v23 = vcombine.low %v10101_v41, %v10101_v41  ;;  %v9035_v41 = vld [vmem:[#allocation16 + $0x200] ss:$12 sps:$4 sm:$0xff]  }
 0xa12   : > { %7930 = vmatprep.subr.bf16.mxu1 %v8952_v52  ;;  %v9029_v52 = vld [vmem:[#allocation16 + $0x2d8] ss:$12 sps:$4 sm:$0xff]  }
 0xa13   : > { %5965 = vmatpush1.bf16.msra.mxu0 %v8949_v54  ;;  %v9026_v54 = vld [vmem:[#allocation16 + $0x768] ss:$12 sps:$4 sm:$0xff]  }
 0xa14   : > { %5966 = vmatprep.subr.bf16.mxu0 %v8956_v0  ;;  %v9033_v0 = vld [vmem:[#allocation16 + $0x754] ss:$12 sps:$4 sm:$0xff]  }
 0xa15   : > { %7931 = vmatpush3.bf16.msra.mxu1 %v8953_v29  ;;  %v9030_v29 = vld [vmem:[#allocation16 + $0x218] ss:$12 sps:$4 sm:$0xff]  }
 0xa16   : > { %7932 = vmatprep.subr.bf16.mxu1 %v8957_v55  ;;  %v9034_v55 = vld [vmem:[#allocation16 + $0x2c0] ss:$12 sps:$4 sm:$0xff]  }
 0xa17   : > { %5967 = vmatpush1.bf16.msra.mxu0 %v8954_v15  ;;  %v9031_v15 = vld [vmem:[#allocation16 + $0x750] ss:$12 sps:$4 sm:$0xff]  }
 0xa18   : > { %5968 = vmatprep.subr.bf16.mxu0 %v8961_v56  ;;  %v9038_v56 = vld [vmem:[#allocation16 + $0x73c] ss:$12 sps:$4 sm:$0xff]  }
 0xa19   : > { %7933 = vmatpush3.bf16.msra.mxu1 %v8958_v57  ;;  %v9039_v57 = vld [vmem:[#allocation16 + $0x2a8] ss:$12 sps:$4 sm:$0xff]  }
 0xa1a   : > { %7934 = vmatprep.subr.bf16.mxu1 %v8962_v58  ;;  %v9036_v58 = vld [vmem:[#allocation16 + $0x738] ss:$12 sps:$4 sm:$0xff]  }
 0xa1b   : > { %5969 = vmatpush1.bf16.msra.mxu0 %v8959_v60  ;;  %v9043_v60 = vld [vmem:[#allocation16 + $0x724] ss:$12 sps:$4 sm:$0xff]  }
 0xa1c   : > { %5970 = vmatprep.subr.bf16.mxu0 %v8966_v61  ;;  %v9040_v61 = vld [vmem:[#allocation16 + $0x1e8] ss:$12 sps:$4 sm:$0xff]  }
 0xa1d   : > { %7935 = vmatpush3.bf16.msra.mxu1 %v8963_v62  ;;  %v9044_v62 = vld [vmem:[#allocation16 + $0x290] ss:$12 sps:$4 sm:$0xff]  }
 0xa1e   : > { %7936 = vmatprep.subr.bf16.mxu1 %v8967_v63  ;;  %v9048_v63 = vld [vmem:[#allocation16 + $0x70c] ss:$12 sps:$4 sm:$0xff]  }
 0xa1f   : > { %5971 = vmatpush1.bf16.msra.mxu0 %v8964_v1  ;;  %v9045_v1 = vld [vmem:[#allocation16 + $0x1d0] ss:$12 sps:$4 sm:$0xff]  }
 0xa20   : > { %5972 = vmatprep.subr.bf16.mxu0 %v8971_v2  ;;  %v9049_v2 = vld [vmem:[#allocation16 + $0x278] ss:$12 sps:$4 sm:$0xff]  }
 0xa21   : > { %7937 = vmatpush3.bf16.msra.mxu1 %v8968_v42  ;;  %v9046_v42 = vld [vmem:[#allocation16 + $0x708] ss:$12 sps:$4 sm:$0xff]  }
 0xa22   : > { %7938 = vmatprep.subr.bf16.mxu1 %v8972_v4  ;;  %v9053_v4 = vld [vmem:[#allocation16 + $0x6f4] ss:$12 sps:$4 sm:$0xff]  }
 0xa23   : > { %5973 = vmatpush1.bf16.msra.mxu0 %v8969_v35  ;;  %v9050_v35 = vld [vmem:[#allocation16 + $0x1b8] ss:$12 sps:$4 sm:$0xff]  }
 0xa24   : > { %5974 = vmatprep.subr.bf16.mxu0 %v8976_v47  ;;  %v9054_v47 = vld [vmem:[#allocation16 + $0x260] ss:$12 sps:$4 sm:$0xff]  }
 0xa25   : > { %7939 = vmatpush3.bf16.msra.mxu1 %v8973_v5  ;;  %v9051_v5 = vld [vmem:[#allocation16 + $0x6f0] ss:$12 sps:$4 sm:$0xff]  }
 0xa26   : > { %6740 = vmatprep.subr.bf16.mxu1 %v8979_v37  ;;  %v9058_v37 = vld [vmem:[#allocation16 + $0x6dc] ss:$12 sps:$4 sm:$0xff]  }
 0xa27   : > { %5975 = vmatpush2.bf16.msra.mxu0 %v8974_v6  ;;  %v9055_v6 = vld [vmem:[#allocation16 + $0x1a0] ss:$12 sps:$4 sm:$0xff]  }
 0xa28   : > { %6032 = vmatmul.mubr.bf16.vlgmr.msra.gmra.mxu1 %v10109_v39  ;;  %5976 = vmatprep.subr.bf16.mxu0 %v8984_v8  ;;  %v9020_v39 = vld [vmem:[#allocation16 + $0x244] ss:$12 sps:$4 sm:$0xff]  }
 0xa29   : > { %6741 = vmatpush1.bf16.msra.mxu1 %v8977_v9  ;;  %6772 = vmatprep.mubr.bf16.mxu1 %v10119_v10  ;;  %v9056_v8 = vld [vmem:[#allocation16 + $0x6d8] ss:$12 sps:$4 sm:$0xff]  }
 0xa2a   : > { %6742 = vmatprep.subr.bf16.mxu1 %v8987_v53  ;;  %v9063_v9 = vld [vmem:[#allocation16 + $0x6c4] ss:$12 sps:$4 sm:$0xff]  }
 0xa2b   : > { %5977 = vmatpush2.bf16.msra.mxu0 %v8982_v11  ;;  %v10129_v53 = vld [vmem:[#allocation5 + $0x8] sm:$0xee]  ;;  %v9060_v11 = vld [vmem:[#allocation16 + $0x188] ss:$12 sps:$4 sm:$0xff]  }
 0xa2c   : > { %5978 = vmatprep.subr.bf16.mxu0 %v8990_v12  ;;  %v9066_v12 = vld [vmem:[#allocation16 + $0x82c] ss:$12 sps:$4 sm:$0xff]  }
 0xa2d   : > { %6743 = vmatpush1.bf16.msra.mxu1 %v8985_v13  ;;  %v9061_v13 = vld [vmem:[#allocation16 + $0x6c0] ss:$12 sps:$4 sm:$0xff]  }
 0xa2e   : > { %6744 = vmatprep.subr.bf16.mxu1 %v8993_v14  ;;  %v7739_v14 = vcombine.high %v10129_v53, %v10129_v53 }
 0xa2f   : > { %5979 = vmatpush2.bf16.msra.mxu0 %v8988_v16  ;;  %v7736_v16 = vcombine.low %v10115_v38, %v10115_v38  ;;  %v9071_v38 = vld [vmem:[#allocation16 + $0x810] ss:$12 sps:$4 sm:$0xff]  }
 0xa30   : > { %5980 = vmatprep.subr.bf16.mxu0 %v8996_v17  ;;  %v9069_v17 = vld [vmem:[#allocation16 + $0x770] ss:$12 sps:$4 sm:$0xff]  }
 0xa31   : > { %6745 = vmatpush1.bf16.msra.mxu1 %v8991_v20  ;;  %v9064_v20 = vld [vmem:[#allocation16 + $0x828] ss:$12 sps:$4 sm:$0xff]  }
 0xa32   : > { %6746 = vmatprep.subr.bf16.mxu1 %v8999_v21  ;;  %v9073_v21 = vld [vmem:[#allocation16 + $0x814] ss:$12 sps:$4 sm:$0xff]  }
 0xa33   : > { %5981 = vmatpush2.bf16.msra.mxu0 %v8994_v22  ;;  %v10135_v22 = vrot.slane %v7739_v14, 1  ;;  %v9127_v14 = vld [vmem:[#allocation16 + $0x840] ss:$12 sps:$4 sm:$0xff]  }
 0xa34   : > { %5982 = vmatprep.subr.bf16.mxu0 %v9002_v24  ;;  %v9070_v24 = vld [vmem:[#allocation16 + $0x6b0] ss:$12 sps:$4 sm:$0xff]  }
 0xa35   : > { %6747 = vmatpush1.bf16.msra.mxu1 %v8997_v25  ;;  %v10137_v25 = vrot.slane %v7736_v16, 1  ;;  %v7738_v16 = vcombine.low %v10129_v53, %v10129_v53 }
 0xa36   : > { %6748 = vmatprep.subr.bf16.mxu1 %v9005_v26  ;;  %v9074_v26 = vld [vmem:[#allocation16 + $0x758] ss:$12 sps:$4 sm:$0xff]  }
 0xa37   : > { %5983 = vmatpush2.bf16.msra.mxu0 %v9000_v27 }
 0xa38   : > { %5984 = vmatprep.subr.bf16.mxu0 %v9008_v30  ;;  %v9078_v30 = vld [vmem:[#allocation16 + $0x7fc] ss:$12 sps:$4 sm:$0xff]  }
 0xa39   : > { %6749 = vmatpush1.bf16.msra.mxu1 %v9003_v28  ;;  %v9075_v28 = vld [vmem:[#allocation16 + $0x698] ss:$12 sps:$4 sm:$0xff]  }
 0xa3a   : > { %6750 = vmatprep.subr.bf16.mxu1 %v9011_v31 }
 0xa3b   : > { %5985 = vmatpush2.bf16.msra.mxu0 %v9006_v32  ;;  %v9079_v32 = vld [vmem:[#allocation16 + $0x740] ss:$12 sps:$4 sm:$0xff]  }
 0xa3c   : > { %5986 = vmatprep.subr.bf16.mxu0 %v9014_v33  ;;  %v9076_v33 = vld [vmem:[#allocation16 + $0x7f8] ss:$12 sps:$4 sm:$0xff]  }
 0xa3d   : > { %6751 = vmatpush1.bf16.msra.mxu1 %v9009_v34 }
 0xa3e   : > { %6752 = vmatprep.subr.bf16.mxu1 %v9017_v40  ;;  %v9083_v40 = vld [vmem:[#allocation16 + $0x7e4] ss:$12 sps:$4 sm:$0xff]  }
 0xa3f   : > { %5987 = vmatpush2.bf16.msra.mxu0 %v9012_v19  ;;  %v9080_v19 = vld [vmem:[#allocation16 + $0x680] ss:$12 sps:$4 sm:$0xff]  }
 0xa40   : > { %5988 = vmatprep.subr.bf16.mxu0 %v9020_v39 }
 0xa41   : > { %6753 = vmatpush1.bf16.msra.mxu1 %v9015_v45  ;;  %v9084_v45 = vld [vmem:[#allocation16 + $0x728] ss:$12 sps:$4 sm:$0xff]  }
 0xa42   : > { %6754 = vmatprep.subr.bf16.mxu1 %v9023_v48  ;;  %v9081_v48 = vld [vmem:[#allocation16 + $0x7e0] ss:$12 sps:$4 sm:$0xff]  }
 0xa43   : > { %5989 = vmatpush2.bf16.msra.mxu0 %v9018_v49  ;;  %v9088_v49 = vld [vmem:[#allocation16 + $0x7cc] ss:$12 sps:$4 sm:$0xff]  }
 0xa44   : > { %7946 = vmatprep.subr.bf16.mxu0 %v9024_v50  ;;  %v9089_v50 = vld [vmem:[#allocation16 + $0x710] ss:$12 sps:$4 sm:$0xff]  }
 0xa45   : > { %6755 = vmatpush1.bf16.msra.mxu1 %v9021_v18  ;;  %v9086_v18 = vld [vmem:[#allocation16 + $0x7c8] ss:$12 sps:$4 sm:$0xff]  }
 0xa46   : > { %5991 = vmatmul.mubr.bf16.vlgmr.msra.gmra.mxu0 %v10125_v23  ;;  %6756 = vmatprep.subr.bf16.mxu1 %v9028_v59  ;;  %v9093_v59 = vld [vmem:[#allocation16 + $0x7b4] ss:$12 sps:$4 sm:$0xff]  }
 0xa47   : > { %7947 = vmatpush3.bf16.msra.mxu0 %v9025_v51  ;;  %6071 = vmatprep.mubr.bf16.mxu0 %v10105_v36  ;;  %v9041_v36 = vld [vmem:[#allocation16 + $0x720] ss:$12 sps:$4 sm:$0xff]   ;;  %v9090_v51 = vld [vmem:[#allocation16 + $0x650] ss:$12 sps:$4 sm:$0xff]  }
 0xa48   : > { %7948 = vmatprep.subr.bf16.mxu0 %v9029_v52  ;;  %v9091_v52 = vld [vmem:[#allocation16 + $0x7b0] ss:$12 sps:$4 sm:$0xff]  }
 0xa49   : > { %6757 = vmatpush2.bf16.msra.mxu1 %v9026_v54  ;;  %v9098_v54 = vld [vmem:[#allocation16 + $0x79c] ss:$12 sps:$4 sm:$0xff]  }
 0xa4a   : > { %6758 = vmatprep.subr.bf16.mxu1 %v9033_v0  ;;  %v9095_v0 = vld [vmem:[#allocation16 + $0x638] ss:$12 sps:$4 sm:$0xff]  }
 0xa4b   : > { %7949 = vmatpush3.bf16.msra.mxu0 %v9030_v29  ;;  %v9099_v29 = vld [vmem:[#allocation16 + $0x6e0] ss:$12 sps:$4 sm:$0xff]  }
 0xa4c   : > { %7950 = vmatprep.subr.bf16.mxu0 %v9034_v55  ;;  %v9096_v55 = vld [vmem:[#allocation16 + $0x798] ss:$12 sps:$4 sm:$0xff]  }
 0xa4d   : > { %6759 = vmatpush2.bf16.msra.mxu1 %v9031_v15  ;;  %v9103_v15 = vld [vmem:[#allocation16 + $0x784] ss:$12 sps:$4 sm:$0xff]  }
 0xa4e   : > { %6760 = vmatprep.subr.bf16.mxu1 %v9038_v56  ;;  %v9100_v56 = vld [vmem:[#allocation16 + $0x620] ss:$12 sps:$4 sm:$0xff]  }
 0xa4f   : > { %7951 = vmatpush3.bf16.msra.mxu0 %v9035_v41  ;;  %v9104_v41 = vld [vmem:[#allocation16 + $0x6c8] ss:$12 sps:$4 sm:$0xff]  }
 0xa50   : > { %7952 = vmatprep.subr.bf16.mxu0 %v9039_v57  ;;  %v9101_v57 = vld [vmem:[#allocation16 + $0x780] ss:$12 sps:$4 sm:$0xff]  }
 0xa51   : > { %6761 = vmatpush2.bf16.msra.mxu1 %v9036_v58  ;;  %v9108_v58 = vld [vmem:[#allocation16 + $0x8ec] ss:$12 sps:$4 sm:$0xff]  }
 0xa52   : > { %6762 = vmatprep.subr.bf16.mxu1 %v9043_v60  ;;  %v9105_v60 = vld [vmem:[#allocation16 + $0x608] ss:$12 sps:$4 sm:$0xff]  }
 0xa53   : > { %7953 = vmatpush3.bf16.msra.mxu0 %v9040_v61  ;;  %v9106_v61 = vld [vmem:[#allocation16 + $0x8e8] ss:$12 sps:$4 sm:$0xff]  }
 0xa54   : > { %7954 = vmatprep.subr.bf16.mxu0 %v9044_v62  ;;  %v9111_v62 = vld [vmem:[#allocation16 + $0x8d4] ss:$12 sps:$4 sm:$0xff]  }
 0xa55   : > { %6763 = vmatpush2.bf16.msra.mxu1 %v9041_v36  ;;  %v9109_v36 = vld [vmem:[#allocation16 + $0x8d0] ss:$12 sps:$4 sm:$0xff]  }
 0xa56   : > { %6764 = vmatprep.subr.bf16.mxu1 %v9048_v63 }
 0xa57   : > { %7955 = vmatpush3.bf16.msra.mxu0 %v9045_v1  ;;  %v9114_v1 = vld [vmem:[#allocation16 + $0x8bc] ss:$12 sps:$4 sm:$0xff]  }
 0xa58   : > { %7956 = vmatprep.subr.bf16.mxu0 %v9049_v2 }
 0xa59   : > { %6765 = vmatpush2.bf16.msra.mxu1 %v9046_v42 }
 0xa5a   : > { %6766 = vmatprep.subr.bf16.mxu1 %v9053_v4  ;;  %v9112_v4 = vld [vmem:[#allocation16 + $0x8b8] ss:$12 sps:$4 sm:$0xff]  }
 0xa5b   : > { %7957 = vmatpush3.bf16.msra.mxu0 %v9050_v35 }
 0xa5c   : > { %7958 = vmatprep.subr.bf16.mxu0 %v9054_v47  ;;  %v9117_v47 = vld [vmem:[#allocation16 + $0x8a4] ss:$12 sps:$4 sm:$0xff]  }
 0xa5d   : > { %6767 = vmatpush2.bf16.msra.mxu1 %v9051_v5 }
 0xa5e   : > { %6768 = vmatprep.subr.bf16.mxu1 %v9058_v37  ;;  %v9115_v37 = vld [vmem:[#allocation16 + $0x8a0] ss:$12 sps:$4 sm:$0xff]  }
 0xa5f   : > { %7959 = vmatpush3.bf16.msra.mxu0 %v9055_v6  ;;  %v9120_v6 = vld [vmem:[#allocation16 + $0x88c] ss:$12 sps:$4 sm:$0xff]  }
 0xa60   : > { %7960 = vmatprep.subr.bf16.mxu0 %v9059_v7  ;;  %v9118_v7 = vld [vmem:[#allocation16 + $0x888] ss:$12 sps:$4 sm:$0xff]  }
 0xa61   : > { %6769 = vmatpush2.bf16.msra.mxu1 %v9056_v8  ;;  %v9123_v8 = vld [vmem:[#allocation16 + $0x874] ss:$12 sps:$4 sm:$0xff]  }
 0xa62   : > { %6770 = vmatprep.subr.bf16.mxu1 %v9063_v9  ;;  %v9121_v9 = vld [vmem:[#allocation16 + $0x870] ss:$12 sps:$4 sm:$0xff]  }
 0xa63   : > { %7961 = vmatpush3.bf16.msra.mxu0 %v9060_v11  ;;  %v9126_v11 = vld [vmem:[#allocation16 + $0x85c] ss:$12 sps:$4 sm:$0xff]  }
 0xa64   : > { %6781 = vmatprep.subr.bf16.mxu0 %v9066_v12  ;;  %v9124_v12 = vld [vmem:[#allocation16 + $0x858] ss:$12 sps:$4 sm:$0xff]  }
 0xa65   : > { %6771 = vmatpush2.bf16.msra.mxu1 %v9061_v13  ;;  %v9129_v13 = vld [vmem:[#allocation16 + $0x844] ss:$12 sps:$4 sm:$0xff]  }
 0xa66   : > { %6072 = vmatmul.mubr.bf16.vlgmr.msra.gmra.mxu0 %v10125_v23  ;;  %7968 = vmatprep.subr.bf16.mxu1 %v9069_v17  ;;  %v9094_v23 = vld [vmem:[#allocation16 + $0x6f8] ss:$12 sps:$4 sm:$0xff]   ;;  %v9130_v17 = vld [vmem:[#allocation16 + $0x8f0] ss:$12 sps:$4 sm:$0xff]  }
 0xa67   : > { %6782 = vmatpush1.bf16.msra.mxu0 %v9064_v20  ;;  %6813 = vmatprep.mubr.bf16.mxu0 %v10135_v22  ;;  %v9131_v20 = vld [vmem:[#allocation16 + $0x830] ss:$12 sps:$4 sm:$0xff]  }
 0xa68   : > { %6773 = vmatmul.mubr.bf16.vlgmr.msra.gmra.mxu1 %v10137_v25  ;;  %v10142_v27 = vpop.f32.mrf.mxu1  ;;  %6783 = vmatprep.subr.bf16.mxu0 %v9073_v21  ;;  %v6222_v21 = vrot.slane %v7738_v16, 1 }
 0xa69   : > { %7969 = vmatpush3.bf16.msra.mxu1 %v9070_v24  ;;  %6854 = vmatprep.mubr.bf16.mxu1 %v10119_v10  ;;  %v9085_v10 = vld [vmem:[#allocation16 + $0x668] ss:$12 sps:$4 sm:$0xff]   ;;  %v9132_v24 = vld [vmem:[#allocation16 + $0x8d8] ss:$12 sps:$4 sm:$0xff]  }
 0xa6a   : > { %v10145_v31 = vpop.f32.mrf.mxu1  ;;  %7970 = vmatprep.subr.bf16.mxu1 %v9074_v26 }
 0xa6b   : > { %6784 = vmatpush1.bf16.msra.mxu0 %v9071_v38  ;;  %v9133_v38 = vld [vmem:[#allocation16 + $0x818] ss:$12 sps:$4 sm:$0xff]  }
 0xa6c   : > { %v5267_v34 = vpop.f32.mrf.mxu1  ;;  %6785 = vmatprep.subr.bf16.mxu0 %v9078_v30 }
 0xa6d   : > { %7971 = vmatpush3.bf16.msra.mxu1 %v9075_v28  ;;  %v9134_v28 = vld [vmem:[#allocation16 + $0x8c0] ss:$12 sps:$4 sm:$0xff]  }
 0xa6e   : > { %v5268_v39 = vpop.f32.mrf.mxu1  ;;  %7972 = vmatprep.subr.bf16.mxu1 %v9079_v32 }
 0xa6f   : > { %6786 = vmatpush1.bf16.msra.mxu0 %v9076_v33  ;;  %v9135_v33 = vld [vmem:[#allocation16 + $0x800] ss:$12 sps:$4 sm:$0xff]   ;;  %v9138_v39 = vld [vmem:[#allocation16 + $0x890] ss:$12 sps:$4 sm:$0xff]  }
 0xa70   : > { %6787 = vmatprep.subr.bf16.mxu0 %v9083_v40  ;;  %v9136_v40 = vld [vmem:[#allocation16 + $0x8a8] ss:$12 sps:$4 sm:$0xff]  }
 0xa71   : > { %7973 = vmatpush3.bf16.msra.mxu1 %v9080_v19  ;;  %v9137_v19 = vld [vmem:[#allocation16 + $0x7e8] ss:$12 sps:$4 sm:$0xff]  }
 0xa72   : > { %7974 = vmatprep.subr.bf16.mxu1 %v9084_v45  ;;  %v9141_v45 = vld [vmem:[#allocation16 + $0x7b8] ss:$12 sps:$4 sm:$0xff]  }
 0xa73   : > { %6788 = vmatpush1.bf16.msra.mxu0 %v9081_v48  ;;  %v9142_v48 = vld [vmem:[#allocation16 + $0x860] ss:$12 sps:$4 sm:$0xff]  }
 0xa74   : > { %6789 = vmatprep.subr.bf16.mxu0 %v9088_v49  ;;  %v9144_v49 = vld [vmem:[#allocation16 + $0x848] ss:$12 sps:$4 sm:$0xff]  }
 0xa75   : > { %7975 = vmatpush3.bf16.msra.mxu1 %v9085_v10  ;;  %v9145_v10 = vld [vmem:[#allocation16 + $0x788] ss:$12 sps:$4 sm:$0xff]  }
 0xa76   : > { %7976 = vmatprep.subr.bf16.mxu1 %v9089_v50 }
 0xa77   : > { %6790 = vmatpush1.bf16.msra.mxu0 %v9086_v18 }
 0xa78   : > { %6791 = vmatprep.subr.bf16.mxu0 %v9093_v59 }
 0xa79   : > { %7977 = vmatpush3.bf16.msra.mxu1 %v9090_v51 }
 0xa7a   : > { %7978 = vmatprep.subr.bf16.mxu1 %v9094_v23 }
 0xa7b   : > { %6792 = vmatpush1.bf16.msra.mxu0 %v9091_v52 }
 0xa7c   : > { %6793 = vmatprep.subr.bf16.mxu0 %v9098_v54 }
 0xa7d   : > { %7979 = vmatpush3.bf16.msra.mxu1 %v9095_v0 }
 0xa7e   : > { %7980 = vmatprep.subr.bf16.mxu1 %v9099_v29 }
 0xa7f   : > { %6794 = vmatpush1.bf16.msra.mxu0 %v9096_v55 }
 0xa80   : > { %6795 = vmatprep.subr.bf16.mxu0 %v9103_v15 }
 0xa81   : > { %7981 = vmatpush3.bf16.msra.mxu1 %v9100_v56 }
 0xa82   : > { %7982 = vmatprep.subr.bf16.mxu1 %v9104_v41 }
 0xa83   : > { %6796 = vmatpush1.bf16.msra.mxu0 %v9101_v57 }
 0xa84   : > { %6797 = vmatprep.subr.bf16.mxu0 %v9108_v58 }
 0xa85   : > { %7983 = vmatpush3.bf16.msra.mxu1 %v9105_v60 }
 0xa87   : > { %6798 = vmatpush2.bf16.msra.mxu0 %v9106_v61 }
 0xa88   : > { %v7896_v63 = vpop.f32.mrf.mxu1  ;;  %6855 = vmatmul.mubr.bf16.vlgmr.msra.gmra.mxu1 %v10137_v25  ;;  %6799 = vmatprep.subr.bf16.mxu0 %v9111_v62 }
 0xa8a   : > { %v7897_v2 = vpop.f32.mrf.mxu1 }
 0xa8b   : > { %v10148_v42 = vadd.f32 %v7897_v2, %v7896_v63  ;;  %6800 = vmatpush2.bf16.msra.mxu0 %v9109_v36 }
 0xa8c   : > { %v7899_v35 = vpop.f32.mrf.mxu1  ;;  %6801 = vmatprep.subr.bf16.mxu0 %v9114_v1 }
 0xa8e   : > { %v7900_v5 = vpop.f32.mrf.mxu1 }
 0xa8f   : > { %6802 = vmatpush2.bf16.msra.mxu0 %v9112_v4 }
 0xa90   : > { %6803 = vmatprep.subr.bf16.mxu0 %v9117_v47 }
 0xa93   : > { %6804 = vmatpush2.bf16.msra.mxu0 %v9115_v37 }
 0xa94   : > { %6805 = vmatprep.subr.bf16.mxu0 %v9120_v6 }
 0xa97   : > { %6806 = vmatpush2.bf16.msra.mxu0 %v9118_v7 }
 0xa98   : > { %6807 = vmatprep.subr.bf16.mxu0 %v9123_v8 }
 0xa9b   : > { %6808 = vmatpush2.bf16.msra.mxu0 %v9121_v9 }
 0xa9c   : > { %6809 = vmatprep.subr.bf16.mxu0 %v9126_v11 }
 0xa9f   : > { %6810 = vmatpush2.bf16.msra.mxu0 %v9124_v12 }
 0xaa0   : > { %6811 = vmatprep.subr.bf16.mxu0 %v9129_v13 }
 0xaa3   : > { %6812 = vmatpush2.bf16.msra.mxu0 %v9127_v14 }
 0xaa4   : > { %7990 = vmatprep.subr.bf16.mxu0 %v9130_v17 }
 0xaa6   : > { %6814 = vmatmul.mubr.bf16.vlgmr.msra.gmra.mxu0 %v6222_v21  ;;  %v5304_v25 = vpop.f32.mrf.mxu0 }
 0xaa7   : > { %v5305_v26 = vadd.f32 %v5304_v25, %v10142_v27  ;;  %7991 = vmatpush3.bf16.msra.mxu0 %v9131_v20  ;;  %6894 = vmatprep.mubr.bf16.mxu0 %v10135_v22  ;;  %v9139_v27 = vld [vmem:[#allocation16 + $0x7d0] ss:$12 sps:$4 sm:$0xff]   ;;  %v9140_v22 = vld [vmem:[#allocation16 + $0x878] ss:$12 sps:$4 sm:$0xff]   ;;  %v6905_v20 = vld [vmem:[#allocation23] sm:$0x7] }
 0xaa8   : > { %v5306_v30 = vpop.f32.mrf.mxu0  ;;  %7992 = vmatprep.subr.bf16.mxu0 %v9132_v24  ;;  %v6910_v25 = vrot.slane %v6905_v20, %v9948_v44 }
 0xaa9   : > { %v5307_v53 = vadd.f32 %v5306_v30, %v10145_v31  ;;  %v9143_v31 = vld [vmem:[#allocation16 + $0x7a0] ss:$12 sps:$4 sm:$0xff]  }
 0xaaa   : > { %v5308_v32 = vpop.f32.mrf.mxu0 }
 0xaab   : > { %7993 = vmatpush3.bf16.msra.mxu0 %v9133_v38 }
 0xaac   : > { %v5309_v34 = vpop.f32.mrf.mxu0  ;;  %7994 = vmatprep.subr.bf16.mxu0 %v9134_v28  ;;  %v6914_v28 = vrot.slane %v6905_v20, %v9951_v46  ;;  %v6918_v46 = vrot.slane %v6905_v20, %v4378_v3 }
 0xaaf   : > { %7995 = vmatpush3.bf16.msra.mxu0 %v9135_v33 }
 0xab0   : > { %7996 = vmatprep.subr.bf16.mxu0 %v9136_v40 }
 0xab3   : > { %7997 = vmatpush3.bf16.msra.mxu0 %v9137_v19 }
 0xab4   : > { %7998 = vmatprep.subr.bf16.mxu0 %v9138_v39 }
 0xab7   : > { %7999 = vmatpush3.bf16.msra.mxu0 %v9139_v27 }
 0xab8   : > { %8000 = vmatprep.subr.bf16.mxu0 %v9140_v22 }
 0xabb   : > { %8001 = vmatpush3.bf16.msra.mxu0 %v9141_v45 }
 0xabc   : > { %8002 = vmatprep.subr.bf16.mxu0 %v9142_v48 }
 0xabf   : > { %8003 = vmatpush3.bf16.msra.mxu0 %v9143_v31 }
 0xac0   : > { %8004 = vmatprep.subr.bf16.mxu0 %v9144_v49 }
 0xac3   : > { %8005 = vmatpush3.bf16.msra.mxu0 %v9145_v10 }
 0xac6   : > { %v7918_v50 = vpop.f32.mrf.mxu0  ;;  %6895 = vmatmul.mubr.bf16.vlgmr.msra.gmra.mxu0 %v6222_v21 }
 0xac8   : > { %v7919_v18 = vpop.f32.mrf.mxu0  ;;  %v5951_v59 = vpop.f32.mrf.mxu1 }
 0xac9   : > { %v7920_v51 = vadd.f32 %v7919_v18, %v7918_v50  ;;  %v5952_v23 = vadd.f32 %v5951_v59, %v5305_v26 }
 0xaca   : > { %v7921_v52 = vpop.f32.mrf.mxu0  ;;  %v5953_v54 = vpop.f32.mrf.mxu1 }
 0xacb   : > { %v5386_v0 = vadd.f32 %v7920_v51, %v10148_v42  ;;  %v5954_v29 = vadd.f32 %v5953_v54, %v5307_v53 }
 0xacc   : > { %v7922_v55 = vpop.f32.mrf.mxu0  ;;  %v5955_v15 = vpop.f32.mrf.mxu1 }
 0xace   : > { %v5956_v56 = vpop.f32.mrf.mxu1 }
 0xae8   : > { %v7940_v41 = vpop.f32.mrf.mxu1 }
 0xaea   : > { %v7941_v57 = vpop.f32.mrf.mxu1 }
 0xaeb   : > { %v7942_v58 = vadd.f32 %v7941_v57, %v7940_v41 }
 0xaec   : > { %v7943_v60 = vpop.f32.mrf.mxu1 }
 0xaed   : > { %v6034_v61 = vadd.f32 %v7942_v58, %v5386_v0 }
 0xaee   : > { %v7944_v62 = vpop.f32.mrf.mxu1 }
 0xb06   : > { %v5992_v36 = vpop.f32.mrf.mxu0 }
 0xb07   : > { %v5993_v63 = vadd.f32 %v5992_v36, %v5952_v23 }
 0xb08   : > { %v5994_v1 = vpop.f32.mrf.mxu0 }
 0xb09   : > { %v5995_v2 = vadd.f32 %v5994_v1, %v5954_v29 }
 0xb0a   : > { %v5996_v4 = vpop.f32.mrf.mxu0 }
 0xb0c   : > { %v5997_v35 = vpop.f32.mrf.mxu0 }
 0xb26   : > { %v7962_v47 = vpop.f32.mrf.mxu0 }
 0xb28   : > { %v7963_v5 = vpop.f32.mrf.mxu0  ;;  %v6774_v42 = vpop.f32.mrf.mxu1 }
 0xb29   : > { %v7964_v37 = vadd.f32 %v7963_v5, %v7962_v47 }
 0xb2a   : > { %v7965_v6 = vpop.f32.mrf.mxu0  ;;  %v6776_v7 = vpop.f32.mrf.mxu1 }
 0xb2b   : > { %v6074_v8 = vadd.f32 %v7964_v37, %v6034_v61 }
 0xb2c   : > { %v7966_v9 = vpop.f32.mrf.mxu0  ;;  %v6778_v11 = vpop.f32.mrf.mxu1 }
 0xb2e   : > { %v6779_v12 = vpop.f32.mrf.mxu1 }
 0xb48   : > { %v7984_v13 = vpop.f32.mrf.mxu1 }
 0xb4a   : > { %v7985_v14 = vpop.f32.mrf.mxu1 }
 0xb4b   : > { %v7986_v27 = vadd.f32 %v7985_v14, %v7984_v13 }
 0xb4c   : > { %v7987_v16 = vpop.f32.mrf.mxu1 }
 0xb4e   : > { %v7988_v17 = vpop.f32.mrf.mxu1 }
 0xb66   : > { %v6815_v21 = vpop.f32.mrf.mxu0 }
 0xb67   : > { %v6816_v24 = vadd.f32 %v6815_v21, %v6774_v42 }
 0xb68   : > { %v6817_v26 = vpop.f32.mrf.mxu0 }
 0xb69   : > { %v6902_v38 = vadd.f32 %v6816_v24, %v5993_v63  ;;  %v6818_v30 = vadd.f32 %v6817_v26, %v6776_v7 }
 0xb6a   : > { %v6819_v53 = vpop.f32.mrf.mxu0 }
 0xb6b   : > { %v6922_v32 = vadd.f32 %v6910_v25, %v6902_v38  ;;  %v6903_v33 = vadd.f32 %v6818_v30, %v5995_v2 }
 0xb6c   : > { %v6820_v34 = vpop.f32.mrf.mxu0 }
 0xb6d   : > { %6925 = vst [vmem:[%s605_s24] sm:$0x3f] %v6922_v32  ;;  %v6923_v40 = vadd.f32 %v6914_v28, %v6903_v33 }
 0xb6f   : > { %6926 = vst [vmem:[%s605_s24 + $0x8] sm:$0x3f] %v6923_v40 }
 0xb86   : > { %v8006_v19 = vpop.f32.mrf.mxu0 }
 0xb88   : > { %v8007_v39 = vpop.f32.mrf.mxu0 }
 0xb89   : > { %v8008_v44 = vadd.f32 %v8007_v39, %v8006_v19 }
 0xb8a   : > { %v8009_v22 = vpop.f32.mrf.mxu0 }
 0xb8b   : > { %v6897_v45 = vadd.f32 %v8008_v44, %v7986_v27 }
 0xb8c   : > { %v8010_v48 = vpop.f32.mrf.mxu0 }
 0xb8d   : > { %v6904_v31 = vadd.f32 %v6897_v45, %v6074_v8 }
 0xb8f   : > { %v6924_v49 = vadd.f32 %v6918_v46, %v6904_v31 }
 0xb91   : > { %6927 = vst [vmem:[%s605_s24 + $0x10] sm:$0x3f] %v6924_v49 }
 0xb92 PF: > { %s30_s25 = sadd.s32 1, %s9498_s25  }
 0xb93   : > { %p27_p6 = scmp.ge.s32.totalorder %s30_s25, 4  }
 0xb95   :  { %29 = sbr.rel (!%p27_p6) target bundleno = 7 (0x7), region = 165 }
 0xb9a   :  { %6949 = vsyncpa [#allocation7], 1 }
 0xb9b   :  { %6951 = vsyncpa [#allocation7 + $0x1], 1 }
 0xb9c   :  { %6952 = vsyncpa [#allocation9], 1 }
 0xb9d   :  { %6953 = vsyncpa [#allocation12], 1 }
 0xb9e   :  { %6954 = vsyncpa [#allocation15], 1 }
 0xb9f   :  { %6955 = vsyncpa [#allocation18], 1 }
 0xba0   :  { %6956 = vsyncpa [#allocation21], 1 }
 0xba1   :  { %6957 = vsyncpa [#allocation24], 1 }

</bundles_post_ra>
